<compile_context>
chip_gen: v7x
topology: tpu7x:2x2x1
jax: 0.10.0
libtpu: 0.0.40
codegen_flags: <defaults>
</compile_context>

<pallas_src>
import numpy as np
import jax
import jax.numpy as jnp
from jax.experimental import pallas as pl
from jax.experimental.pallas import tpu as pltpu

EPS = 1e-5

# Static extents implied by input length 64.
_T1, _P1 = 62, 31        # conv1 out, pool1 out
_T2, _P2 = 29, 14        # conv2 out, pool2 out (floor drops the last row)
_T3, _P3 = 14, 7         # conv3 out, pool3 out
_C1, _C2, _C3 = 32, 64, 128
_NOUT, _NPAD = 257, 384  # true FC width, lane-dense padded width (3*128)


def _round_up(x, m):
    return ((x + m - 1) // m) * m


def kpca_cnn_kernel(p1_ref, w1_ref, w2_ref, w3_ref, wfc_ref, aff_ref, bfc_ref,
                    out_ref):
    """One batch tile.  p1_ref: (62, Bt, 5) conv1 im2col; out_ref: (Bt, 384)."""
    f32 = jnp.float32
    bt = out_ref.shape[0]

    def pool(c, n_pairs):
        # MaxPool1d(kernel=2, stride=2, floor) along the leading time axis.
        # Pure VPU: pairwise max of full (Bt, C) slabs, stacked back on time.
        return jnp.stack(
            [jnp.maximum(c[2 * i], c[2 * i + 1]) for i in range(n_pairs)],
            axis=0)

    def affine_relu(a, row, c):
        # Folded (conv bias + eval-mode BatchNorm) affine, then ReLU.
        s = aff_ref[row:row + 1, 0:c]        # (1, c) scale
        h = aff_ref[row + 1:row + 2, 0:c]    # (1, c) shift
        return jnp.maximum(a * s + h, 0.0)

    def pad_time(a, c):
        z = jnp.zeros((1, bt, c), f32)
        return jnp.concatenate([z, a, z], axis=0)

    # ---- conv1 (Cin=1): single im2col matmul (62*Bt, 5) @ (5, 32)
    c1 = jnp.dot(p1_ref[...].reshape(_T1 * bt, 5), w1_ref[...],
                 preferred_element_type=f32).reshape(_T1, bt, _C1)
    a1 = pad_time(affine_relu(pool(c1, _P1), 0, _C1), _C1)       # (33, Bt, 32)

    # ---- conv2: 5 taps, each one big matmul (29*Bt, 32) @ (32, 64)
    acc2 = jnp.zeros((_T2 * bt, _C2), f32)
    for k in range(5):
        acc2 = acc2 + jnp.dot(a1[k:k + _T2].reshape(_T2 * bt, _C1), w2_ref[k],
                              preferred_element_type=f32)
    c2 = acc2.reshape(_T2, bt, _C2)
    a2 = pad_time(affine_relu(pool(c2, _P2), 2, _C2), _C2)       # (16, Bt, 64)

    # ---- conv3: 3 taps, each (14*Bt, 64) @ (64, 128)
    acc3 = jnp.zeros((_T3 * bt, _C3), f32)
    for k in range(3):
        acc3 = acc3 + jnp.dot(a2[k:k + _T3].reshape(_T3 * bt, _C2), w3_ref[k],
                              preferred_element_type=f32)
    c3 = acc3.reshape(_T3, bt, _C3)
    a3 = affine_relu(pool(c3, _P3), 4, _C3)                      # (7, Bt, 128)

    # ---- fc: torch (C, L) flatten order handled by the pre-permuted weight.
    # Lane-concat the 7 time slabs -> (Bt, 896), one lane-dense matmul -> (Bt, 384).
    flat = jnp.concatenate([a3[l] for l in range(_P3)], axis=1)
    out_ref[...] = (jnp.dot(flat, wfc_ref[...], preferred_element_type=f32)
                    + bfc_ref[...])


def kpca_cnn_forward(x, params, *, block_b=128):
    """x: (B, 1, 64) float32 (PyTorch NCL). Returns (B, 257) float32."""
    B = x.shape[0]
    bt = _round_up(min(block_b, _round_up(B, 8)), 8)   # batch tile, multiple of 8
    b_pad = _round_up(B, bt)
    n_blocks = b_pad // bt

    # ---- fold conv bias + eval-mode BatchNorm into one per-channel affine.
    # The conv bias is per-channel, so it commutes with MaxPool and folds into
    # the BN shift:  bn(pool(conv)+b) = scale*pool(conv) + (scale*b + shift).
    # TODO(synk): training-mode batch statistics not implemented (eval only).
    def fold(bn, b_conv):
        scale = bn["gamma"] / jnp.sqrt(bn["var"] + EPS)
        shift = bn["beta"] - bn["mean"] * scale + b_conv * scale
        return scale, shift

    s1, h1 = fold(params["bn1"], params["b1"])
    s2, h2 = fold(params["bn2"], params["b2"])
    s3, h3 = fold(params["bn3"], params["b3"])
    aff = jnp.zeros((6, 128), jnp.float32)
    aff = aff.at[0, :_C1].set(s1).at[1, :_C1].set(h1)
    aff = aff.at[2, :_C2].set(s2).at[3, :_C2].set(h2)
    aff = aff.at[4, :_C3].set(s3).at[5, :_C3].set(h3)

    # ---- conv1 im2col in the wrapper: P[t, b, k] = xpad[b, t + k]
    xb = jnp.pad(x[:, 0, :], ((0, b_pad - B), (1, 1)))               # (b_pad, 66)
    patches = jnp.stack([xb[:, k:k + _T1] for k in range(5)], axis=-1)
    patches = jnp.transpose(patches, (1, 0, 2))                       # (62, b_pad, 5)

    # ---- weight layouts: conv weights (K, Cin, Cout); FC weight permuted so
    # row index = l*128 + c matches the kernel's lane-concat order, padded to 384.
    w1m = jnp.transpose(params["W1"][:, 0, :], (1, 0))                # (5, 32)
    w2k = jnp.transpose(params["W2"], (2, 1, 0))                      # (5, 32, 64)
    w3k = jnp.transpose(params["W3"], (2, 1, 0))                      # (3, 64, 128)
    wfc = jnp.transpose(params["Wfc"].reshape(_NOUT, _C3, _P3),
                        (2, 1, 0)).reshape(_C3 * _P3, _NOUT)
    wfc = jnp.pad(wfc, ((0, 0), (0, _NPAD - _NOUT)))                  # (896, 384)
    bfc = jnp.pad(params["bfc"], ((0, _NPAD - _NOUT),))[None, :]      # (1, 384)

    grid_spec = pltpu.PrefetchScalarGridSpec(
        num_scalar_prefetch=0,
        grid=(n_blocks,),
        in_specs=[
            pl.BlockSpec((_T1, bt, 5), lambda i: (0, i, 0)),          # im2col input
            pl.BlockSpec((5, _C1), lambda i: (0, 0)),                 # conv1 weight
            pl.BlockSpec((5, _C1, _C2), lambda i: (0, 0, 0)),         # conv2 weight
            pl.BlockSpec((3, _C2, _C3), lambda i: (0, 0, 0)),         # conv3 weight
            pl.BlockSpec((_C3 * _P3, _NPAD), lambda i: (0, 0)),       # fc weight
            pl.BlockSpec((6, 128), lambda i: (0, 0)),                 # packed affines
            pl.BlockSpec((1, _NPAD), lambda i: (0, 0)),               # fc bias
        ],
        out_specs=pl.BlockSpec((bt, _NPAD), lambda i: (i, 0)),
    )

    out = pl.pallas_call(
        kpca_cnn_kernel,
        out_shape=jax.ShapeDtypeStruct((b_pad, _NPAD), jnp.float32),
        grid_spec=grid_spec,
        compiler_params=pltpu.CompilerParams(
            dimension_semantics=("parallel",),          # megacore split on v7x
            vmem_limit_bytes=32 * 1024 * 1024),         # covers v5e's 16MiB default
    )(patches, w1m, w2k, w3k, wfc, aff, bfc)
    return out[:B, :_NOUT]


# ----------------------------- pure-JAX reference -----------------------------
def reference_forward(x, params):
    def conv1d(x, w, b, pad):
        y = jax.lax.conv_general_dilated(
            x, w, window_strides=(1,), padding=[(pad, pad)],
            dimension_numbers=("NCH", "OIH", "NCH"),
            precision=jax.lax.Precision.HIGHEST)
        return y + b[None, :, None]

    def maxpool(x):
        B, C, L = x.shape
        Lp = (L // 2) * 2
        return jnp.max(x[:, :, :Lp].reshape(B, C, Lp // 2, 2), axis=-1)

    def bn(x, p):
        return ((x - p["mean"][None, :, None])
                / jnp.sqrt(p["var"][None, :, None] + EPS)
                * p["gamma"][None, :, None] + p["beta"][None, :, None])

    out = jax.nn.relu(bn(maxpool(conv1d(x, params["W1"], params["b1"], 1)), params["bn1"]))
    out = jax.nn.relu(bn(maxpool(conv1d(out, params["W2"], params["b2"], 1)), params["bn2"]))
    out = jax.nn.relu(bn(maxpool(conv1d(out, params["W3"], params["b3"], 1)), params["bn3"]))
    out = out.reshape(out.shape[0], -1)
    return (jnp.dot(out, params["Wfc"].T, precision=jax.lax.Precision.HIGHEST)
            + params["bfc"][None, :])


# ----------------------------- parameter init ---------------------------------
def init_params(key):
    ks = jax.random.split(key, 8)

    def w(k, shape, fan_in):
        return jax.random.normal(k, shape, jnp.float32) / np.sqrt(fan_in)

    def bn_params(c):
        # PyTorch-default BatchNorm1d params, applied in eval (inference) mode.
        return dict(gamma=jnp.ones((c,), jnp.float32),
                    beta=jnp.zeros((c,), jnp.float32),
                    mean=jnp.zeros((c,), jnp.float32),
                    var=jnp.ones((c,), jnp.float32))

    return dict(
        W1=w(ks[0], (32, 1, 5), 5),
        b1=0.05 * jax.random.normal(ks[1], (32,), jnp.float32),
        W2=w(ks[2], (64, 32, 5), 32 * 5),
        b2=0.05 * jax.random.normal(ks[3], (64,), jnp.float32),
        W3=w(ks[4], (128, 64, 3), 64 * 3),
        b3=0.05 * jax.random.normal(ks[5], (128,), jnp.float32),
        Wfc=w(ks[6], (257, 896), 896),
        bfc=0.05 * jax.random.normal(ks[7], (257,), jnp.float32),
        bn1=bn_params(32), bn2=bn_params(64), bn3=bn_params(128),
    )


if __name__ == "__main__":
    root = jax.random.PRNGKey(0)
    kx, kp = jax.random.split(root)

    # Input length 64 -> after the three conv/pool stages the flatten size is
    # 128 * 7 = 896, matching nn.Linear(896, 257).
    x = jax.random.normal(kx, (2, 1, 64), jnp.float32)
    params = init_params(kp)

    out = jax.block_until_ready(kpca_cnn_forward(x, params))
    ref = jax.block_until_ready(reference_forward(x, params))

    assert out.shape == (2, 257), out.shape
    np.testing.assert_allclose(np.asarray(out), np.asarray(ref),
                               rtol=1e-2, atol=1e-2)
    print("KERNEL_OK")
</pallas_src>

<mosaic_0001>
module attributes {stable_mosaic.version = 11 : i64} {
  func.func @kpca_cnn_kernel(%arg0: i32, %arg1: memref<62x8x5xf32, #tpu.memory_space<vmem>>, %arg2: memref<5x32xf32, #tpu.memory_space<vmem>>, %arg3: memref<5x32x64xf32, #tpu.memory_space<vmem>>, %arg4: memref<3x64x128xf32, #tpu.memory_space<vmem>>, %arg5: memref<896x384xf32, #tpu.memory_space<vmem>>, %arg6: memref<6x128xf32, #tpu.memory_space<vmem>>, %arg7: memref<1x384xf32, #tpu.memory_space<vmem>>, %arg8: memref<8x384xf32, #tpu.memory_space<vmem>>) attributes {dimension_semantics = [#tpu.dimension_semantics<parallel>], iteration_bounds = array<i64: 1>, scalar_prefetch = 0 : i64, scratch_operands = 0 : i64, tpu.core_type = #tpu.core_type<tc>, window_params = [{transform_indices = @transform_0, window_bounds = array<i64: 62, 8, 5>}, {pipeline_mode = #tpu.pipeline_mode<synchronous>, transform_indices = @transform_1, window_bounds = array<i64: 5, 32>}, {pipeline_mode = #tpu.pipeline_mode<synchronous>, transform_indices = @transform_2, window_bounds = array<i64: 5, 32, 64>}, {pipeline_mode = #tpu.pipeline_mode<synchronous>, transform_indices = @transform_3, window_bounds = array<i64: 3, 64, 128>}, {pipeline_mode = #tpu.pipeline_mode<synchronous>, transform_indices = @transform_4, window_bounds = array<i64: 896, 384>}, {pipeline_mode = #tpu.pipeline_mode<synchronous>, transform_indices = @transform_5, window_bounds = array<i64: 6, 128>}, {pipeline_mode = #tpu.pipeline_mode<synchronous>, transform_indices = @transform_6, window_bounds = array<i64: 1, 384>}, {transform_indices = @transform_7, window_bounds = array<i64: 8, 384>}]} {
    %c0 = arith.constant 0 : index
    %c0_0 = arith.constant 0 : index
    %c0_1 = arith.constant 0 : index
    %0 = vector.load %arg1[%c0, %c0_0, %c0_1] : memref<62x8x5xf32, #tpu.memory_space<vmem>>, vector<62x8x5xf32>
    %1 = vector.shape_cast %0 : vector<62x8x5xf32> to vector<496x5xf32>
    %c0_2 = arith.constant 0 : index
    %c0_3 = arith.constant 0 : index
    %2 = vector.load %arg2[%c0_2, %c0_3] : memref<5x32xf32, #tpu.memory_space<vmem>>, vector<5x32xf32>
    %cst = arith.constant dense<0.000000e+00> : vector<496x32xf32>
    %3 = tpu.matmul %1, %2, %cst {dimension_numbers = #tpu.dot_dimension_numbers<[1], [0], [0], [1], [0, 0, 1, 1], [], []>} : vector<496x5xf32>, vector<5x32xf32>, vector<496x32xf32> -> vector<496x32xf32>
    %4 = vector.shape_cast %3 : vector<496x32xf32> to vector<62x8x32xf32>
    %5 = vector.extract_strided_slice %4 {offsets = [0, 0, 0], sizes = [1, 8, 32], strides = [1, 1, 1]} : vector<62x8x32xf32> to vector<1x8x32xf32>
    %6 = vector.shape_cast %5 : vector<1x8x32xf32> to vector<8x32xf32>
    %7 = vector.extract_strided_slice %4 {offsets = [1, 0, 0], sizes = [1, 8, 32], strides = [1, 1, 1]} : vector<62x8x32xf32> to vector<1x8x32xf32>
    %8 = vector.shape_cast %7 : vector<1x8x32xf32> to vector<8x32xf32>
    %9 = arith.maximumf %6, %8 : vector<8x32xf32>
    %10 = vector.extract_strided_slice %4 {offsets = [2, 0, 0], sizes = [1, 8, 32], strides = [1, 1, 1]} : vector<62x8x32xf32> to vector<1x8x32xf32>
    %11 = vector.shape_cast %10 : vector<1x8x32xf32> to vector<8x32xf32>
    %12 = vector.extract_strided_slice %4 {offsets = [3, 0, 0], sizes = [1, 8, 32], strides = [1, 1, 1]} : vector<62x8x32xf32> to vector<1x8x32xf32>
    %13 = vector.shape_cast %12 : vector<1x8x32xf32> to vector<8x32xf32>
    %14 = arith.maximumf %11, %13 : vector<8x32xf32>
    %15 = vector.extract_strided_slice %4 {offsets = [4, 0, 0], sizes = [1, 8, 32], strides = [1, 1, 1]} : vector<62x8x32xf32> to vector<1x8x32xf32>
    %16 = vector.shape_cast %15 : vector<1x8x32xf32> to vector<8x32xf32>
    %17 = vector.extract_strided_slice %4 {offsets = [5, 0, 0], sizes = [1, 8, 32], strides = [1, 1, 1]} : vector<62x8x32xf32> to vector<1x8x32xf32>
    %18 = vector.shape_cast %17 : vector<1x8x32xf32> to vector<8x32xf32>
    %19 = arith.maximumf %16, %18 : vector<8x32xf32>
    %20 = vector.extract_strided_slice %4 {offsets = [6, 0, 0], sizes = [1, 8, 32], strides = [1, 1, 1]} : vector<62x8x32xf32> to vector<1x8x32xf32>
    %21 = vector.shape_cast %20 : vector<1x8x32xf32> to vector<8x32xf32>
    %22 = vector.extract_strided_slice %4 {offsets = [7, 0, 0], sizes = [1, 8, 32], strides = [1, 1, 1]} : vector<62x8x32xf32> to vector<1x8x32xf32>
    %23 = vector.shape_cast %22 : vector<1x8x32xf32> to vector<8x32xf32>
    %24 = arith.maximumf %21, %23 : vector<8x32xf32>
    %25 = vector.extract_strided_slice %4 {offsets = [8, 0, 0], sizes = [1, 8, 32], strides = [1, 1, 1]} : vector<62x8x32xf32> to vector<1x8x32xf32>
    %26 = vector.shape_cast %25 : vector<1x8x32xf32> to vector<8x32xf32>
    %27 = vector.extract_strided_slice %4 {offsets = [9, 0, 0], sizes = [1, 8, 32], strides = [1, 1, 1]} : vector<62x8x32xf32> to vector<1x8x32xf32>
    %28 = vector.shape_cast %27 : vector<1x8x32xf32> to vector<8x32xf32>
    %29 = arith.maximumf %26, %28 : vector<8x32xf32>
    %30 = vector.extract_strided_slice %4 {offsets = [10, 0, 0], sizes = [1, 8, 32], strides = [1, 1, 1]} : vector<62x8x32xf32> to vector<1x8x32xf32>
    %31 = vector.shape_cast %30 : vector<1x8x32xf32> to vector<8x32xf32>
    %32 = vector.extract_strided_slice %4 {offsets = [11, 0, 0], sizes = [1, 8, 32], strides = [1, 1, 1]} : vector<62x8x32xf32> to vector<1x8x32xf32>
    %33 = vector.shape_cast %32 : vector<1x8x32xf32> to vector<8x32xf32>
    %34 = arith.maximumf %31, %33 : vector<8x32xf32>
    %35 = vector.extract_strided_slice %4 {offsets = [12, 0, 0], sizes = [1, 8, 32], strides = [1, 1, 1]} : vector<62x8x32xf32> to vector<1x8x32xf32>
    %36 = vector.shape_cast %35 : vector<1x8x32xf32> to vector<8x32xf32>
    %37 = vector.extract_strided_slice %4 {offsets = [13, 0, 0], sizes = [1, 8, 32], strides = [1, 1, 1]} : vector<62x8x32xf32> to vector<1x8x32xf32>
    %38 = vector.shape_cast %37 : vector<1x8x32xf32> to vector<8x32xf32>
    %39 = arith.maximumf %36, %38 : vector<8x32xf32>
    %40 = vector.extract_strided_slice %4 {offsets = [14, 0, 0], sizes = [1, 8, 32], strides = [1, 1, 1]} : vector<62x8x32xf32> to vector<1x8x32xf32>
    %41 = vector.shape_cast %40 : vector<1x8x32xf32> to vector<8x32xf32>
    %42 = vector.extract_strided_slice %4 {offsets = [15, 0, 0], sizes = [1, 8, 32], strides = [1, 1, 1]} : vector<62x8x32xf32> to vector<1x8x32xf32>
    %43 = vector.shape_cast %42 : vector<1x8x32xf32> to vector<8x32xf32>
    %44 = arith.maximumf %41, %43 : vector<8x32xf32>
    %45 = vector.extract_strided_slice %4 {offsets = [16, 0, 0], sizes = [1, 8, 32], strides = [1, 1, 1]} : vector<62x8x32xf32> to vector<1x8x32xf32>
    %46 = vector.shape_cast %45 : vector<1x8x32xf32> to vector<8x32xf32>
    %47 = vector.extract_strided_slice %4 {offsets = [17, 0, 0], sizes = [1, 8, 32], strides = [1, 1, 1]} : vector<62x8x32xf32> to vector<1x8x32xf32>
    %48 = vector.shape_cast %47 : vector<1x8x32xf32> to vector<8x32xf32>
    %49 = arith.maximumf %46, %48 : vector<8x32xf32>
    %50 = vector.extract_strided_slice %4 {offsets = [18, 0, 0], sizes = [1, 8, 32], strides = [1, 1, 1]} : vector<62x8x32xf32> to vector<1x8x32xf32>
    %51 = vector.shape_cast %50 : vector<1x8x32xf32> to vector<8x32xf32>
    %52 = vector.extract_strided_slice %4 {offsets = [19, 0, 0], sizes = [1, 8, 32], strides = [1, 1, 1]} : vector<62x8x32xf32> to vector<1x8x32xf32>
    %53 = vector.shape_cast %52 : vector<1x8x32xf32> to vector<8x32xf32>
    %54 = arith.maximumf %51, %53 : vector<8x32xf32>
    %55 = vector.extract_strided_slice %4 {offsets = [20, 0, 0], sizes = [1, 8, 32], strides = [1, 1, 1]} : vector<62x8x32xf32> to vector<1x8x32xf32>
    %56 = vector.shape_cast %55 : vector<1x8x32xf32> to vector<8x32xf32>
    %57 = vector.extract_strided_slice %4 {offsets = [21, 0, 0], sizes = [1, 8, 32], strides = [1, 1, 1]} : vector<62x8x32xf32> to vector<1x8x32xf32>
    %58 = vector.shape_cast %57 : vector<1x8x32xf32> to vector<8x32xf32>
    %59 = arith.maximumf %56, %58 : vector<8x32xf32>
    %60 = vector.extract_strided_slice %4 {offsets = [22, 0, 0], sizes = [1, 8, 32], strides = [1, 1, 1]} : vector<62x8x32xf32> to vector<1x8x32xf32>
    %61 = vector.shape_cast %60 : vector<1x8x32xf32> to vector<8x32xf32>
    %62 = vector.extract_strided_slice %4 {offsets = [23, 0, 0], sizes = [1, 8, 32], strides = [1, 1, 1]} : vector<62x8x32xf32> to vector<1x8x32xf32>
    %63 = vector.shape_cast %62 : vector<1x8x32xf32> to vector<8x32xf32>
    %64 = arith.maximumf %61, %63 : vector<8x32xf32>
    %65 = vector.extract_strided_slice %4 {offsets = [24, 0, 0], sizes = [1, 8, 32], strides = [1, 1, 1]} : vector<62x8x32xf32> to vector<1x8x32xf32>
    %66 = vector.shape_cast %65 : vector<1x8x32xf32> to vector<8x32xf32>
    %67 = vector.extract_strided_slice %4 {offsets = [25, 0, 0], sizes = [1, 8, 32], strides = [1, 1, 1]} : vector<62x8x32xf32> to vector<1x8x32xf32>
    %68 = vector.shape_cast %67 : vector<1x8x32xf32> to vector<8x32xf32>
    %69 = arith.maximumf %66, %68 : vector<8x32xf32>
    %70 = vector.extract_strided_slice %4 {offsets = [26, 0, 0], sizes = [1, 8, 32], strides = [1, 1, 1]} : vector<62x8x32xf32> to vector<1x8x32xf32>
    %71 = vector.shape_cast %70 : vector<1x8x32xf32> to vector<8x32xf32>
    %72 = vector.extract_strided_slice %4 {offsets = [27, 0, 0], sizes = [1, 8, 32], strides = [1, 1, 1]} : vector<62x8x32xf32> to vector<1x8x32xf32>
    %73 = vector.shape_cast %72 : vector<1x8x32xf32> to vector<8x32xf32>
    %74 = arith.maximumf %71, %73 : vector<8x32xf32>
    %75 = vector.extract_strided_slice %4 {offsets = [28, 0, 0], sizes = [1, 8, 32], strides = [1, 1, 1]} : vector<62x8x32xf32> to vector<1x8x32xf32>
    %76 = vector.shape_cast %75 : vector<1x8x32xf32> to vector<8x32xf32>
    %77 = vector.extract_strided_slice %4 {offsets = [29, 0, 0], sizes = [1, 8, 32], strides = [1, 1, 1]} : vector<62x8x32xf32> to vector<1x8x32xf32>
    %78 = vector.shape_cast %77 : vector<1x8x32xf32> to vector<8x32xf32>
    %79 = arith.maximumf %76, %78 : vector<8x32xf32>
    %80 = vector.extract_strided_slice %4 {offsets = [30, 0, 0], sizes = [1, 8, 32], strides = [1, 1, 1]} : vector<62x8x32xf32> to vector<1x8x32xf32>
    %81 = vector.shape_cast %80 : vector<1x8x32xf32> to vector<8x32xf32>
    %82 = vector.extract_strided_slice %4 {offsets = [31, 0, 0], sizes = [1, 8, 32], strides = [1, 1, 1]} : vector<62x8x32xf32> to vector<1x8x32xf32>
    %83 = vector.shape_cast %82 : vector<1x8x32xf32> to vector<8x32xf32>
    %84 = arith.maximumf %81, %83 : vector<8x32xf32>
    %85 = vector.extract_strided_slice %4 {offsets = [32, 0, 0], sizes = [1, 8, 32], strides = [1, 1, 1]} : vector<62x8x32xf32> to vector<1x8x32xf32>
    %86 = vector.shape_cast %85 : vector<1x8x32xf32> to vector<8x32xf32>
    %87 = vector.extract_strided_slice %4 {offsets = [33, 0, 0], sizes = [1, 8, 32], strides = [1, 1, 1]} : vector<62x8x32xf32> to vector<1x8x32xf32>
    %88 = vector.shape_cast %87 : vector<1x8x32xf32> to vector<8x32xf32>
    %89 = arith.maximumf %86, %88 : vector<8x32xf32>
    %90 = vector.extract_strided_slice %4 {offsets = [34, 0, 0], sizes = [1, 8, 32], strides = [1, 1, 1]} : vector<62x8x32xf32> to vector<1x8x32xf32>
    %91 = vector.shape_cast %90 : vector<1x8x32xf32> to vector<8x32xf32>
    %92 = vector.extract_strided_slice %4 {offsets = [35, 0, 0], sizes = [1, 8, 32], strides = [1, 1, 1]} : vector<62x8x32xf32> to vector<1x8x32xf32>
    %93 = vector.shape_cast %92 : vector<1x8x32xf32> to vector<8x32xf32>
    %94 = arith.maximumf %91, %93 : vector<8x32xf32>
    %95 = vector.extract_strided_slice %4 {offsets = [36, 0, 0], sizes = [1, 8, 32], strides = [1, 1, 1]} : vector<62x8x32xf32> to vector<1x8x32xf32>
    %96 = vector.shape_cast %95 : vector<1x8x32xf32> to vector<8x32xf32>
    %97 = vector.extract_strided_slice %4 {offsets = [37, 0, 0], sizes = [1, 8, 32], strides = [1, 1, 1]} : vector<62x8x32xf32> to vector<1x8x32xf32>
    %98 = vector.shape_cast %97 : vector<1x8x32xf32> to vector<8x32xf32>
    %99 = arith.maximumf %96, %98 : vector<8x32xf32>
    %100 = vector.extract_strided_slice %4 {offsets = [38, 0, 0], sizes = [1, 8, 32], strides = [1, 1, 1]} : vector<62x8x32xf32> to vector<1x8x32xf32>
    %101 = vector.shape_cast %100 : vector<1x8x32xf32> to vector<8x32xf32>
    %102 = vector.extract_strided_slice %4 {offsets = [39, 0, 0], sizes = [1, 8, 32], strides = [1, 1, 1]} : vector<62x8x32xf32> to vector<1x8x32xf32>
    %103 = vector.shape_cast %102 : vector<1x8x32xf32> to vector<8x32xf32>
    %104 = arith.maximumf %101, %103 : vector<8x32xf32>
    %105 = vector.extract_strided_slice %4 {offsets = [40, 0, 0], sizes = [1, 8, 32], strides = [1, 1, 1]} : vector<62x8x32xf32> to vector<1x8x32xf32>
    %106 = vector.shape_cast %105 : vector<1x8x32xf32> to vector<8x32xf32>
    %107 = vector.extract_strided_slice %4 {offsets = [41, 0, 0], sizes = [1, 8, 32], strides = [1, 1, 1]} : vector<62x8x32xf32> to vector<1x8x32xf32>
    %108 = vector.shape_cast %107 : vector<1x8x32xf32> to vector<8x32xf32>
    %109 = arith.maximumf %106, %108 : vector<8x32xf32>
    %110 = vector.extract_strided_slice %4 {offsets = [42, 0, 0], sizes = [1, 8, 32], strides = [1, 1, 1]} : vector<62x8x32xf32> to vector<1x8x32xf32>
    %111 = vector.shape_cast %110 : vector<1x8x32xf32> to vector<8x32xf32>
    %112 = vector.extract_strided_slice %4 {offsets = [43, 0, 0], sizes = [1, 8, 32], strides = [1, 1, 1]} : vector<62x8x32xf32> to vector<1x8x32xf32>
    %113 = vector.shape_cast %112 : vector<1x8x32xf32> to vector<8x32xf32>
    %114 = arith.maximumf %111, %113 : vector<8x32xf32>
    %115 = vector.extract_strided_slice %4 {offsets = [44, 0, 0], sizes = [1, 8, 32], strides = [1, 1, 1]} : vector<62x8x32xf32> to vector<1x8x32xf32>
    %116 = vector.shape_cast %115 : vector<1x8x32xf32> to vector<8x32xf32>
    %117 = vector.extract_strided_slice %4 {offsets = [45, 0, 0], sizes = [1, 8, 32], strides = [1, 1, 1]} : vector<62x8x32xf32> to vector<1x8x32xf32>
    %118 = vector.shape_cast %117 : vector<1x8x32xf32> to vector<8x32xf32>
    %119 = arith.maximumf %116, %118 : vector<8x32xf32>
    %120 = vector.extract_strided_slice %4 {offsets = [46, 0, 0], sizes = [1, 8, 32], strides = [1, 1, 1]} : vector<62x8x32xf32> to vector<1x8x32xf32>
    %121 = vector.shape_cast %120 : vector<1x8x32xf32> to vector<8x32xf32>
    %122 = vector.extract_strided_slice %4 {offsets = [47, 0, 0], sizes = [1, 8, 32], strides = [1, 1, 1]} : vector<62x8x32xf32> to vector<1x8x32xf32>
    %123 = vector.shape_cast %122 : vector<1x8x32xf32> to vector<8x32xf32>
    %124 = arith.maximumf %121, %123 : vector<8x32xf32>
    %125 = vector.extract_strided_slice %4 {offsets = [48, 0, 0], sizes = [1, 8, 32], strides = [1, 1, 1]} : vector<62x8x32xf32> to vector<1x8x32xf32>
    %126 = vector.shape_cast %125 : vector<1x8x32xf32> to vector<8x32xf32>
    %127 = vector.extract_strided_slice %4 {offsets = [49, 0, 0], sizes = [1, 8, 32], strides = [1, 1, 1]} : vector<62x8x32xf32> to vector<1x8x32xf32>
    %128 = vector.shape_cast %127 : vector<1x8x32xf32> to vector<8x32xf32>
    %129 = arith.maximumf %126, %128 : vector<8x32xf32>
    %130 = vector.extract_strided_slice %4 {offsets = [50, 0, 0], sizes = [1, 8, 32], strides = [1, 1, 1]} : vector<62x8x32xf32> to vector<1x8x32xf32>
    %131 = vector.shape_cast %130 : vector<1x8x32xf32> to vector<8x32xf32>
    %132 = vector.extract_strided_slice %4 {offsets = [51, 0, 0], sizes = [1, 8, 32], strides = [1, 1, 1]} : vector<62x8x32xf32> to vector<1x8x32xf32>
    %133 = vector.shape_cast %132 : vector<1x8x32xf32> to vector<8x32xf32>
    %134 = arith.maximumf %131, %133 : vector<8x32xf32>
    %135 = vector.extract_strided_slice %4 {offsets = [52, 0, 0], sizes = [1, 8, 32], strides = [1, 1, 1]} : vector<62x8x32xf32> to vector<1x8x32xf32>
    %136 = vector.shape_cast %135 : vector<1x8x32xf32> to vector<8x32xf32>
    %137 = vector.extract_strided_slice %4 {offsets = [53, 0, 0], sizes = [1, 8, 32], strides = [1, 1, 1]} : vector<62x8x32xf32> to vector<1x8x32xf32>
    %138 = vector.shape_cast %137 : vector<1x8x32xf32> to vector<8x32xf32>
    %139 = arith.maximumf %136, %138 : vector<8x32xf32>
    %140 = vector.extract_strided_slice %4 {offsets = [54, 0, 0], sizes = [1, 8, 32], strides = [1, 1, 1]} : vector<62x8x32xf32> to vector<1x8x32xf32>
    %141 = vector.shape_cast %140 : vector<1x8x32xf32> to vector<8x32xf32>
    %142 = vector.extract_strided_slice %4 {offsets = [55, 0, 0], sizes = [1, 8, 32], strides = [1, 1, 1]} : vector<62x8x32xf32> to vector<1x8x32xf32>
    %143 = vector.shape_cast %142 : vector<1x8x32xf32> to vector<8x32xf32>
    %144 = arith.maximumf %141, %143 : vector<8x32xf32>
    %145 = vector.extract_strided_slice %4 {offsets = [56, 0, 0], sizes = [1, 8, 32], strides = [1, 1, 1]} : vector<62x8x32xf32> to vector<1x8x32xf32>
    %146 = vector.shape_cast %145 : vector<1x8x32xf32> to vector<8x32xf32>
    %147 = vector.extract_strided_slice %4 {offsets = [57, 0, 0], sizes = [1, 8, 32], strides = [1, 1, 1]} : vector<62x8x32xf32> to vector<1x8x32xf32>
    %148 = vector.shape_cast %147 : vector<1x8x32xf32> to vector<8x32xf32>
    %149 = arith.maximumf %146, %148 : vector<8x32xf32>
    %150 = vector.extract_strided_slice %4 {offsets = [58, 0, 0], sizes = [1, 8, 32], strides = [1, 1, 1]} : vector<62x8x32xf32> to vector<1x8x32xf32>
    %151 = vector.shape_cast %150 : vector<1x8x32xf32> to vector<8x32xf32>
    %152 = vector.extract_strided_slice %4 {offsets = [59, 0, 0], sizes = [1, 8, 32], strides = [1, 1, 1]} : vector<62x8x32xf32> to vector<1x8x32xf32>
    %153 = vector.shape_cast %152 : vector<1x8x32xf32> to vector<8x32xf32>
    %154 = arith.maximumf %151, %153 : vector<8x32xf32>
    %155 = vector.extract_strided_slice %4 {offsets = [60, 0, 0], sizes = [1, 8, 32], strides = [1, 1, 1]} : vector<62x8x32xf32> to vector<1x8x32xf32>
    %156 = vector.shape_cast %155 : vector<1x8x32xf32> to vector<8x32xf32>
    %157 = vector.extract_strided_slice %4 {offsets = [61, 0, 0], sizes = [1, 8, 32], strides = [1, 1, 1]} : vector<62x8x32xf32> to vector<1x8x32xf32>
    %158 = vector.shape_cast %157 : vector<1x8x32xf32> to vector<8x32xf32>
    %159 = arith.maximumf %156, %158 : vector<8x32xf32>
    %160 = vector.shape_cast %9 : vector<8x32xf32> to vector<1x8x32xf32>
    %161 = vector.shape_cast %14 : vector<8x32xf32> to vector<1x8x32xf32>
    %162 = vector.shape_cast %19 : vector<8x32xf32> to vector<1x8x32xf32>
    %163 = vector.shape_cast %24 : vector<8x32xf32> to vector<1x8x32xf32>
    %164 = vector.shape_cast %29 : vector<8x32xf32> to vector<1x8x32xf32>
    %165 = vector.shape_cast %34 : vector<8x32xf32> to vector<1x8x32xf32>
    %166 = vector.shape_cast %39 : vector<8x32xf32> to vector<1x8x32xf32>
    %167 = vector.shape_cast %44 : vector<8x32xf32> to vector<1x8x32xf32>
    %168 = vector.shape_cast %49 : vector<8x32xf32> to vector<1x8x32xf32>
    %169 = vector.shape_cast %54 : vector<8x32xf32> to vector<1x8x32xf32>
    %170 = vector.shape_cast %59 : vector<8x32xf32> to vector<1x8x32xf32>
    %171 = vector.shape_cast %64 : vector<8x32xf32> to vector<1x8x32xf32>
    %172 = vector.shape_cast %69 : vector<8x32xf32> to vector<1x8x32xf32>
    %173 = vector.shape_cast %74 : vector<8x32xf32> to vector<1x8x32xf32>
    %174 = vector.shape_cast %79 : vector<8x32xf32> to vector<1x8x32xf32>
    %175 = vector.shape_cast %84 : vector<8x32xf32> to vector<1x8x32xf32>
    %176 = vector.shape_cast %89 : vector<8x32xf32> to vector<1x8x32xf32>
    %177 = vector.shape_cast %94 : vector<8x32xf32> to vector<1x8x32xf32>
    %178 = vector.shape_cast %99 : vector<8x32xf32> to vector<1x8x32xf32>
    %179 = vector.shape_cast %104 : vector<8x32xf32> to vector<1x8x32xf32>
    %180 = vector.shape_cast %109 : vector<8x32xf32> to vector<1x8x32xf32>
    %181 = vector.shape_cast %114 : vector<8x32xf32> to vector<1x8x32xf32>
    %182 = vector.shape_cast %119 : vector<8x32xf32> to vector<1x8x32xf32>
    %183 = vector.shape_cast %124 : vector<8x32xf32> to vector<1x8x32xf32>
    %184 = vector.shape_cast %129 : vector<8x32xf32> to vector<1x8x32xf32>
    %185 = vector.shape_cast %134 : vector<8x32xf32> to vector<1x8x32xf32>
    %186 = vector.shape_cast %139 : vector<8x32xf32> to vector<1x8x32xf32>
    %187 = vector.shape_cast %144 : vector<8x32xf32> to vector<1x8x32xf32>
    %188 = vector.shape_cast %149 : vector<8x32xf32> to vector<1x8x32xf32>
    %189 = vector.shape_cast %154 : vector<8x32xf32> to vector<1x8x32xf32>
    %190 = vector.shape_cast %159 : vector<8x32xf32> to vector<1x8x32xf32>
    %191 = tpu.concatenate %160, %161, %162, %163, %164, %165, %166, %167, %168, %169, %170, %171, %172, %173, %174, %175 in 0 : vector<1x8x32xf32>, vector<1x8x32xf32>, vector<1x8x32xf32>, vector<1x8x32xf32>, vector<1x8x32xf32>, vector<1x8x32xf32>, vector<1x8x32xf32>, vector<1x8x32xf32>, vector<1x8x32xf32>, vector<1x8x32xf32>, vector<1x8x32xf32>, vector<1x8x32xf32>, vector<1x8x32xf32>, vector<1x8x32xf32>, vector<1x8x32xf32>, vector<1x8x32xf32> -> vector<16x8x32xf32>
    %192 = tpu.concatenate %176, %177, %178, %179, %180, %181, %182, %183, %184, %185, %186, %187, %188, %189, %190 in 0 : vector<1x8x32xf32>, vector<1x8x32xf32>, vector<1x8x32xf32>, vector<1x8x32xf32>, vector<1x8x32xf32>, vector<1x8x32xf32>, vector<1x8x32xf32>, vector<1x8x32xf32>, vector<1x8x32xf32>, vector<1x8x32xf32>, vector<1x8x32xf32>, vector<1x8x32xf32>, vector<1x8x32xf32>, vector<1x8x32xf32>, vector<1x8x32xf32> -> vector<15x8x32xf32>
    %193 = tpu.concatenate %191, %192 in 0 : vector<16x8x32xf32>, vector<15x8x32xf32> -> vector<31x8x32xf32>
    %c0_4 = arith.constant 0 : index
    %c0_5 = arith.constant 0 : index
    %194 = vector.load %arg6[%c0_4, %c0_5] : memref<6x128xf32, #tpu.memory_space<vmem>>, vector<1x32xf32>
    %c1 = arith.constant 1 : index
    %c0_6 = arith.constant 0 : index
    %195 = vector.load %arg6[%c1, %c0_6] : memref<6x128xf32, #tpu.memory_space<vmem>>, vector<1x32xf32>
    %196 = vector.shape_cast %194 : vector<1x32xf32> to vector<1x1x32xf32>
    %197 = vector.broadcast %196 : vector<1x1x32xf32> to vector<31x8x32xf32>
    %198 = arith.mulf %193, %197 : vector<31x8x32xf32>
    %199 = vector.shape_cast %195 : vector<1x32xf32> to vector<1x1x32xf32>
    %200 = vector.broadcast %199 : vector<1x1x32xf32> to vector<31x8x32xf32>
    %201 = arith.addf %198, %200 : vector<31x8x32xf32>
    %cst_7 = arith.constant 0.000000e+00 : f32
    %202 = vector.broadcast %cst_7 : f32 to vector<31x8x32xf32>
    %203 = arith.maximumf %201, %202 : vector<31x8x32xf32>
    %cst_8 = arith.constant 0.000000e+00 : f32
    %204 = vector.broadcast %cst_8 : f32 to vector<1x8x32xf32>
    %205 = tpu.concatenate %204, %203, %204 in 0 : vector<1x8x32xf32>, vector<31x8x32xf32>, vector<1x8x32xf32> -> vector<33x8x32xf32>
    %cst_9 = arith.constant 0.000000e+00 : f32
    %206 = vector.broadcast %cst_9 : f32 to vector<232x64xf32>
    %207 = vector.extract_strided_slice %205 {offsets = [0, 0, 0], sizes = [29, 8, 32], strides = [1, 1, 1]} : vector<33x8x32xf32> to vector<29x8x32xf32>
    %208 = vector.shape_cast %207 : vector<29x8x32xf32> to vector<232x32xf32>
    %c0_10 = arith.constant 0 : index
    %c0_11 = arith.constant 0 : index
    %c0_12 = arith.constant 0 : index
    %209 = vector.load %arg3[%c0_10, %c0_11, %c0_12] : memref<5x32x64xf32, #tpu.memory_space<vmem>>, vector<1x32x64xf32>
    %210 = vector.shape_cast %209 : vector<1x32x64xf32> to vector<32x64xf32>
    %cst_13 = arith.constant dense<0.000000e+00> : vector<232x64xf32>
    %211 = tpu.matmul %208, %210, %cst_13 {dimension_numbers = #tpu.dot_dimension_numbers<[1], [0], [0], [1], [0, 0, 1, 1], [], []>} : vector<232x32xf32>, vector<32x64xf32>, vector<232x64xf32> -> vector<232x64xf32>
    %212 = arith.addf %206, %211 : vector<232x64xf32>
    %213 = vector.extract_strided_slice %205 {offsets = [1, 0, 0], sizes = [29, 8, 32], strides = [1, 1, 1]} : vector<33x8x32xf32> to vector<29x8x32xf32>
    %214 = vector.shape_cast %213 : vector<29x8x32xf32> to vector<232x32xf32>
    %c1_14 = arith.constant 1 : index
    %c0_15 = arith.constant 0 : index
    %c0_16 = arith.constant 0 : index
    %215 = vector.load %arg3[%c1_14, %c0_15, %c0_16] : memref<5x32x64xf32, #tpu.memory_space<vmem>>, vector<1x32x64xf32>
    %216 = vector.shape_cast %215 : vector<1x32x64xf32> to vector<32x64xf32>
    %cst_17 = arith.constant dense<0.000000e+00> : vector<232x64xf32>
    %217 = tpu.matmul %214, %216, %cst_17 {dimension_numbers = #tpu.dot_dimension_numbers<[1], [0], [0], [1], [0, 0, 1, 1], [], []>} : vector<232x32xf32>, vector<32x64xf32>, vector<232x64xf32> -> vector<232x64xf32>
    %218 = arith.addf %212, %217 : vector<232x64xf32>
    %219 = vector.extract_strided_slice %205 {offsets = [2, 0, 0], sizes = [29, 8, 32], strides = [1, 1, 1]} : vector<33x8x32xf32> to vector<29x8x32xf32>
    %220 = vector.shape_cast %219 : vector<29x8x32xf32> to vector<232x32xf32>
    %c2 = arith.constant 2 : index
    %c0_18 = arith.constant 0 : index
    %c0_19 = arith.constant 0 : index
    %221 = vector.load %arg3[%c2, %c0_18, %c0_19] : memref<5x32x64xf32, #tpu.memory_space<vmem>>, vector<1x32x64xf32>
    %222 = vector.shape_cast %221 : vector<1x32x64xf32> to vector<32x64xf32>
    %cst_20 = arith.constant dense<0.000000e+00> : vector<232x64xf32>
    %223 = tpu.matmul %220, %222, %cst_20 {dimension_numbers = #tpu.dot_dimension_numbers<[1], [0], [0], [1], [0, 0, 1, 1], [], []>} : vector<232x32xf32>, vector<32x64xf32>, vector<232x64xf32> -> vector<232x64xf32>
    %224 = arith.addf %218, %223 : vector<232x64xf32>
    %225 = vector.extract_strided_slice %205 {offsets = [3, 0, 0], sizes = [29, 8, 32], strides = [1, 1, 1]} : vector<33x8x32xf32> to vector<29x8x32xf32>
    %226 = vector.shape_cast %225 : vector<29x8x32xf32> to vector<232x32xf32>
    %c3 = arith.constant 3 : index
    %c0_21 = arith.constant 0 : index
    %c0_22 = arith.constant 0 : index
    %227 = vector.load %arg3[%c3, %c0_21, %c0_22] : memref<5x32x64xf32, #tpu.memory_space<vmem>>, vector<1x32x64xf32>
    %228 = vector.shape_cast %227 : vector<1x32x64xf32> to vector<32x64xf32>
    %cst_23 = arith.constant dense<0.000000e+00> : vector<232x64xf32>
    %229 = tpu.matmul %226, %228, %cst_23 {dimension_numbers = #tpu.dot_dimension_numbers<[1], [0], [0], [1], [0, 0, 1, 1], [], []>} : vector<232x32xf32>, vector<32x64xf32>, vector<232x64xf32> -> vector<232x64xf32>
    %230 = arith.addf %224, %229 : vector<232x64xf32>
    %231 = vector.extract_strided_slice %205 {offsets = [4, 0, 0], sizes = [29, 8, 32], strides = [1, 1, 1]} : vector<33x8x32xf32> to vector<29x8x32xf32>
    %232 = vector.shape_cast %231 : vector<29x8x32xf32> to vector<232x32xf32>
    %c4 = arith.constant 4 : index
    %c0_24 = arith.constant 0 : index
    %c0_25 = arith.constant 0 : index
    %233 = vector.load %arg3[%c4, %c0_24, %c0_25] : memref<5x32x64xf32, #tpu.memory_space<vmem>>, vector<1x32x64xf32>
    %234 = vector.shape_cast %233 : vector<1x32x64xf32> to vector<32x64xf32>
    %cst_26 = arith.constant dense<0.000000e+00> : vector<232x64xf32>
    %235 = tpu.matmul %232, %234, %cst_26 {dimension_numbers = #tpu.dot_dimension_numbers<[1], [0], [0], [1], [0, 0, 1, 1], [], []>} : vector<232x32xf32>, vector<32x64xf32>, vector<232x64xf32> -> vector<232x64xf32>
    %236 = arith.addf %230, %235 : vector<232x64xf32>
    %237 = vector.shape_cast %236 : vector<232x64xf32> to vector<29x8x64xf32>
    %238 = vector.extract_strided_slice %237 {offsets = [0, 0, 0], sizes = [1, 8, 64], strides = [1, 1, 1]} : vector<29x8x64xf32> to vector<1x8x64xf32>
    %239 = vector.shape_cast %238 : vector<1x8x64xf32> to vector<8x64xf32>
    %240 = vector.extract_strided_slice %237 {offsets = [1, 0, 0], sizes = [1, 8, 64], strides = [1, 1, 1]} : vector<29x8x64xf32> to vector<1x8x64xf32>
    %241 = vector.shape_cast %240 : vector<1x8x64xf32> to vector<8x64xf32>
    %242 = arith.maximumf %239, %241 : vector<8x64xf32>
    %243 = vector.extract_strided_slice %237 {offsets = [2, 0, 0], sizes = [1, 8, 64], strides = [1, 1, 1]} : vector<29x8x64xf32> to vector<1x8x64xf32>
    %244 = vector.shape_cast %243 : vector<1x8x64xf32> to vector<8x64xf32>
    %245 = vector.extract_strided_slice %237 {offsets = [3, 0, 0], sizes = [1, 8, 64], strides = [1, 1, 1]} : vector<29x8x64xf32> to vector<1x8x64xf32>
    %246 = vector.shape_cast %245 : vector<1x8x64xf32> to vector<8x64xf32>
    %247 = arith.maximumf %244, %246 : vector<8x64xf32>
    %248 = vector.extract_strided_slice %237 {offsets = [4, 0, 0], sizes = [1, 8, 64], strides = [1, 1, 1]} : vector<29x8x64xf32> to vector<1x8x64xf32>
    %249 = vector.shape_cast %248 : vector<1x8x64xf32> to vector<8x64xf32>
    %250 = vector.extract_strided_slice %237 {offsets = [5, 0, 0], sizes = [1, 8, 64], strides = [1, 1, 1]} : vector<29x8x64xf32> to vector<1x8x64xf32>
    %251 = vector.shape_cast %250 : vector<1x8x64xf32> to vector<8x64xf32>
    %252 = arith.maximumf %249, %251 : vector<8x64xf32>
    %253 = vector.extract_strided_slice %237 {offsets = [6, 0, 0], sizes = [1, 8, 64], strides = [1, 1, 1]} : vector<29x8x64xf32> to vector<1x8x64xf32>
    %254 = vector.shape_cast %253 : vector<1x8x64xf32> to vector<8x64xf32>
    %255 = vector.extract_strided_slice %237 {offsets = [7, 0, 0], sizes = [1, 8, 64], strides = [1, 1, 1]} : vector<29x8x64xf32> to vector<1x8x64xf32>
    %256 = vector.shape_cast %255 : vector<1x8x64xf32> to vector<8x64xf32>
    %257 = arith.maximumf %254, %256 : vector<8x64xf32>
    %258 = vector.extract_strided_slice %237 {offsets = [8, 0, 0], sizes = [1, 8, 64], strides = [1, 1, 1]} : vector<29x8x64xf32> to vector<1x8x64xf32>
    %259 = vector.shape_cast %258 : vector<1x8x64xf32> to vector<8x64xf32>
    %260 = vector.extract_strided_slice %237 {offsets = [9, 0, 0], sizes = [1, 8, 64], strides = [1, 1, 1]} : vector<29x8x64xf32> to vector<1x8x64xf32>
    %261 = vector.shape_cast %260 : vector<1x8x64xf32> to vector<8x64xf32>
    %262 = arith.maximumf %259, %261 : vector<8x64xf32>
    %263 = vector.extract_strided_slice %237 {offsets = [10, 0, 0], sizes = [1, 8, 64], strides = [1, 1, 1]} : vector<29x8x64xf32> to vector<1x8x64xf32>
    %264 = vector.shape_cast %263 : vector<1x8x64xf32> to vector<8x64xf32>
    %265 = vector.extract_strided_slice %237 {offsets = [11, 0, 0], sizes = [1, 8, 64], strides = [1, 1, 1]} : vector<29x8x64xf32> to vector<1x8x64xf32>
    %266 = vector.shape_cast %265 : vector<1x8x64xf32> to vector<8x64xf32>
    %267 = arith.maximumf %264, %266 : vector<8x64xf32>
    %268 = vector.extract_strided_slice %237 {offsets = [12, 0, 0], sizes = [1, 8, 64], strides = [1, 1, 1]} : vector<29x8x64xf32> to vector<1x8x64xf32>
    %269 = vector.shape_cast %268 : vector<1x8x64xf32> to vector<8x64xf32>
    %270 = vector.extract_strided_slice %237 {offsets = [13, 0, 0], sizes = [1, 8, 64], strides = [1, 1, 1]} : vector<29x8x64xf32> to vector<1x8x64xf32>
    %271 = vector.shape_cast %270 : vector<1x8x64xf32> to vector<8x64xf32>
    %272 = arith.maximumf %269, %271 : vector<8x64xf32>
    %273 = vector.extract_strided_slice %237 {offsets = [14, 0, 0], sizes = [1, 8, 64], strides = [1, 1, 1]} : vector<29x8x64xf32> to vector<1x8x64xf32>
    %274 = vector.shape_cast %273 : vector<1x8x64xf32> to vector<8x64xf32>
    %275 = vector.extract_strided_slice %237 {offsets = [15, 0, 0], sizes = [1, 8, 64], strides = [1, 1, 1]} : vector<29x8x64xf32> to vector<1x8x64xf32>
    %276 = vector.shape_cast %275 : vector<1x8x64xf32> to vector<8x64xf32>
    %277 = arith.maximumf %274, %276 : vector<8x64xf32>
    %278 = vector.extract_strided_slice %237 {offsets = [16, 0, 0], sizes = [1, 8, 64], strides = [1, 1, 1]} : vector<29x8x64xf32> to vector<1x8x64xf32>
    %279 = vector.shape_cast %278 : vector<1x8x64xf32> to vector<8x64xf32>
    %280 = vector.extract_strided_slice %237 {offsets = [17, 0, 0], sizes = [1, 8, 64], strides = [1, 1, 1]} : vector<29x8x64xf32> to vector<1x8x64xf32>
    %281 = vector.shape_cast %280 : vector<1x8x64xf32> to vector<8x64xf32>
    %282 = arith.maximumf %279, %281 : vector<8x64xf32>
    %283 = vector.extract_strided_slice %237 {offsets = [18, 0, 0], sizes = [1, 8, 64], strides = [1, 1, 1]} : vector<29x8x64xf32> to vector<1x8x64xf32>
    %284 = vector.shape_cast %283 : vector<1x8x64xf32> to vector<8x64xf32>
    %285 = vector.extract_strided_slice %237 {offsets = [19, 0, 0], sizes = [1, 8, 64], strides = [1, 1, 1]} : vector<29x8x64xf32> to vector<1x8x64xf32>
    %286 = vector.shape_cast %285 : vector<1x8x64xf32> to vector<8x64xf32>
    %287 = arith.maximumf %284, %286 : vector<8x64xf32>
    %288 = vector.extract_strided_slice %237 {offsets = [20, 0, 0], sizes = [1, 8, 64], strides = [1, 1, 1]} : vector<29x8x64xf32> to vector<1x8x64xf32>
    %289 = vector.shape_cast %288 : vector<1x8x64xf32> to vector<8x64xf32>
    %290 = vector.extract_strided_slice %237 {offsets = [21, 0, 0], sizes = [1, 8, 64], strides = [1, 1, 1]} : vector<29x8x64xf32> to vector<1x8x64xf32>
    %291 = vector.shape_cast %290 : vector<1x8x64xf32> to vector<8x64xf32>
    %292 = arith.maximumf %289, %291 : vector<8x64xf32>
    %293 = vector.extract_strided_slice %237 {offsets = [22, 0, 0], sizes = [1, 8, 64], strides = [1, 1, 1]} : vector<29x8x64xf32> to vector<1x8x64xf32>
    %294 = vector.shape_cast %293 : vector<1x8x64xf32> to vector<8x64xf32>
    %295 = vector.extract_strided_slice %237 {offsets = [23, 0, 0], sizes = [1, 8, 64], strides = [1, 1, 1]} : vector<29x8x64xf32> to vector<1x8x64xf32>
    %296 = vector.shape_cast %295 : vector<1x8x64xf32> to vector<8x64xf32>
    %297 = arith.maximumf %294, %296 : vector<8x64xf32>
    %298 = vector.extract_strided_slice %237 {offsets = [24, 0, 0], sizes = [1, 8, 64], strides = [1, 1, 1]} : vector<29x8x64xf32> to vector<1x8x64xf32>
    %299 = vector.shape_cast %298 : vector<1x8x64xf32> to vector<8x64xf32>
    %300 = vector.extract_strided_slice %237 {offsets = [25, 0, 0], sizes = [1, 8, 64], strides = [1, 1, 1]} : vector<29x8x64xf32> to vector<1x8x64xf32>
    %301 = vector.shape_cast %300 : vector<1x8x64xf32> to vector<8x64xf32>
    %302 = arith.maximumf %299, %301 : vector<8x64xf32>
    %303 = vector.extract_strided_slice %237 {offsets = [26, 0, 0], sizes = [1, 8, 64], strides = [1, 1, 1]} : vector<29x8x64xf32> to vector<1x8x64xf32>
    %304 = vector.shape_cast %303 : vector<1x8x64xf32> to vector<8x64xf32>
    %305 = vector.extract_strided_slice %237 {offsets = [27, 0, 0], sizes = [1, 8, 64], strides = [1, 1, 1]} : vector<29x8x64xf32> to vector<1x8x64xf32>
    %306 = vector.shape_cast %305 : vector<1x8x64xf32> to vector<8x64xf32>
    %307 = arith.maximumf %304, %306 : vector<8x64xf32>
    %308 = vector.shape_cast %242 : vector<8x64xf32> to vector<1x8x64xf32>
    %309 = vector.shape_cast %247 : vector<8x64xf32> to vector<1x8x64xf32>
    %310 = vector.shape_cast %252 : vector<8x64xf32> to vector<1x8x64xf32>
    %311 = vector.shape_cast %257 : vector<8x64xf32> to vector<1x8x64xf32>
    %312 = vector.shape_cast %262 : vector<8x64xf32> to vector<1x8x64xf32>
    %313 = vector.shape_cast %267 : vector<8x64xf32> to vector<1x8x64xf32>
    %314 = vector.shape_cast %272 : vector<8x64xf32> to vector<1x8x64xf32>
    %315 = vector.shape_cast %277 : vector<8x64xf32> to vector<1x8x64xf32>
    %316 = vector.shape_cast %282 : vector<8x64xf32> to vector<1x8x64xf32>
    %317 = vector.shape_cast %287 : vector<8x64xf32> to vector<1x8x64xf32>
    %318 = vector.shape_cast %292 : vector<8x64xf32> to vector<1x8x64xf32>
    %319 = vector.shape_cast %297 : vector<8x64xf32> to vector<1x8x64xf32>
    %320 = vector.shape_cast %302 : vector<8x64xf32> to vector<1x8x64xf32>
    %321 = vector.shape_cast %307 : vector<8x64xf32> to vector<1x8x64xf32>
    %322 = tpu.concatenate %308, %309, %310, %311, %312, %313, %314, %315, %316, %317, %318, %319, %320, %321 in 0 : vector<1x8x64xf32>, vector<1x8x64xf32>, vector<1x8x64xf32>, vector<1x8x64xf32>, vector<1x8x64xf32>, vector<1x8x64xf32>, vector<1x8x64xf32>, vector<1x8x64xf32>, vector<1x8x64xf32>, vector<1x8x64xf32>, vector<1x8x64xf32>, vector<1x8x64xf32>, vector<1x8x64xf32>, vector<1x8x64xf32> -> vector<14x8x64xf32>
    %c2_27 = arith.constant 2 : index
    %c0_28 = arith.constant 0 : index
    %323 = vector.load %arg6[%c2_27, %c0_28] : memref<6x128xf32, #tpu.memory_space<vmem>>, vector<1x64xf32>
    %c3_29 = arith.constant 3 : index
    %c0_30 = arith.constant 0 : index
    %324 = vector.load %arg6[%c3_29, %c0_30] : memref<6x128xf32, #tpu.memory_space<vmem>>, vector<1x64xf32>
    %325 = vector.shape_cast %323 : vector<1x64xf32> to vector<1x1x64xf32>
    %326 = vector.broadcast %325 : vector<1x1x64xf32> to vector<14x8x64xf32>
    %327 = arith.mulf %322, %326 : vector<14x8x64xf32>
    %328 = vector.shape_cast %324 : vector<1x64xf32> to vector<1x1x64xf32>
    %329 = vector.broadcast %328 : vector<1x1x64xf32> to vector<14x8x64xf32>
    %330 = arith.addf %327, %329 : vector<14x8x64xf32>
    %cst_31 = arith.constant 0.000000e+00 : f32
    %331 = vector.broadcast %cst_31 : f32 to vector<14x8x64xf32>
    %332 = arith.maximumf %330, %331 : vector<14x8x64xf32>
    %cst_32 = arith.constant 0.000000e+00 : f32
    %333 = vector.broadcast %cst_32 : f32 to vector<1x8x64xf32>
    %334 = tpu.concatenate %333, %332, %333 in 0 : vector<1x8x64xf32>, vector<14x8x64xf32>, vector<1x8x64xf32> -> vector<16x8x64xf32>
    %cst_33 = arith.constant 0.000000e+00 : f32
    %335 = vector.broadcast %cst_33 : f32 to vector<112x128xf32>
    %336 = vector.extract_strided_slice %334 {offsets = [0, 0, 0], sizes = [14, 8, 64], strides = [1, 1, 1]} : vector<16x8x64xf32> to vector<14x8x64xf32>
    %337 = vector.shape_cast %336 : vector<14x8x64xf32> to vector<112x64xf32>
    %c0_34 = arith.constant 0 : index
    %c0_35 = arith.constant 0 : index
    %c0_36 = arith.constant 0 : index
    %338 = vector.load %arg4[%c0_34, %c0_35, %c0_36] : memref<3x64x128xf32, #tpu.memory_space<vmem>>, vector<1x64x128xf32>
    %339 = vector.shape_cast %338 : vector<1x64x128xf32> to vector<64x128xf32>
    %cst_37 = arith.constant dense<0.000000e+00> : vector<112x128xf32>
    %340 = tpu.matmul %337, %339, %cst_37 {dimension_numbers = #tpu.dot_dimension_numbers<[1], [0], [0], [1], [0, 0, 1, 1], [], []>} : vector<112x64xf32>, vector<64x128xf32>, vector<112x128xf32> -> vector<112x128xf32>
    %341 = arith.addf %335, %340 : vector<112x128xf32>
    %342 = vector.extract_strided_slice %334 {offsets = [1, 0, 0], sizes = [14, 8, 64], strides = [1, 1, 1]} : vector<16x8x64xf32> to vector<14x8x64xf32>
    %343 = vector.shape_cast %342 : vector<14x8x64xf32> to vector<112x64xf32>
    %c1_38 = arith.constant 1 : index
    %c0_39 = arith.constant 0 : index
    %c0_40 = arith.constant 0 : index
    %344 = vector.load %arg4[%c1_38, %c0_39, %c0_40] : memref<3x64x128xf32, #tpu.memory_space<vmem>>, vector<1x64x128xf32>
    %345 = vector.shape_cast %344 : vector<1x64x128xf32> to vector<64x128xf32>
    %cst_41 = arith.constant dense<0.000000e+00> : vector<112x128xf32>
    %346 = tpu.matmul %343, %345, %cst_41 {dimension_numbers = #tpu.dot_dimension_numbers<[1], [0], [0], [1], [0, 0, 1, 1], [], []>} : vector<112x64xf32>, vector<64x128xf32>, vector<112x128xf32> -> vector<112x128xf32>
    %347 = arith.addf %341, %346 : vector<112x128xf32>
    %348 = vector.extract_strided_slice %334 {offsets = [2, 0, 0], sizes = [14, 8, 64], strides = [1, 1, 1]} : vector<16x8x64xf32> to vector<14x8x64xf32>
    %349 = vector.shape_cast %348 : vector<14x8x64xf32> to vector<112x64xf32>
    %c2_42 = arith.constant 2 : index
    %c0_43 = arith.constant 0 : index
    %c0_44 = arith.constant 0 : index
    %350 = vector.load %arg4[%c2_42, %c0_43, %c0_44] : memref<3x64x128xf32, #tpu.memory_space<vmem>>, vector<1x64x128xf32>
    %351 = vector.shape_cast %350 : vector<1x64x128xf32> to vector<64x128xf32>
    %cst_45 = arith.constant dense<0.000000e+00> : vector<112x128xf32>
    %352 = tpu.matmul %349, %351, %cst_45 {dimension_numbers = #tpu.dot_dimension_numbers<[1], [0], [0], [1], [0, 0, 1, 1], [], []>} : vector<112x64xf32>, vector<64x128xf32>, vector<112x128xf32> -> vector<112x128xf32>
    %353 = arith.addf %347, %352 : vector<112x128xf32>
    %354 = vector.shape_cast %353 : vector<112x128xf32> to vector<14x8x128xf32>
    %355 = vector.extract_strided_slice %354 {offsets = [0, 0, 0], sizes = [1, 8, 128], strides = [1, 1, 1]} : vector<14x8x128xf32> to vector<1x8x128xf32>
    %356 = vector.shape_cast %355 : vector<1x8x128xf32> to vector<8x128xf32>
    %357 = vector.extract_strided_slice %354 {offsets = [1, 0, 0], sizes = [1, 8, 128], strides = [1, 1, 1]} : vector<14x8x128xf32> to vector<1x8x128xf32>
    %358 = vector.shape_cast %357 : vector<1x8x128xf32> to vector<8x128xf32>
    %359 = arith.maximumf %356, %358 : vector<8x128xf32>
    %360 = vector.extract_strided_slice %354 {offsets = [2, 0, 0], sizes = [1, 8, 128], strides = [1, 1, 1]} : vector<14x8x128xf32> to vector<1x8x128xf32>
    %361 = vector.shape_cast %360 : vector<1x8x128xf32> to vector<8x128xf32>
    %362 = vector.extract_strided_slice %354 {offsets = [3, 0, 0], sizes = [1, 8, 128], strides = [1, 1, 1]} : vector<14x8x128xf32> to vector<1x8x128xf32>
    %363 = vector.shape_cast %362 : vector<1x8x128xf32> to vector<8x128xf32>
    %364 = arith.maximumf %361, %363 : vector<8x128xf32>
    %365 = vector.extract_strided_slice %354 {offsets = [4, 0, 0], sizes = [1, 8, 128], strides = [1, 1, 1]} : vector<14x8x128xf32> to vector<1x8x128xf32>
    %366 = vector.shape_cast %365 : vector<1x8x128xf32> to vector<8x128xf32>
    %367 = vector.extract_strided_slice %354 {offsets = [5, 0, 0], sizes = [1, 8, 128], strides = [1, 1, 1]} : vector<14x8x128xf32> to vector<1x8x128xf32>
    %368 = vector.shape_cast %367 : vector<1x8x128xf32> to vector<8x128xf32>
    %369 = arith.maximumf %366, %368 : vector<8x128xf32>
    %370 = vector.extract_strided_slice %354 {offsets = [6, 0, 0], sizes = [1, 8, 128], strides = [1, 1, 1]} : vector<14x8x128xf32> to vector<1x8x128xf32>
    %371 = vector.shape_cast %370 : vector<1x8x128xf32> to vector<8x128xf32>
    %372 = vector.extract_strided_slice %354 {offsets = [7, 0, 0], sizes = [1, 8, 128], strides = [1, 1, 1]} : vector<14x8x128xf32> to vector<1x8x128xf32>
    %373 = vector.shape_cast %372 : vector<1x8x128xf32> to vector<8x128xf32>
    %374 = arith.maximumf %371, %373 : vector<8x128xf32>
    %375 = vector.extract_strided_slice %354 {offsets = [8, 0, 0], sizes = [1, 8, 128], strides = [1, 1, 1]} : vector<14x8x128xf32> to vector<1x8x128xf32>
    %376 = vector.shape_cast %375 : vector<1x8x128xf32> to vector<8x128xf32>
    %377 = vector.extract_strided_slice %354 {offsets = [9, 0, 0], sizes = [1, 8, 128], strides = [1, 1, 1]} : vector<14x8x128xf32> to vector<1x8x128xf32>
    %378 = vector.shape_cast %377 : vector<1x8x128xf32> to vector<8x128xf32>
    %379 = arith.maximumf %376, %378 : vector<8x128xf32>
    %380 = vector.extract_strided_slice %354 {offsets = [10, 0, 0], sizes = [1, 8, 128], strides = [1, 1, 1]} : vector<14x8x128xf32> to vector<1x8x128xf32>
    %381 = vector.shape_cast %380 : vector<1x8x128xf32> to vector<8x128xf32>
    %382 = vector.extract_strided_slice %354 {offsets = [11, 0, 0], sizes = [1, 8, 128], strides = [1, 1, 1]} : vector<14x8x128xf32> to vector<1x8x128xf32>
    %383 = vector.shape_cast %382 : vector<1x8x128xf32> to vector<8x128xf32>
    %384 = arith.maximumf %381, %383 : vector<8x128xf32>
    %385 = vector.extract_strided_slice %354 {offsets = [12, 0, 0], sizes = [1, 8, 128], strides = [1, 1, 1]} : vector<14x8x128xf32> to vector<1x8x128xf32>
    %386 = vector.shape_cast %385 : vector<1x8x128xf32> to vector<8x128xf32>
    %387 = vector.extract_strided_slice %354 {offsets = [13, 0, 0], sizes = [1, 8, 128], strides = [1, 1, 1]} : vector<14x8x128xf32> to vector<1x8x128xf32>
    %388 = vector.shape_cast %387 : vector<1x8x128xf32> to vector<8x128xf32>
    %389 = arith.maximumf %386, %388 : vector<8x128xf32>
    %390 = vector.shape_cast %359 : vector<8x128xf32> to vector<1x8x128xf32>
    %391 = vector.shape_cast %364 : vector<8x128xf32> to vector<1x8x128xf32>
    %392 = vector.shape_cast %369 : vector<8x128xf32> to vector<1x8x128xf32>
    %393 = vector.shape_cast %374 : vector<8x128xf32> to vector<1x8x128xf32>
    %394 = vector.shape_cast %379 : vector<8x128xf32> to vector<1x8x128xf32>
    %395 = vector.shape_cast %384 : vector<8x128xf32> to vector<1x8x128xf32>
    %396 = vector.shape_cast %389 : vector<8x128xf32> to vector<1x8x128xf32>
    %397 = tpu.concatenate %390, %391, %392, %393, %394, %395, %396 in 0 : vector<1x8x128xf32>, vector<1x8x128xf32>, vector<1x8x128xf32>, vector<1x8x128xf32>, vector<1x8x128xf32>, vector<1x8x128xf32>, vector<1x8x128xf32> -> vector<7x8x128xf32>
    %c4_46 = arith.constant 4 : index
    %c0_47 = arith.constant 0 : index
    %398 = vector.load %arg6[%c4_46, %c0_47] : memref<6x128xf32, #tpu.memory_space<vmem>>, vector<1x128xf32>
    %c5 = arith.constant 5 : index
    %c0_48 = arith.constant 0 : index
    %399 = vector.load %arg6[%c5, %c0_48] : memref<6x128xf32, #tpu.memory_space<vmem>>, vector<1x128xf32>
    %400 = vector.shape_cast %398 : vector<1x128xf32> to vector<1x1x128xf32>
    %401 = vector.broadcast %400 : vector<1x1x128xf32> to vector<7x8x128xf32>
    %402 = arith.mulf %397, %401 : vector<7x8x128xf32>
    %403 = vector.shape_cast %399 : vector<1x128xf32> to vector<1x1x128xf32>
    %404 = vector.broadcast %403 : vector<1x1x128xf32> to vector<7x8x128xf32>
    %405 = arith.addf %402, %404 : vector<7x8x128xf32>
    %cst_49 = arith.constant 0.000000e+00 : f32
    %406 = vector.broadcast %cst_49 : f32 to vector<7x8x128xf32>
    %407 = arith.maximumf %405, %406 : vector<7x8x128xf32>
    %408 = vector.extract_strided_slice %407 {offsets = [0, 0, 0], sizes = [1, 8, 128], strides = [1, 1, 1]} : vector<7x8x128xf32> to vector<1x8x128xf32>
    %409 = vector.shape_cast %408 : vector<1x8x128xf32> to vector<8x128xf32>
    %410 = vector.extract_strided_slice %407 {offsets = [1, 0, 0], sizes = [1, 8, 128], strides = [1, 1, 1]} : vector<7x8x128xf32> to vector<1x8x128xf32>
    %411 = vector.shape_cast %410 : vector<1x8x128xf32> to vector<8x128xf32>
    %412 = vector.extract_strided_slice %407 {offsets = [2, 0, 0], sizes = [1, 8, 128], strides = [1, 1, 1]} : vector<7x8x128xf32> to vector<1x8x128xf32>
    %413 = vector.shape_cast %412 : vector<1x8x128xf32> to vector<8x128xf32>
    %414 = vector.extract_strided_slice %407 {offsets = [3, 0, 0], sizes = [1, 8, 128], strides = [1, 1, 1]} : vector<7x8x128xf32> to vector<1x8x128xf32>
    %415 = vector.shape_cast %414 : vector<1x8x128xf32> to vector<8x128xf32>
    %416 = vector.extract_strided_slice %407 {offsets = [4, 0, 0], sizes = [1, 8, 128], strides = [1, 1, 1]} : vector<7x8x128xf32> to vector<1x8x128xf32>
    %417 = vector.shape_cast %416 : vector<1x8x128xf32> to vector<8x128xf32>
    %418 = vector.extract_strided_slice %407 {offsets = [5, 0, 0], sizes = [1, 8, 128], strides = [1, 1, 1]} : vector<7x8x128xf32> to vector<1x8x128xf32>
    %419 = vector.shape_cast %418 : vector<1x8x128xf32> to vector<8x128xf32>
    %420 = vector.extract_strided_slice %407 {offsets = [6, 0, 0], sizes = [1, 8, 128], strides = [1, 1, 1]} : vector<7x8x128xf32> to vector<1x8x128xf32>
    %421 = vector.shape_cast %420 : vector<1x8x128xf32> to vector<8x128xf32>
    %422 = tpu.concatenate %409, %411, %413, %415, %417, %419, %421 in 1 : vector<8x128xf32>, vector<8x128xf32>, vector<8x128xf32>, vector<8x128xf32>, vector<8x128xf32>, vector<8x128xf32>, vector<8x128xf32> -> vector<8x896xf32>
    %c0_50 = arith.constant 0 : index
    %c0_51 = arith.constant 0 : index
    %423 = vector.load %arg5[%c0_50, %c0_51] : memref<896x384xf32, #tpu.memory_space<vmem>>, vector<896x384xf32>
    %cst_52 = arith.constant dense<0.000000e+00> : vector<8x384xf32>
    %424 = tpu.matmul %422, %423, %cst_52 {dimension_numbers = #tpu.dot_dimension_numbers<[1], [0], [0], [1], [0, 0, 1, 1], [], []>} : vector<8x896xf32>, vector<896x384xf32>, vector<8x384xf32> -> vector<8x384xf32>
    %c0_53 = arith.constant 0 : index
    %c0_54 = arith.constant 0 : index
    %425 = vector.load %arg7[%c0_53, %c0_54] : memref<1x384xf32, #tpu.memory_space<vmem>>, vector<1x384xf32>
    %426 = vector.broadcast %425 : vector<1x384xf32> to vector<8x384xf32>
    %427 = arith.addf %424, %426 : vector<8x384xf32>
    %c0_55 = arith.constant 0 : index
    %c0_56 = arith.constant 0 : index
    %428 = vector.load %arg8[%c0_55, %c0_56] : memref<8x384xf32, #tpu.memory_space<vmem>>, vector<8x384xf32>
    tpu.vector_store %arg8[%c0_55, %c0_56], %427 {strides = array<i32>} : memref<8x384xf32, #tpu.memory_space<vmem>>, vector<8x384xf32>,
    return
  }
  func.func @transform_0(%arg0: i32) -> (i32, i32, i32) {
    %c0_i32 = arith.constant 0 : i32
    %c0_i32_0 = arith.constant 0 : i32
    %c0_i32_1 = arith.constant 0 : i32
    return %c0_i32, %arg0, %c0_i32_0 : i32, i32, i32
  }
  func.func @transform_1(%arg0: i32) -> (i32, i32) {
    %c0_i32 = arith.constant 0 : i32
    %c0_i32_0 = arith.constant 0 : i32
    %c0_i32_1 = arith.constant 0 : i32
    return %c0_i32, %c0_i32_0 : i32, i32
  }
  func.func @transform_2(%arg0: i32) -> (i32, i32, i32) {
    %c0_i32 = arith.constant 0 : i32
    %c0_i32_0 = arith.constant 0 : i32
    %c0_i32_1 = arith.constant 0 : i32
    %c0_i32_2 = arith.constant 0 : i32
    return %c0_i32, %c0_i32_0, %c0_i32_1 : i32, i32, i32
  }
  func.func @transform_3(%arg0: i32) -> (i32, i32, i32) {
    %c0_i32 = arith.constant 0 : i32
    %c0_i32_0 = arith.constant 0 : i32
    %c0_i32_1 = arith.constant 0 : i32
    %c0_i32_2 = arith.constant 0 : i32
    return %c0_i32, %c0_i32_0, %c0_i32_1 : i32, i32, i32
  }
  func.func @transform_4(%arg0: i32) -> (i32, i32) {
    %c0_i32 = arith.constant 0 : i32
    %c0_i32_0 = arith.constant 0 : i32
    %c0_i32_1 = arith.constant 0 : i32
    return %c0_i32, %c0_i32_0 : i32, i32
  }
  func.func @transform_5(%arg0: i32) -> (i32, i32) {
    %c0_i32 = arith.constant 0 : i32
    %c0_i32_0 = arith.constant 0 : i32
    %c0_i32_1 = arith.constant 0 : i32
    return %c0_i32, %c0_i32_0 : i32, i32
  }
  func.func @transform_6(%arg0: i32) -> (i32, i32) {
    %c0_i32 = arith.constant 0 : i32
    %c0_i32_0 = arith.constant 0 : i32
    %c0_i32_1 = arith.constant 0 : i32
    return %c0_i32, %c0_i32_0 : i32, i32
  }
  func.func @transform_7(%arg0: i32) -> (i32, i32) {
    %c0_i32 = arith.constant 0 : i32
    %c0_i32_0 = arith.constant 0 : i32
    return %arg0, %c0_i32 : i32, i32
  }
}

</mosaic_0001>

<bundles_post_ra>
// kernel: tpu_custom_call.1
= control target key start
LH: loop header
LB: loop body
LE: loop exit
PB: predicated region body
PF: predicated region fallthrough
CT: control target
= control target key end

     0   :  { %12 = vsyncpa [#allocation3], 0  ;;  %s7279_s0 = inlined_call_operand.vmem [shape: f32[62,8,5], index: 0, kind: input, shape index: {}]   ;;  %s7280_s1 = inlined_call_operand.hbm [shape: f32[5,32], index: 1, kind: input, shape index: {}]   ;;  %s7281_s2 = inlined_call_operand.hbm [shape: f32[5,32,64], index: 2, kind: input, shape index: {}]   ;;  %s7282_s3 = inlined_call_operand.hbm [shape: f32[3,64,128], index: 3, kind: input, shape index: {}]   ;;  %s7283_s4 = inlined_call_operand.hbm [shape: f32[896,384], index: 4, kind: input, shape index: {}]   ;;  %s7284_s5 = inlined_call_operand.hbm [shape: f32[6,128], index: 5, kind: input, shape index: {}]   ;;  %s7285_s6 = inlined_call_operand.hbm [shape: f32[1,384], index: 6, kind: input, shape index: {}]   ;;  %s7286_s7 = inlined_call_operand.hbm [shape: f32[8,384], index: 7, kind: output, shape index: {}]  }
   0x1   :  { %13 = vsyncpa [#allocation6], 0 }
   0x2   :  { %14 = vsyncpa [#allocation9], 0 }
   0x3   :  { %15 = vsyncpa [#allocation12], 0 }
   0x4   :  { %16 = vsyncpa [#allocation4], 0  ;;  %s5890_s24 = smov [#allocation5]   ;;  %s5726_s28 = scalar_lea.hbm %s7281_s2, 2560 }
   0x5   :  { %s34_s25 = sshll.u32 %s5890_s24, 4  ;;  %p5727_p0 = scmp.ne.s32.totalorder %s7281_s2, %s5726_s28  ;;  %s35_s25 = int_to_ptr.vmem [resolvable:$true] %s34_s25 }
   0x6   :  { %p5730_p1 = scmp.lt.u32.totalorder %s5726_s28, %s7281_s2 }
   0x8   :  { %p5732_p2 = pnand %p5730_p1, %p5727_p0 }
   0xa   :  { %5735 = shalt.err (!%p5732_p2)
}
   0xb   :  { %s5736_s10 = scalar_lea.vmem %s35_s25, 2560  ;;  %p5741_p4 = scmp.lt.s32.totalorder %s35_s25, %s35_s25 }
   0xc   :  { %p5737_p3 = scmp.ne.s32.totalorder %s35_s25, %s5736_s10  ;;  %p5742_p5 = scmp.lt.s32.totalorder %s5736_s10, %s5736_s10 }
   0xe   :  { %p5743_p6 = por %p5742_p5, %p5741_p4 }
  0x10   :  { %p5744_p7 = pnand %p5743_p6, %p5737_p3 }
  0x12   :  { %5747 = shalt.err (!%p5744_p7)
}
  0x13   :  { %s5891_s11 = smov 128   ;;  %s5892_s12 = smov 8  }
  0x14   :  { %40 = dma.hbm_to_vmem [thread:$0]  %s7281_s2, 2560, %s35_s25, [#allocation6], %s5891_s11, %s5891_s11, %s5892_s12  }
  0x15   :  { %s5893_s15 = smov [#allocation8]   ;;  %s5748_s19 = scalar_lea.hbm %s7283_s4, 43008 }
  0x16   :  { %s58_s16 = sshll.u32 %s5893_s15, 4  ;;  %p5749_p8 = scmp.ne.s32.totalorder %s7283_s4, %s5748_s19  ;;  %s59_s16 = int_to_ptr.vmem [resolvable:$true] %s58_s16 }
  0x17   :  { %p5752_p9 = scmp.lt.u32.totalorder %s5748_s19, %s7283_s4 }
  0x19   :  { %p5754_p10 = pnand %p5752_p9, %p5749_p8 }
  0x1b   :  { %5757 = shalt.err (!%p5754_p10)
}
  0x1c   :  { %s5758_s24 = scalar_lea.vmem %s59_s16, 43008  ;;  %p5763_p12 = scmp.lt.s32.totalorder %s59_s16, %s59_s16 }
  0x1d   :  { %p5759_p11 = scmp.ne.s32.totalorder %s59_s16, %s5758_s24  ;;  %p5764_p13 = scmp.lt.s32.totalorder %s5758_s24, %s5758_s24 }
  0x1f   :  { %p5765_p0 = por %p5764_p13, %p5763_p12 }
  0x21   :  { %p5766_p1 = pnand %p5765_p0, %p5759_p11 }
  0x23   :  { %5769 = shalt.err (!%p5766_p1)
}
  0x24   :  { %s5894_s2 = smov 384   ;;  %s5895_s25 = smov 24  }
  0x25   :  { %64 = dma.hbm_to_vmem [thread:$0]  %s7283_s4, 43008, %s59_s16, [#allocation9], %s5894_s2, %s5894_s2, %s5895_s25  }
  0x26   :  { %s5896_s28 = smov [#allocation2]   ;;  %s5897_s30 = smov [#allocation7]  }
  0x27   :  { %s25_s29 = sshll.u32 %s5896_s28, 4  ;;  %s46_s8 = sshll.u32 %s5897_s30, 4  ;;  %s26_s29 = int_to_ptr.vmem [resolvable:$true] %s25_s29  ;;  %s5971_s8 = int_to_ptr.vmem [resolvable:$true] %s46_s8 }
  0x28   :  { %s5770_s13 = scalar_lea.hbm %s7280_s1, 128 }
  0x29   :  { %p5771_p2 = scmp.ne.s32.totalorder %s7280_s1, %s5770_s13  ;;  %p5774_p3 = scmp.lt.u32.totalorder %s5770_s13, %s7280_s1 }
  0x2b   :  { %p5776_p4 = pnand %p5774_p3, %p5771_p2 }
  0x2d   :  { %5779 = shalt.err (!%p5776_p4)
}
  0x2e   :  { %s5780_s4 = scalar_lea.vmem %s26_s29, 128  ;;  %p5785_p6 = scmp.lt.s32.totalorder %s26_s29, %s26_s29 }
  0x2f   :  { %p5781_p5 = scmp.ne.s32.totalorder %s26_s29, %s5780_s4  ;;  %p5786_p7 = scmp.lt.s32.totalorder %s5780_s4, %s5780_s4 }
  0x31   :  { %p5787_p8 = por %p5786_p7, %p5785_p6 }
  0x33   :  { %p5788_p9 = pnand %p5787_p8, %p5781_p5 }
  0x35   :  { %5791 = shalt.err (!%p5788_p9)
}
  0x36   :  { %28 = dma.hbm_to_vmem [thread:$0]  %s7280_s1, 128, %s26_s29, [#allocation3]  }
  0x37   :  { %s5792_s22 = scalar_lea.hbm %s7282_s3, 3072 }
  0x38   :  { %p5793_p10 = scmp.ne.s32.totalorder %s7282_s3, %s5792_s22  ;;  %p5796_p11 = scmp.lt.u32.totalorder %s5792_s22, %s7282_s3 }
  0x3a   :  { %p5798_p12 = pnand %p5796_p11, %p5793_p10 }
  0x3c   :  { %5801 = shalt.err (!%p5798_p12)
}
  0x3d   :  { %s5802_s26 = scalar_lea.vmem %s5971_s8, 3072  ;;  %p5807_p0 = scmp.lt.s32.totalorder %s5971_s8, %s5971_s8 }
  0x3e   :  { %p5803_p13 = scmp.ne.s32.totalorder %s5971_s8, %s5802_s26  ;;  %p5808_p1 = scmp.lt.s32.totalorder %s5802_s26, %s5802_s26 }
  0x40   :  { %p5809_p2 = por %p5808_p1, %p5807_p0 }
  0x42   :  { %p5810_p3 = pnand %p5809_p2, %p5803_p13 }
  0x44   :  { %5813 = shalt.err (!%p5810_p3)
}
  0x45   :  { %52 = dma.hbm_to_vmem [thread:$0]  %s7282_s3, 3072, %s5971_s8, [#allocation6], %s5891_s11, %s5891_s11, %s5892_s12  }
  0x46   :  { %s5898_s28 = smov [#allocation10]   ;;  %s5899_s30 = smov [#allocation11]  }
  0x47   :  { %s71_s29 = sshll.u32 %s5898_s28, 4  ;;  %s81_s9 = sshll.u32 %s5899_s30, 4  ;;  %s72_s29 = int_to_ptr.vmem [resolvable:$true] %s71_s29  ;;  %s82_s9 = int_to_ptr.vmem [resolvable:$true] %s81_s9 }
  0x48   :  { %s5814_s14 = scalar_lea.hbm %s7284_s5, 128 }
  0x49   :  { %p5815_p4 = scmp.ne.s32.totalorder %s7284_s5, %s5814_s14  ;;  %p5818_p5 = scmp.lt.u32.totalorder %s5814_s14, %s7284_s5 }
  0x4b   :  { %p5820_p6 = pnand %p5818_p5, %p5815_p4 }
  0x4d   :  { %5823 = shalt.err (!%p5820_p6)
}
  0x4e   :  { %s5824_s3 = scalar_lea.vmem %s72_s29, 128  ;;  %p5829_p8 = scmp.lt.s32.totalorder %s72_s29, %s72_s29 }
  0x4f   :  { %p5825_p7 = scmp.ne.s32.totalorder %s72_s29, %s5824_s3  ;;  %p5830_p9 = scmp.lt.s32.totalorder %s5824_s3, %s5824_s3 }
  0x51   :  { %p5831_p10 = por %p5830_p9, %p5829_p8 }
  0x53   :  { %p5832_p11 = pnand %p5831_p10, %p5825_p7 }
  0x55   :  { %5835 = shalt.err (!%p5832_p11)
}
  0x56   :  { %74 = dma.hbm_to_vmem [thread:$0]  %s7284_s5, 128, %s72_s29, [#allocation9]  }
  0x57   :  { %s5836_s19 = scalar_lea.hbm %s7285_s6, 48 }
  0x58   :  { %p5837_p12 = scmp.ne.s32.totalorder %s7285_s6, %s5836_s19  ;;  %p5840_p13 = scmp.lt.u32.totalorder %s5836_s19, %s7285_s6 }
  0x5a   :  { %p5842_p0 = pnand %p5840_p13, %p5837_p12 }
  0x5c   :  { %5845 = shalt.err (!%p5842_p0)
}
  0x5d   :  { %s5846_s24 = scalar_lea.vmem %s82_s9, 48  ;;  %s5850_s2 = scalar_lea.vmem %s82_s9, 64 }
  0x5e   :  { %p5847_p1 = scmp.ne.s32.totalorder %s82_s9, %s5846_s24  ;;  %p5851_p2 = scmp.lt.s32.totalorder %s82_s9, %s82_s9 }
  0x5f   :  { %p5852_p3 = scmp.lt.s32.totalorder %s5850_s2, %s5846_s24 }
  0x61   :  { %p5853_p4 = por %p5852_p3, %p5851_p2 }
  0x63   :  { %p5854_p5 = pnand %p5853_p4, %p5847_p1 }
  0x65   :  { %5857 = shalt.err (!%p5854_p5)
}
  0x66   :  { %84 = dma.hbm_to_vmem [thread:$0]  %s7285_s6, 48, %s82_s9, [#allocation12]  }
  0x67   :  { %5880 = dma.done.wait [#allocation3], 128  }
  0x68   :  { %5881 = vsyncadd [#allocation3], 4294967168 }
  0x69   :  { %5882 = dma.done.wait [#allocation6], 5632  }
  0x6a   :  { %5883 = vsyncadd [#allocation6], 4294961664 }
  0x6b   :  { %5884 = dma.done.wait [#allocation9], 43136  }
  0x6c   :  { %5885 = vsyncadd [#allocation9], 4294924160 }
  0x6d   :  { %5886 = dma.done.wait [#allocation12], 48  }
  0x6e   :  { %5887 = vsyncadd [#allocation12], 4294967248  ;;  %vm353_vm0 = vcmask 1044480   ;;  %vm166_vm1 = vcmask 39936   ;;  %v165_v0 = vld [vmem:[#allocation2] sm:$0x1f] }
  0x6f   :  { %v103_v1 = vld [vmem:[%s7279_s0] sm:$0xff]  ;;  %v104_v2 = vld [vmem:[%s7279_s0 + $0x8] sm:$0xff]  ;;  %4316 = vmatprep.subr.msk.mxu0 %vm353_vm0, %v165_v0  ;;  %v105_v3 = vld [vmem:[%s7279_s0 + $0x10] sm:$0xff]  ;;  %v5900_v50 = vmov 0.0|0.0   ;;  %vm5901_vm2 = vmmov 0   ;;  %v5902_v57 = vmov 0.0  }
  0x70   :  { %4318 = vmatprep.mubr.msk.f32.mxu0 %vm166_vm1, %v103_v1  ;;  %4317 = vmatpush3.msk.msra.mxu0 %vm353_vm0, %v165_v0  ;;  %v106_v4 = vld [vmem:[%s7279_s0 + $0x18] sm:$0xff]  ;;  %v107_v5 = vld [vmem:[%s7279_s0 + $0x20] sm:$0xff]  ;;  %v108_v6 = vld [vmem:[%s7279_s0 + $0x28] sm:$0xff]  ;;  %vm875_vm3 = vcmask 261120   ;;  %vm2199_vm4 = vcmask 523264  }
  0x71   :  { %4319 = vmatmul.mubr.msk.f32.vlgmr.msra.gmra.mrb[0].mxu0 %vm166_vm1, %v104_v2  ;;  %v109_v7 = vld [vmem:[%s7279_s0 + $0x30] sm:$0xff]  ;;  %v110_v8 = vld [vmem:[%s7279_s0 + $0x38] sm:$0xff]  ;;  %v111_v9 = vld [vmem:[%s7279_s0 + $0x40] sm:$0xff]  ;;  %5032 = vmatprep.subr.bf16.mxu0 %v5900_v50 }
  0x72   :  { %4321 = vmatprep.mubr.msk.f32.mxu0 %vm166_vm1, %v105_v3  ;;  %v112_v10 = vld [vmem:[%s7279_s0 + $0x48] sm:$0xff]  ;;  %v113_v11 = vld [vmem:[%s7279_s0 + $0x50] sm:$0xff]  ;;  %v114_v12 = vld [vmem:[%s7279_s0 + $0x58] sm:$0xff]  ;;  %5454 = vmatprep.subr.bf16.mxu1 %v5900_v50 }
  0x73   :  { %v115_v13 = vld [vmem:[%s7279_s0 + $0x60] sm:$0xff]  ;;  %v116_v14 = vld [vmem:[%s7279_s0 + $0x68] sm:$0xff]  ;;  %v117_v15 = vld [vmem:[%s7279_s0 + $0x70] sm:$0xff]  ;;  %4437 = vmatprep.mubr.msk.f32.mxu1 %vm5901_vm2, %v5902_v57 }
  0x74   :  { %v118_v16 = vld [vmem:[%s7279_s0 + $0x78] sm:$0xff]  ;;  %v119_v17 = vld [vmem:[%s7279_s0 + $0x80] sm:$0xff]  ;;  %v120_v18 = vld [vmem:[%s7279_s0 + $0x88] sm:$0xff] }
  0x75   :  { %4322 = vmatmul.mubr.msk.f32.gmra.mrb[2].mxu0 %vm166_vm1, %v106_v4  ;;  %v121_v19 = vld [vmem:[%s7279_s0 + $0x90] sm:$0xff]  ;;  %v122_v20 = vld [vmem:[%s7279_s0 + $0x98] sm:$0xff]  ;;  %v123_v21 = vld [vmem:[%s7279_s0 + $0xa0] sm:$0xff] }
  0x76   :  { %4324 = vmatprep.mubr.msk.f32.mxu0 %vm166_vm1, %v107_v5  ;;  %v124_v22 = vld [vmem:[%s7279_s0 + $0xa8] sm:$0xff]  ;;  %v125_v23 = vld [vmem:[%s7279_s0 + $0xb0] sm:$0xff]  ;;  %v126_v24 = vld [vmem:[%s7279_s0 + $0xb8] sm:$0xff] }
  0x77   :  { %v127_v25 = vld [vmem:[%s7279_s0 + $0xc0] sm:$0xff]  ;;  %v128_v26 = vld [vmem:[%s7279_s0 + $0xc8] sm:$0xff]  ;;  %v129_v27 = vld [vmem:[%s7279_s0 + $0xd0] sm:$0xff] }
  0x78   :  { %v130_v28 = vld [vmem:[%s7279_s0 + $0xd8] sm:$0xff]  ;;  %v131_v29 = vld [vmem:[%s7279_s0 + $0xe0] sm:$0xff]  ;;  %v132_v30 = vld [vmem:[%s7279_s0 + $0xe8] sm:$0xff] }
  0x79   :  { %4325 = vmatmul.mubr.msk.f32.gmra.mrb[4].mxu0 %vm166_vm1, %v108_v6  ;;  %v133_v31 = vld [vmem:[%s7279_s0 + $0xf0] sm:$0xff]  ;;  %v134_v32 = vld [vmem:[%s7279_s0 + $0xf8] sm:$0xff]  ;;  %v135_v33 = vld [vmem:[%s7279_s0 + $0x100] sm:$0xff] }
  0x7a   :  { %4327 = vmatprep.mubr.msk.f32.mxu0 %vm166_vm1, %v109_v7  ;;  %v136_v34 = vld [vmem:[%s7279_s0 + $0x108] sm:$0xff]  ;;  %v137_v35 = vld [vmem:[%s7279_s0 + $0x110] sm:$0xff]  ;;  %v138_v36 = vld [vmem:[%s7279_s0 + $0x118] sm:$0xff] }
  0x7b   :  { %v139_v37 = vld [vmem:[%s7279_s0 + $0x120] sm:$0xff]  ;;  %v140_v38 = vld [vmem:[%s7279_s0 + $0x128] sm:$0xff]  ;;  %v141_v39 = vld [vmem:[%s7279_s0 + $0x130] sm:$0xff] }
  0x7c   :  { %v142_v40 = vld [vmem:[%s7279_s0 + $0x138] sm:$0xff]  ;;  %v143_v41 = vld [vmem:[%s7279_s0 + $0x140] sm:$0xff]  ;;  %v144_v42 = vld [vmem:[%s7279_s0 + $0x148] sm:$0xff] }
  0x7d   :  { %4328 = vmatmul.mubr.msk.f32.gmra.mrb[6].mxu0 %vm166_vm1, %v110_v8  ;;  %v145_v43 = vld [vmem:[%s7279_s0 + $0x150] sm:$0xff]  ;;  %v146_v44 = vld [vmem:[%s7279_s0 + $0x158] sm:$0xff]  ;;  %v147_v45 = vld [vmem:[%s7279_s0 + $0x160] sm:$0xff] }
  0x7e   :  { %4330 = vmatprep.mubr.msk.f32.mxu0 %vm166_vm1, %v111_v9  ;;  %v871_v46 = vld [vmem:[#allocation5 + $0x20] sm:$0xff]  ;;  %v872_v47 = vld [vmem:[#allocation5 + $0x28] sm:$0xff]  ;;  %v873_v52 = vld [vmem:[#allocation5 + $0x30] sm:$0xff] }
  0x7f   :  { %v5033_v48 = vpack.c.bf16 %v872_v47, %v871_v46  ;;  %v148_v49 = vld [vmem:[%s7279_s0 + $0x168] sm:$0xff]  ;;  %v149_v51 = vld [vmem:[%s7279_s0 + $0x170] sm:$0xff]  ;;  %v874_v53 = vld [vmem:[#allocation5 + $0x38] sm:$0xff] }
  0x80   :  { %v5036_v54 = vpack.c.bf16 %v874_v53, %v873_v52  ;;  %v150_v55 = vld [vmem:[%s7279_s0 + $0x178] sm:$0xff]  ;;  %v151_v56 = vld [vmem:[%s7279_s0 + $0x180] sm:$0xff]  ;;  %v152_v58 = vld [vmem:[%s7279_s0 + $0x188] sm:$0xff] }
  0x81   :  { %4331 = vmatmul.mubr.msk.f32.gmra.mrb[8].mxu0 %vm166_vm1, %v112_v10  ;;  %5456 = vmatpush3.bf16.msra.mxu1 %v5033_v48  ;;  %v153_v59 = vld [vmem:[%s7279_s0 + $0x190] sm:$0xff]  ;;  %v154_v60 = vld [vmem:[%s7279_s0 + $0x198] sm:$0xff]  ;;  %v155_v61 = vld [vmem:[%s7279_s0 + $0x1a0] sm:$0xff] }
  0x82   :  { %4333 = vmatprep.mubr.msk.f32.mxu0 %vm166_vm1, %v113_v11  ;;  %5034 = vmatpush3.bf16.msra.mxu0 %v5033_v48  ;;  %v156_v62 = vld [vmem:[%s7279_s0 + $0x1a8] sm:$0xff]  ;;  %v157_v63 = vld [vmem:[%s7279_s0 + $0x1b0] sm:$0xff]  ;;  %v158_v0 = vld [vmem:[%s7279_s0 + $0x1b8] sm:$0xff] }
  0x83   :  { %5035 = vmatprep.subr.bf16.mxu0 %v5900_v50  ;;  %5455 = vmatprep.subr.bf16.mxu1 %v5900_v50  ;;  %v159_v1 = vld [vmem:[%s7279_s0 + $0x1c0] sm:$0xff]  ;;  %v160_v2 = vld [vmem:[%s7279_s0 + $0x1c8] sm:$0xff]  ;;  %v161_v3 = vld [vmem:[%s7279_s0 + $0x1d0] sm:$0xff] }
  0x84   :  { %v162_v4 = vld [vmem:[%s7279_s0 + $0x1d8] sm:$0xff]  ;;  %v163_v5 = vld [vmem:[%s7279_s0 + $0x1e0] sm:$0xff]  ;;  %v164_v6 = vld [vmem:[%s7279_s0 + $0x1e8] sm:$0xff]  ;;  %s5903_s0 = smov [#allocation13]  }
  0x85   :  { %4334 = vmatmul.mubr.msk.f32.gmra.mrb[10].mxu0 %vm166_vm1, %v114_v12  ;;  %5457 = vmatpush3.bf16.msra.mxu1 %v5036_v54  ;;  %v6286_v9 = vld [vmem:[#allocation10] ss:$0 sm:$0xff]  ;;  %v6288_v11 = vld [vmem:[#allocation10 + $0x1] ss:$0 sm:$0xff]  ;;  %v867_v52 = vld [vmem:[#allocation5 + $0x8] sm:$0xff]  ;;  %s3636_s10 = sshll.u32 %s5903_s0, 4  ;;  %s3637_s10 = int_to_ptr.vmem [resolvable:$true] %s3636_s10 }
  0x86   :  { %4336 = vmatprep.mubr.msk.f32.mxu0 %vm166_vm1, %v115_v13  ;;  %5037 = vmatpush3.bf16.msra.mxu0 %v5036_v54  ;;  %s5858_s13 = scalar_lea.vmem %s3637_s10, 384  ;;  %p5863_p7 = scmp.lt.s32.totalorder %s3637_s10, %s3637_s10 }
  0x87   :  { %5038 = vmatprep.subr.bf16.mxu1 %v5900_v50  ;;  %p5859_p6 = scmp.ne.s32.totalorder %s3637_s10, %s5858_s13  ;;  %p5864_p8 = scmp.lt.s32.totalorder %s5858_s13, %s5858_s13 }
  0x89   :  { %4337 = vmatmul.mubr.msk.f32.gmra.mrb[12].mxu0 %vm166_vm1, %v116_v14  ;;  %p5865_p9 = por %p5864_p8, %p5863_p7 }
  0x8a   :  { %4339 = vmatprep.mubr.msk.f32.mxu0 %vm166_vm1, %v117_v15 }
  0x8b   :  { %p5866_p10 = pnand %p5865_p9, %p5859_p6 }
  0x8d   :  { %4340 = vmatmul.mubr.msk.f32.gmra.mrb[14].mxu0 %vm166_vm1, %v118_v16 }
  0x8e   :  { %4342 = vmatprep.mubr.msk.f32.mxu0 %vm166_vm1, %v119_v17 }
  0x91   :  { %4343 = vmatmul.mubr.msk.f32.gmra.mrb[16].mxu0 %vm166_vm1, %v120_v18 }
  0x92   :  { %4345 = vmatprep.mubr.msk.f32.mxu0 %vm166_vm1, %v121_v19 }
  0x95   :  { %4346 = vmatmul.mubr.msk.f32.gmra.mrb[18].mxu0 %vm166_vm1, %v122_v20 }
  0x96   :  { %4348 = vmatprep.mubr.msk.f32.mxu0 %vm166_vm1, %v123_v21 }
  0x99   :  { %4349 = vmatmul.mubr.msk.f32.gmra.mrb[20].mxu0 %vm166_vm1, %v124_v22 }
  0x9a   :  { %4351 = vmatprep.mubr.msk.f32.mxu0 %vm166_vm1, %v125_v23 }
  0x9d   :  { %4352 = vmatmul.mubr.msk.f32.gmra.mrb[22].mxu0 %vm166_vm1, %v126_v24 }
  0x9e   :  { %4354 = vmatprep.mubr.msk.f32.mxu0 %vm166_vm1, %v127_v25 }
  0xa1   :  { %4355 = vmatmul.mubr.msk.f32.gmra.mrb[24].mxu0 %vm166_vm1, %v128_v26 }
  0xa2   :  { %4357 = vmatprep.mubr.msk.f32.mxu0 %vm166_vm1, %v129_v27 }
  0xa5   :  { %4358 = vmatmul.mubr.msk.f32.gmra.mrb[26].mxu0 %vm166_vm1, %v130_v28 }
  0xa6   :  { %4360 = vmatprep.mubr.msk.f32.mxu0 %vm166_vm1, %v131_v29 }
  0xa9   :  { %4361 = vmatmul.mubr.msk.f32.gmra.mrb[28].mxu0 %vm166_vm1, %v132_v30 }
  0xaa   :  { %4363 = vmatprep.mubr.msk.f32.mxu0 %vm166_vm1, %v133_v31 }
  0xad   :  { %4364 = vmatmul.mubr.msk.f32.gmra.mrb[30].mxu0 %vm166_vm1, %v134_v32 }
  0xae   :  { %4366 = vmatprep.mubr.msk.f32.mxu0 %vm166_vm1, %v135_v33 }
  0xb1   :  { %4367 = vmatmul.mubr.msk.f32.gmra.mrb[32].mxu0 %vm166_vm1, %v136_v34 }
  0xb2   :  { %4369 = vmatprep.mubr.msk.f32.mxu0 %vm166_vm1, %v137_v35 }
  0xb5   :  { %4370 = vmatmul.mubr.msk.f32.gmra.mrb[34].mxu0 %vm166_vm1, %v138_v36 }
  0xb6   :  { %4372 = vmatprep.mubr.msk.f32.mxu0 %vm166_vm1, %v139_v37 }
  0xb9   :  { %4373 = vmatmul.mubr.msk.f32.gmra.mrb[36].mxu0 %vm166_vm1, %v140_v38 }
  0xba   :  { %4375 = vmatprep.mubr.msk.f32.mxu0 %vm166_vm1, %v141_v39 }
  0xbd   :  { %4376 = vmatmul.mubr.msk.f32.gmra.mrb[38].mxu0 %vm166_vm1, %v142_v40 }
  0xbe   :  { %4378 = vmatprep.mubr.msk.f32.mxu0 %vm166_vm1, %v143_v41 }
  0xc1   :  { %4379 = vmatmul.mubr.msk.f32.gmra.mrb[40].mxu0 %vm166_vm1, %v144_v42 }
  0xc2   :  { %4381 = vmatprep.mubr.msk.f32.mxu0 %vm166_vm1, %v145_v43 }
  0xc5   :  { %4382 = vmatmul.mubr.msk.f32.gmra.mrb[42].mxu0 %vm166_vm1, %v146_v44 }
  0xc6   :  { %4384 = vmatprep.mubr.msk.f32.mxu0 %vm166_vm1, %v147_v45 }
  0xc9   :  { %4385 = vmatmul.mubr.msk.f32.gmra.mrb[44].mxu0 %vm166_vm1, %v148_v49 }
  0xca   :  { %4387 = vmatprep.mubr.msk.f32.mxu0 %vm166_vm1, %v149_v51  ;;  %v866_v51 = vld [vmem:[#allocation5] sm:$0xff] }
  0xcd   :  { %4388 = vmatmul.mubr.msk.f32.gmra.mrb[46].mxu0 %vm166_vm1, %v150_v55 }
  0xce   :  { %4390 = vmatprep.mubr.msk.f32.mxu0 %vm166_vm1, %v151_v56  ;;  %v5039_v56 = vpack.c.bf16 %v867_v52, %v866_v51 }
  0xd1   :  { %4391 = vmatmul.mubr.msk.f32.gmra.mrb[48].mxu0 %vm166_vm1, %v152_v58 }
  0xd2   :  { %4393 = vmatprep.mubr.msk.f32.mxu0 %vm166_vm1, %v153_v59 }
  0xd5   :  { %4394 = vmatmul.mubr.msk.f32.gmra.mrb[50].mxu0 %vm166_vm1, %v154_v60 }
  0xd6   :  { %4396 = vmatprep.mubr.msk.f32.mxu0 %vm166_vm1, %v155_v61  ;;  %v868_v61 = vld [vmem:[#allocation5 + $0x10] sm:$0xff] }
  0xd9   :  { %4397 = vmatmul.mubr.msk.f32.gmra.mrb[52].mxu0 %vm166_vm1, %v156_v62  ;;  %v869_v62 = vld [vmem:[#allocation5 + $0x18] sm:$0xff] }
  0xda   :  { %4399 = vmatprep.mubr.msk.f32.mxu0 %vm166_vm1, %v157_v63 }
  0xdd   :  { %4400 = vmatmul.mubr.msk.f32.gmra.mrb[54].mxu0 %vm166_vm1, %v158_v0 }
  0xde   :  { %4402 = vmatprep.mubr.msk.f32.mxu0 %vm166_vm1, %v159_v1 }
  0xe1   :  { %4403 = vmatmul.mubr.msk.f32.gmra.mrb[56].mxu0 %vm166_vm1, %v160_v2  ;;  %v5042_v2 = vpack.c.bf16 %v869_v62, %v868_v61 }
  0xe2   :  { %4405 = vmatprep.mubr.msk.f32.mxu0 %vm166_vm1, %v161_v3 }
  0xe5   :  { %4406 = vmatmul.mubr.msk.f32.gmra.mrb[58].mxu0 %vm166_vm1, %v162_v4 }
  0xe6   :  { %4408 = vmatprep.mubr.msk.f32.mxu0 %vm166_vm1, %v163_v5 }
  0xe9   :  { %4409 = vmatmul.mubr.msk.f32.gmra.mrb[60].mxu0 %vm166_vm1, %v164_v6 }
  0xea   :  { %4419 = vmatprep.mubr.msk.f32.mxu0 %vm5901_vm2, %v5902_v57 }
 0x144   :  { %v4320_v7 = vpop.f32.mrb[0].mxu0 }
 0x145   :  { %v423_v8 = vpop.f32.mrb[1].mxu0 }
 0x146   :  { %v732_v10 = vmax.f32 %v423_v8, %v4320_v7 }
 0x148   :  { %v769_v12 = vmul.f32 %v6286_v9, %v732_v10  ;;  %v4323_v13 = vpop.f32.mrb[2].mxu0 }
 0x149   :  { %v433_v14 = vpop.f32.mrb[3].mxu0 }
 0x14a   :  { %v6292_v15 = vadd.f32 %v6288_v11, %v769_v12  ;;  %v733_v16 = vmax.f32 %v433_v14, %v4323_v13 }
 0x14c   :  { %v835_v17 = vmax.f32 %v6292_v15, 0.0  ;;  %v770_v18 = vmul.f32 %v6286_v9, %v733_v16  ;;  %v4326_v19 = vpop.f32.mrb[4].mxu0 }
 0x14d   :  { %v443_v20 = vpop.f32.mrb[5].mxu0 }
 0x14e   :  { %v805_v21 = vadd.f32 %v6288_v11, %v770_v18  ;;  %v734_v22 = vmax.f32 %v443_v20, %v4326_v19  ;;  %4420 = vmatmul.mubr.msk.f32.vlgmr.msra.gmra.mrb[62].mxu0 %vm875_vm3, %v835_v17 }
 0x14f   :  { %4422 = vmatprep.mubr.msk.f32.mxu0 %vm5901_vm2, %v5902_v57 }
 0x150   :  { %v6302_v23 = vmax.f32 %v805_v21, 0.0  ;;  %v771_v24 = vmul.f32 %v6286_v9, %v734_v22  ;;  %v4329_v25 = vpop.f32.mrb[6].mxu0 }
 0x151   :  { %v453_v26 = vpop.f32.mrb[7].mxu0 }
 0x152   :  { %v806_v27 = vadd.f32 %v6288_v11, %v771_v24  ;;  %v735_v28 = vmax.f32 %v453_v26, %v4329_v25  ;;  %4423 = vmatmul.mubr.msk.f32.gmra.mrb[64].mxu0 %vm875_vm3, %v6302_v23 }
 0x153   :  { %4425 = vmatprep.mubr.msk.f32.mxu0 %vm5901_vm2, %v5902_v57 }
 0x154   :  { %v6310_v29 = vmax.f32 %v806_v27, 0.0  ;;  %v772_v30 = vmul.f32 %v6286_v9, %v735_v28  ;;  %v4332_v31 = vpop.f32.mrb[8].mxu0 }
 0x155   :  { %v463_v32 = vpop.f32.mrb[9].mxu0 }
 0x156   :  { %v807_v33 = vadd.f32 %v6288_v11, %v772_v30  ;;  %v736_v34 = vmax.f32 %v463_v32, %v4332_v31  ;;  %4426 = vmatmul.mubr.msk.f32.gmra.mrb[66].mxu0 %vm875_vm3, %v6310_v29 }
 0x157   :  { %4428 = vmatprep.mubr.msk.f32.mxu0 %vm5901_vm2, %v5902_v57 }
 0x158   :  { %v6318_v35 = vmax.f32 %v807_v33, 0.0  ;;  %v773_v36 = vmul.f32 %v6286_v9, %v736_v34  ;;  %v4335_v37 = vpop.f32.mrb[10].mxu0 }
 0x159   :  { %v473_v38 = vpop.f32.mrb[11].mxu0 }
 0x15a   :  { %v808_v39 = vadd.f32 %v6288_v11, %v773_v36  ;;  %v737_v40 = vmax.f32 %v473_v38, %v4335_v37  ;;  %4429 = vmatmul.mubr.msk.f32.gmra.mrb[68].mxu0 %vm875_vm3, %v6318_v35 }
 0x15b   :  { %4431 = vmatprep.mubr.msk.f32.mxu0 %vm5901_vm2, %v5902_v57 }
 0x15c   :  { %v6326_v41 = vmax.f32 %v808_v39, 0.0  ;;  %v774_v42 = vmul.f32 %v6286_v9, %v737_v40  ;;  %v4338_v43 = vpop.f32.mrb[12].mxu0 }
 0x15d   :  { %v483_v44 = vpop.f32.mrb[13].mxu0 }
 0x15e   :  { %v809_v45 = vadd.f32 %v6288_v11, %v774_v42  ;;  %v738_v46 = vmax.f32 %v483_v44, %v4338_v43  ;;  %4432 = vmatmul.mubr.msk.f32.gmra.mrb[70].mxu0 %vm875_vm3, %v6326_v41 }
 0x15f   :  { %4434 = vmatprep.mubr.msk.f32.mxu0 %vm5901_vm2, %v5902_v57 }
 0x160   :  { %v6334_v47 = vmax.f32 %v809_v45, 0.0  ;;  %v775_v48 = vmul.f32 %v6286_v9, %v738_v46  ;;  %v4341_v49 = vpop.f32.mrb[14].mxu0 }
 0x161   :  { %v493_v53 = vpop.f32.mrb[15].mxu0 }
 0x162   :  { %v810_v54 = vadd.f32 %v6288_v11, %v775_v48  ;;  %v739_v55 = vmax.f32 %v493_v53, %v4341_v49  ;;  %4435 = vmatmul.mubr.msk.f32.gmra.mrb[72].mxu0 %vm875_vm3, %v6334_v47 }
 0x164   :  { %v6340_v58 = vmax.f32 %v810_v54, 0.0  ;;  %v776_v59 = vmul.f32 %v6286_v9, %v739_v55  ;;  %v4344_v60 = vpop.f32.mrb[16].mxu0 }
 0x165   :  { %v503_v63 = vpop.f32.mrb[17].mxu0 }
 0x166   :  { %v811_v0 = vadd.f32 %v6288_v11, %v776_v59  ;;  %v740_v1 = vmax.f32 %v503_v63, %v4344_v60  ;;  %4438 = vmatmul.mubr.msk.f32.vlgmr.msra.gmra.mrb[0].mxu1 %vm875_vm3, %v6340_v58 }
 0x167   :  { %5040 = vmatpush3.bf16.msra.mxu1 %v5039_v56  ;;  %4440 = vmatprep.mubr.msk.f32.mxu1 %vm5901_vm2, %v5902_v57 }
 0x168   :  { %v6348_v3 = vmax.f32 %v811_v0, 0.0  ;;  %v777_v4 = vmul.f32 %v6286_v9, %v740_v1  ;;  %v4347_v5 = vpop.f32.mrb[18].mxu0  ;;  %5041 = vmatprep.subr.bf16.mxu1 %v5900_v50 }
 0x169   :  { %v513_v6 = vpop.f32.mrb[19].mxu0 }
 0x16a   :  { %v812_v7 = vadd.f32 %v6288_v11, %v777_v4  ;;  %v741_v8 = vmax.f32 %v513_v6, %v4347_v5  ;;  %4441 = vmatmul.mubr.msk.f32.gmra.mrb[2].mxu1 %vm875_vm3, %v6348_v3 }
 0x16b   :  { %4443 = vmatprep.mubr.msk.f32.mxu1 %vm5901_vm2, %v5902_v57  ;;  %5043 = vmatpush3.bf16.msra.mxu1 %v5042_v2 }
 0x16c   :  { %v6357_v10 = vmax.f32 %v812_v7, 0.0  ;;  %v778_v12 = vmul.f32 %v6286_v9, %v741_v8  ;;  %v4350_v13 = vpop.f32.mrb[20].mxu0  ;;  %5044 = vmatprep.subr.bf16.mxu1 %v5900_v50 }
 0x16d   :  { %v523_v14 = vpop.f32.mrb[21].mxu0 }
 0x16e   :  { %v813_v16 = vadd.f32 %v6288_v11, %v778_v12  ;;  %v742_v18 = vmax.f32 %v523_v14, %v4350_v13  ;;  %4444 = vmatmul.mubr.msk.f32.gmra.mrb[4].mxu1 %vm875_vm3, %v6357_v10 }
 0x16f   :  { %4446 = vmatprep.mubr.msk.f32.mxu1 %vm5901_vm2, %v5902_v57 }
 0x170   :  { %v6366_v19 = vmax.f32 %v813_v16, 0.0  ;;  %v779_v20 = vmul.f32 %v6286_v9, %v742_v18  ;;  %v4353_v21 = vpop.f32.mrb[22].mxu0 }
 0x171   :  { %v533_v22 = vpop.f32.mrb[23].mxu0 }
 0x172   :  { %v814_v24 = vadd.f32 %v6288_v11, %v779_v20  ;;  %v743_v25 = vmax.f32 %v533_v22, %v4353_v21  ;;  %4447 = vmatmul.mubr.msk.f32.gmra.mrb[6].mxu1 %vm875_vm3, %v6366_v19 }
 0x173   :  { %4449 = vmatprep.mubr.msk.f32.mxu1 %vm5901_vm2, %v5902_v57 }
 0x174   :  { %v6374_v26 = vmax.f32 %v814_v24, 0.0  ;;  %v780_v27 = vmul.f32 %v6286_v9, %v743_v25  ;;  %v4356_v28 = vpop.f32.mrb[24].mxu0 }
 0x175   :  { %v543_v30 = vpop.f32.mrb[25].mxu0 }
 0x176   :  { %v815_v31 = vadd.f32 %v6288_v11, %v780_v27  ;;  %v744_v32 = vmax.f32 %v543_v30, %v4356_v28  ;;  %4450 = vmatmul.mubr.msk.f32.gmra.mrb[8].mxu1 %vm875_vm3, %v6374_v26 }
 0x177   :  { %4452 = vmatprep.mubr.msk.f32.mxu1 %vm5901_vm2, %v5902_v57 }
 0x178   :  { %v6382_v33 = vmax.f32 %v815_v31, 0.0  ;;  %v781_v34 = vmul.f32 %v6286_v9, %v744_v32  ;;  %v4359_v36 = vpop.f32.mrb[26].mxu0 }
 0x179   :  { %v553_v37 = vpop.f32.mrb[27].mxu0 }
 0x17a   :  { %v816_v38 = vadd.f32 %v6288_v11, %v781_v34  ;;  %v745_v39 = vmax.f32 %v553_v37, %v4359_v36  ;;  %4453 = vmatmul.mubr.msk.f32.gmra.mrb[10].mxu1 %vm875_vm3, %v6382_v33 }
 0x17b   :  { %4455 = vmatprep.mubr.msk.f32.mxu1 %vm5901_vm2, %v5902_v57 }
 0x17c   :  { %v6390_v40 = vmax.f32 %v816_v38, 0.0  ;;  %v782_v42 = vmul.f32 %v6286_v9, %v745_v39  ;;  %v4362_v43 = vpop.f32.mrb[28].mxu0 }
 0x17d   :  { %v563_v44 = vpop.f32.mrb[29].mxu0 }
 0x17e   :  { %v817_v45 = vadd.f32 %v6288_v11, %v782_v42  ;;  %v746_v46 = vmax.f32 %v563_v44, %v4362_v43  ;;  %4456 = vmatmul.mubr.msk.f32.gmra.mrb[12].mxu1 %vm875_vm3, %v6390_v40 }
 0x17f   :  { %4458 = vmatprep.mubr.msk.f32.mxu1 %vm5901_vm2, %v5902_v57 }
 0x180   :  { %v6398_v48 = vmax.f32 %v817_v45, 0.0  ;;  %v783_v49 = vmul.f32 %v6286_v9, %v746_v46  ;;  %v4365_v51 = vpop.f32.mrb[30].mxu0 }
 0x181   :  { %v573_v52 = vpop.f32.mrb[31].mxu0 }
 0x182   :  { %v818_v53 = vadd.f32 %v6288_v11, %v783_v49  ;;  %v747_v54 = vmax.f32 %v573_v52, %v4365_v51  ;;  %4459 = vmatmul.mubr.msk.f32.gmra.mrb[14].mxu1 %vm875_vm3, %v6398_v48 }
 0x183   :  { %4461 = vmatprep.mubr.msk.f32.mxu1 %vm5901_vm2, %v5902_v57 }
 0x184   :  { %v6406_v55 = vmax.f32 %v818_v53, 0.0  ;;  %v784_v56 = vmul.f32 %v6286_v9, %v747_v54  ;;  %v4368_v59 = vpop.f32.mrb[32].mxu0 }
 0x185   :  { %v583_v60 = vpop.f32.mrb[33].mxu0 }
 0x186   :  { %v819_v61 = vadd.f32 %v6288_v11, %v784_v56  ;;  %v748_v62 = vmax.f32 %v583_v60, %v4368_v59  ;;  %4462 = vmatmul.mubr.msk.f32.gmra.mrb[16].mxu1 %vm875_vm3, %v6406_v55 }
 0x187   :  { %4464 = vmatprep.mubr.msk.f32.mxu1 %vm5901_vm2, %v5902_v57 }
 0x188   :  { %v6414_v63 = vmax.f32 %v819_v61, 0.0  ;;  %v785_v0 = vmul.f32 %v6286_v9, %v748_v62  ;;  %v4371_v1 = vpop.f32.mrb[34].mxu0 }
 0x189   :  { %v593_v2 = vpop.f32.mrb[35].mxu0 }
 0x18a   :  { %v820_v4 = vadd.f32 %v6288_v11, %v785_v0  ;;  %v749_v5 = vmax.f32 %v593_v2, %v4371_v1  ;;  %4465 = vmatmul.mubr.msk.f32.gmra.mrb[18].mxu1 %vm875_vm3, %v6414_v63 }
 0x18b   :  { %4467 = vmatprep.mubr.msk.f32.mxu1 %vm5901_vm2, %v5902_v57 }
 0x18c   :  { %v6422_v6 = vmax.f32 %v820_v4, 0.0  ;;  %v786_v7 = vmul.f32 %v6286_v9, %v749_v5  ;;  %v4374_v8 = vpop.f32.mrb[36].mxu0 }
 0x18d   :  { %v603_v12 = vpop.f32.mrb[37].mxu0 }
 0x18e   :  { %v821_v13 = vadd.f32 %v6288_v11, %v786_v7  ;;  %v750_v14 = vmax.f32 %v603_v12, %v4374_v8  ;;  %4468 = vmatmul.mubr.msk.f32.gmra.mrb[20].mxu1 %vm875_vm3, %v6422_v6 }
 0x18f   :  { %4470 = vmatprep.mubr.msk.f32.mxu1 %vm5901_vm2, %v5902_v57 }
 0x190   :  { %v6430_v16 = vmax.f32 %v821_v13, 0.0  ;;  %v787_v18 = vmul.f32 %v6286_v9, %v750_v14  ;;  %v4377_v20 = vpop.f32.mrb[38].mxu0 }
 0x191   :  { %v613_v21 = vpop.f32.mrb[39].mxu0 }
 0x192   :  { %v822_v22 = vadd.f32 %v6288_v11, %v787_v18  ;;  %v751_v24 = vmax.f32 %v613_v21, %v4377_v20  ;;  %4471 = vmatmul.mubr.msk.f32.gmra.mrb[22].mxu1 %vm875_vm3, %v6430_v16 }
 0x193   :  { %4473 = vmatprep.mubr.msk.f32.mxu1 %vm5901_vm2, %v5902_v57 }
 0x194   :  { %v6438_v25 = vmax.f32 %v822_v22, 0.0  ;;  %v788_v27 = vmul.f32 %v6286_v9, %v751_v24  ;;  %v4380_v28 = vpop.f32.mrb[40].mxu0 }
 0x195   :  { %v623_v30 = vpop.f32.mrb[41].mxu0 }
 0x196   :  { %v823_v31 = vadd.f32 %v6288_v11, %v788_v27  ;;  %v752_v32 = vmax.f32 %v623_v30, %v4380_v28  ;;  %4474 = vmatmul.mubr.msk.f32.gmra.mrb[24].mxu1 %vm875_vm3, %v6438_v25 }
 0x197   :  { %4476 = vmatprep.mubr.msk.f32.mxu1 %vm5901_vm2, %v5902_v57 }
 0x198   :  { %v6446_v34 = vmax.f32 %v823_v31, 0.0  ;;  %v789_v36 = vmul.f32 %v6286_v9, %v752_v32  ;;  %v4383_v37 = vpop.f32.mrb[42].mxu0 }
 0x199   :  { %v633_v38 = vpop.f32.mrb[43].mxu0 }
 0x19a   :  { %v824_v39 = vadd.f32 %v6288_v11, %v789_v36  ;;  %v753_v42 = vmax.f32 %v633_v38, %v4383_v37  ;;  %4477 = vmatmul.mubr.msk.f32.gmra.mrb[26].mxu1 %vm875_vm3, %v6446_v34 }
 0x19b   :  { %4479 = vmatprep.mubr.msk.f32.mxu1 %vm5901_vm2, %v5902_v57 }
 0x19c   :  { %v6454_v43 = vmax.f32 %v824_v39, 0.0  ;;  %v790_v44 = vmul.f32 %v6286_v9, %v753_v42  ;;  %v4386_v45 = vpop.f32.mrb[44].mxu0 }
 0x19d   :  { %v643_v46 = vpop.f32.mrb[45].mxu0 }
 0x19e   :  { %v825_v49 = vadd.f32 %v6288_v11, %v790_v44  ;;  %v754_v51 = vmax.f32 %v643_v46, %v4386_v45  ;;  %4480 = vmatmul.mubr.msk.f32.gmra.mrb[28].mxu1 %vm875_vm3, %v6454_v43 }
 0x19f   :  { %4482 = vmatprep.mubr.msk.f32.mxu1 %vm5901_vm2, %v5902_v57 }
 0x1a0   :  { %v6462_v52 = vmax.f32 %v825_v49, 0.0  ;;  %v791_v53 = vmul.f32 %v6286_v9, %v754_v51  ;;  %v4389_v54 = vpop.f32.mrb[46].mxu0 }
 0x1a1   :  { %v653_v56 = vpop.f32.mrb[47].mxu0 }
 0x1a2   :  { %v826_v59 = vadd.f32 %v6288_v11, %v791_v53  ;;  %v755_v60 = vmax.f32 %v653_v56, %v4389_v54  ;;  %4483 = vmatmul.mubr.msk.f32.gmra.mrb[30].mxu1 %vm875_vm3, %v6462_v52 }
 0x1a3   :  { %4485 = vmatprep.mubr.msk.f32.mxu1 %vm5901_vm2, %v5902_v57 }
 0x1a4   :  { %v6470_v61 = vmax.f32 %v826_v59, 0.0  ;;  %v792_v62 = vmul.f32 %v6286_v9, %v755_v60  ;;  %v4392_v0 = vpop.f32.mrb[48].mxu0 }
 0x1a5   :  { %v663_v1 = vpop.f32.mrb[49].mxu0 }
 0x1a6   :  { %v827_v2 = vadd.f32 %v6288_v11, %v792_v62  ;;  %v756_v4 = vmax.f32 %v663_v1, %v4392_v0  ;;  %4486 = vmatmul.mubr.msk.f32.gmra.mrb[32].mxu1 %vm875_vm3, %v6470_v61  ;;  %v1385_v62 = vld [vmem:[#allocation5 + $0x40] sm:$0xff]  ;;  %v1386_v0 = vld [vmem:[#allocation5 + $0x48] sm:$0xff] }
 0x1a7   :  { %4488 = vmatprep.mubr.msk.f32.mxu1 %vm5901_vm2, %v5902_v57 }
 0x1a8   :  { %v6478_v5 = vmax.f32 %v827_v2, 0.0  ;;  %v793_v7 = vmul.f32 %v6286_v9, %v756_v4  ;;  %v4395_v8 = vpop.f32.mrb[50].mxu0 }
 0x1a9   :  { %v673_v12 = vpop.f32.mrb[51].mxu0 }
 0x1aa   :  { %v828_v13 = vadd.f32 %v6288_v11, %v793_v7  ;;  %v757_v14 = vmax.f32 %v673_v12, %v4395_v8  ;;  %4489 = vmatmul.mubr.msk.f32.gmra.mrb[34].mxu1 %vm875_vm3, %v6478_v5  ;;  %v5045_v7 = vpack.c.bf16 %v1386_v0, %v1385_v62  ;;  %v1387_v8 = vld [vmem:[#allocation5 + $0x50] sm:$0xff]  ;;  %v1388_v12 = vld [vmem:[#allocation5 + $0x58] sm:$0xff] }
 0x1ab   :  { %4491 = vmatprep.mubr.msk.f32.mxu1 %vm5901_vm2, %v5902_v57 }
 0x1ac   :  { %v6486_v18 = vmax.f32 %v828_v13, 0.0  ;;  %v794_v20 = vmul.f32 %v6286_v9, %v757_v14  ;;  %v4398_v21 = vpop.f32.mrb[52].mxu0  ;;  %v5048_v13 = vpack.c.bf16 %v1388_v12, %v1387_v8  ;;  %v1878_v8 = vld [vmem:[#allocation5 + $0x98] sm:$0xff] }
 0x1ad   :  { %v683_v22 = vpop.f32.mrb[53].mxu0 }
 0x1ae   :  { %v829_v24 = vadd.f32 %v6288_v11, %v794_v20  ;;  %v758_v27 = vmax.f32 %v683_v22, %v4398_v21  ;;  %4492 = vmatmul.mubr.msk.f32.gmra.mrb[36].mxu1 %vm875_vm3, %v6486_v18 }
 0x1af   :  { %4494 = vmatprep.mubr.msk.f32.mxu1 %vm5901_vm2, %v5902_v57 }
 0x1b0   :  { %v6494_v28 = vmax.f32 %v829_v24, 0.0  ;;  %v795_v30 = vmul.f32 %v6286_v9, %v758_v27  ;;  %v4401_v31 = vpop.f32.mrb[54].mxu0 }
 0x1b1   :  { %v693_v32 = vpop.f32.mrb[55].mxu0 }
 0x1b2   :  { %v830_v36 = vadd.f32 %v6288_v11, %v795_v30  ;;  %v759_v37 = vmax.f32 %v693_v32, %v4401_v31  ;;  %4495 = vmatmul.mubr.msk.f32.gmra.mrb[38].mxu1 %vm875_vm3, %v6494_v28  ;;  %v1630_v30 = vld [vmem:[#allocation5 + $0x60] sm:$0xff]  ;;  %v1631_v31 = vld [vmem:[#allocation5 + $0x68] sm:$0xff] }
 0x1b3   :  { %4497 = vmatprep.mubr.msk.f32.mxu1 %vm5901_vm2, %v5902_v57 }
 0x1b4   :  { %v6502_v38 = vmax.f32 %v830_v36, 0.0  ;;  %v796_v39 = vmul.f32 %v6286_v9, %v759_v37  ;;  %v4404_v42 = vpop.f32.mrb[56].mxu0  ;;  %v5051_v37 = vpack.c.bf16 %v1631_v31, %v1630_v30 }
 0x1b5   :  { %v703_v44 = vpop.f32.mrb[57].mxu0 }
 0x1b6   :  { %v831_v45 = vadd.f32 %v6288_v11, %v796_v39  ;;  %v760_v46 = vmax.f32 %v703_v44, %v4404_v42  ;;  %4498 = vmatmul.mubr.msk.f32.gmra.mrb[40].mxu1 %vm875_vm3, %v6502_v38  ;;  %v1632_v39 = vld [vmem:[#allocation5 + $0x70] sm:$0xff]  ;;  %v1633_v42 = vld [vmem:[#allocation5 + $0x78] sm:$0xff] }
 0x1b7   :  { %4500 = vmatprep.mubr.msk.f32.mxu1 %vm5901_vm2, %v5902_v57 }
 0x1b8   :  { %v6510_v49 = vmax.f32 %v831_v45, 0.0  ;;  %v797_v51 = vmul.f32 %v6286_v9, %v760_v46  ;;  %v6513_v53 = vpop.f32.mrb[58].mxu0  ;;  %v5054_v46 = vpack.c.bf16 %v1633_v42, %v1632_v39 }
 0x1b9   :  { %v6515_v54 = vpop.f32.mrb[59].mxu0 }
 0x1ba   :  { %v832_v56 = vadd.f32 %v6288_v11, %v797_v51  ;;  %4501 = vmatmul.mubr.msk.f32.gmra.mrb[42].mxu1 %vm875_vm3, %v6510_v49  ;;  %v761_v59 = vmax.f32 %v6515_v54, %v6513_v53  ;;  %v1875_v53 = vld [vmem:[#allocation5 + $0x80] sm:$0xff]  ;;  %v1876_v54 = vld [vmem:[#allocation5 + $0x88] sm:$0xff] }
 0x1bb   :  { %4503 = vmatprep.mubr.msk.f32.mxu1 %vm5901_vm2, %v5902_v57 }
 0x1bc   :  { %v6524_v60 = vmax.f32 %v832_v56, 0.0  ;;  %v6526_v1 = vpop.f32.mrb[60].mxu0  ;;  %v798_v56 = vmul.f32 %v6286_v9, %v761_v59  ;;  %v5057_v59 = vpack.c.bf16 %v1876_v54, %v1875_v53  ;;  %v2186_v54 = vld [vmem:[#allocation7 + $0x20] sm:$0xff] }
 0x1bd   :  { %v6528_v2 = vpop.f32.mrb[61].mxu0 }
 0x1be   :  { %4504 = vmatmul.mubr.msk.f32.gmra.mrb[44].mxu1 %vm875_vm3, %v6524_v60  ;;  %v762_v4 = vmax.f32 %v6528_v2, %v6526_v1  ;;  %v833_v62 = vadd.f32 %v6288_v11, %v798_v56 }
 0x1bf   :  { %4514 = vmatprep.mubr.msk.f32.mxu1 %vm5901_vm2, %v5902_v57 }
 0x1c0   :  { %v6781_v0 = vmax.f32 %v833_v62, 0.0 }
 0x1c2   :  { %4515 = vmatmul.mubr.f32.vlgmr.msra.gmra.mrb[46].mxu1 %v5902_v57 }
 0x1c3   :  { %5046 = vmatpush3.bf16.msra.mxu1 %v5045_v7  ;;  %4517 = vmatprep.mubr.msk.f32.mxu1 %vm5901_vm2, %v5902_v57  ;;  %v1877_v7 = vld [vmem:[#allocation5 + $0x90] sm:$0xff] }
 0x1c4   :  { %5047 = vmatprep.subr.bf16.mxu1 %v5900_v50  ;;  %v5060_v12 = vpack.c.bf16 %v1878_v8, %v1877_v7 }
 0x1c6   :  { %4518 = vmatmul.mubr.msk.f32.gmra.mrb[48].mxu1 %vm875_vm3, %v835_v17 }
 0x1c7   :  { %4520 = vmatprep.mubr.msk.f32.mxu1 %vm5901_vm2, %v5902_v57  ;;  %5049 = vmatpush3.bf16.msra.mxu1 %v5048_v13 }
 0x1c8   :  { %5050 = vmatprep.subr.bf16.mxu1 %v5900_v50 }
 0x1ca   :  { %4521 = vmatmul.mubr.msk.f32.gmra.mrb[50].mxu1 %vm875_vm3, %v6302_v23 }
 0x1cb   :  { %4523 = vmatprep.mubr.msk.f32.mxu1 %vm5901_vm2, %v5902_v57 }
 0x1ce   :  { %4524 = vmatmul.mubr.msk.f32.gmra.mrb[52].mxu1 %vm875_vm3, %v6310_v29 }
 0x1cf   :  { %4526 = vmatprep.mubr.msk.f32.mxu1 %vm5901_vm2, %v5902_v57 }
 0x1d2   :  { %4527 = vmatmul.mubr.msk.f32.gmra.mrb[54].mxu1 %vm875_vm3, %v6318_v35 }
 0x1d3   :  { %4529 = vmatprep.mubr.msk.f32.mxu1 %vm5901_vm2, %v5902_v57 }
 0x1d6   :  { %4530 = vmatmul.mubr.msk.f32.gmra.mrb[56].mxu1 %vm875_vm3, %v6326_v41 }
 0x1d7   :  { %4532 = vmatprep.mubr.msk.f32.mxu1 %vm5901_vm2, %v5902_v57 }
 0x1da   :  { %4533 = vmatmul.mubr.msk.f32.gmra.mrb[0].mxu1 %vm875_vm3, %v6334_v47 }
 0x1db   :  { %4535 = vmatprep.mubr.msk.f32.mxu1 %vm5901_vm2, %v5902_v57 }
 0x1de   :  { %4536 = vmatmul.mubr.msk.f32.gmra.mrb[2].mxu1 %vm875_vm3, %v6340_v58 }
 0x1df   :  { %4538 = vmatprep.mubr.msk.f32.mxu1 %vm5901_vm2, %v5902_v57 }
 0x1e2   :  { %4539 = vmatmul.mubr.msk.f32.gmra.mrb[4].mxu1 %vm875_vm3, %v6348_v3 }
 0x1e3   :  { %4541 = vmatprep.mubr.msk.f32.mxu1 %vm5901_vm2, %v5902_v57 }
 0x1e6   :  { %4542 = vmatmul.mubr.msk.f32.gmra.mrb[6].mxu1 %vm875_vm3, %v6357_v10 }
 0x1e7   :  { %4544 = vmatprep.mubr.msk.f32.mxu1 %vm5901_vm2, %v5902_v57 }
 0x1ea   :  { %4545 = vmatmul.mubr.msk.f32.gmra.mrb[8].mxu1 %vm875_vm3, %v6366_v19 }
 0x1eb   :  { %4547 = vmatprep.mubr.msk.f32.mxu1 %vm5901_vm2, %v5902_v57 }
 0x1ee   :  { %4548 = vmatmul.mubr.msk.f32.gmra.mrb[10].mxu1 %vm875_vm3, %v6374_v26 }
 0x1ef   :  { %4550 = vmatprep.mubr.msk.f32.mxu1 %vm5901_vm2, %v5902_v57 }
 0x1f2   :  { %4551 = vmatmul.mubr.msk.f32.gmra.mrb[12].mxu1 %vm875_vm3, %v6382_v33 }
 0x1f3   :  { %4553 = vmatprep.mubr.msk.f32.mxu1 %vm5901_vm2, %v5902_v57 }
 0x1f6   :  { %4554 = vmatmul.mubr.msk.f32.gmra.mrb[14].mxu1 %vm875_vm3, %v6390_v40 }
 0x1f7   :  { %4556 = vmatprep.mubr.msk.f32.mxu1 %vm5901_vm2, %v5902_v57 }
 0x1fa   :  { %4557 = vmatmul.mubr.msk.f32.gmra.mrb[16].mxu1 %vm875_vm3, %v6398_v48 }
 0x1fb   :  { %4559 = vmatprep.mubr.msk.f32.mxu1 %vm5901_vm2, %v5902_v57 }
 0x1fe   :  { %4560 = vmatmul.mubr.msk.f32.gmra.mrb[18].mxu1 %vm875_vm3, %v6406_v55 }
 0x1ff   :  { %4562 = vmatprep.mubr.msk.f32.mxu1 %vm5901_vm2, %v5902_v57 }
 0x202   :  { %4563 = vmatmul.mubr.msk.f32.gmra.mrb[20].mxu1 %vm875_vm3, %v6414_v63 }
 0x203   :  { %4565 = vmatprep.mubr.msk.f32.mxu1 %vm5901_vm2, %v5902_v57 }
 0x206   :  { %4566 = vmatmul.mubr.msk.f32.gmra.mrb[22].mxu1 %vm875_vm3, %v6422_v6 }
 0x207   :  { %4568 = vmatprep.mubr.msk.f32.mxu1 %vm5901_vm2, %v5902_v57 }
 0x20a   :  { %4569 = vmatmul.mubr.msk.f32.gmra.mrb[24].mxu1 %vm875_vm3, %v6430_v16 }
 0x20b   :  { %4571 = vmatprep.mubr.msk.f32.mxu1 %vm5901_vm2, %v5902_v57 }
 0x20e   :  { %4572 = vmatmul.mubr.msk.f32.gmra.mrb[26].mxu1 %vm875_vm3, %v6438_v25 }
 0x20f   :  { %4574 = vmatprep.mubr.msk.f32.mxu1 %vm5901_vm2, %v5902_v57 }
 0x212   :  { %4575 = vmatmul.mubr.msk.f32.gmra.mrb[28].mxu1 %vm875_vm3, %v6446_v34 }
 0x213   :  { %4577 = vmatprep.mubr.msk.f32.mxu1 %vm5901_vm2, %v5902_v57 }
 0x216   :  { %4578 = vmatmul.mubr.msk.f32.gmra.mrb[30].mxu1 %vm875_vm3, %v6454_v43 }
 0x217   :  { %4580 = vmatprep.mubr.msk.f32.mxu1 %vm5901_vm2, %v5902_v57 }
 0x21a   :  { %4581 = vmatmul.mubr.msk.f32.gmra.mrb[32].mxu1 %vm875_vm3, %v6462_v52 }
 0x21b   :  { %4583 = vmatprep.mubr.msk.f32.mxu1 %vm5901_vm2, %v5902_v57 }
 0x21e   :  { %4584 = vmatmul.mubr.msk.f32.gmra.mrb[34].mxu1 %vm875_vm3, %v6470_v61 }
 0x21f   :  { %4586 = vmatprep.mubr.msk.f32.mxu1 %vm5901_vm2, %v5902_v57 }
 0x221   :  { %v6634_v15 = vpop.f32.mrb[62].mxu0 }
 0x222   :  { %v4421_v17 = vpop.f32.mrb[63].mxu0  ;;  %4587 = vmatmul.mubr.msk.f32.gmra.mrb[36].mxu1 %vm875_vm3, %v6478_v5 }
 0x223   :  { %4589 = vmatprep.mubr.msk.f32.mxu1 %vm5901_vm2, %v5902_v57  ;;  %v799_v17 = vmul.f32 %v6286_v9, %v762_v4  ;;  %v2191_v9 = vld [vmem:[#allocation7 + $0x40] sm:$0xff] }
 0x225   :  { %v6640_v14 = vpop.f32.mrb[64].mxu0 }
 0x226   :  { %v4424_v20 = vpop.f32.mrb[65].mxu0  ;;  %4590 = vmatmul.mubr.msk.f32.gmra.mrb[38].mxu1 %vm875_vm3, %v6486_v18 }
 0x227   :  { %4592 = vmatprep.mubr.msk.f32.mxu1 %vm5901_vm2, %v5902_v57  ;;  %v6901_v20 = vadd.f32 %v6288_v11, %v799_v17  ;;  %v2192_v11 = vld [vmem:[#allocation7 + $0x48] sm:$0xff]  ;;  %v2189_v17 = vld [vmem:[#allocation7 + $0x38] sm:$0xff] }
 0x229   :  { %v6646_v21 = vpop.f32.mrb[66].mxu0 }
 0x22a   :  { %v4427_v22 = vpop.f32.mrb[67].mxu0  ;;  %4593 = vmatmul.mubr.msk.f32.gmra.mrb[40].mxu1 %vm875_vm3, %v6494_v28 }
 0x22b   :  { %4595 = vmatprep.mubr.msk.f32.mxu1 %vm5901_vm2, %v5902_v57  ;;  %v865_v22 = vmax.f32 %v6901_v20, 0.0 }
 0x22d   :  { %v6652_v24 = vpop.f32.mrb[68].mxu0 }
 0x22e   :  { %v4430_v27 = vpop.f32.mrb[69].mxu0  ;;  %4596 = vmatmul.mubr.msk.f32.gmra.mrb[42].mxu1 %vm875_vm3, %v6502_v38 }
 0x22f   :  { %4598 = vmatprep.mubr.msk.f32.mxu1 %vm5901_vm2, %v5902_v57 }
 0x231   :  { %v6658_v32 = vpop.f32.mrb[70].mxu0 }
 0x232   :  { %v4433_v36 = vpop.f32.mrb[71].mxu0  ;;  %4599 = vmatmul.mubr.msk.f32.gmra.mrb[58].mxu1 %vm875_vm3, %v6510_v49 }
 0x233   :  { %4609 = vmatprep.mubr.msk.f32.mxu1 %vm5901_vm2, %v5902_v57 }
 0x235   :  { %v6664_v44 = vpop.f32.mrb[72].mxu0 }
 0x236   :  { %v4436_v45 = vpop.f32.mrb[73].mxu0  ;;  %4610 = vmatmul.mubr.msk.f32.vlgmr.msra.gmra.mrb[46].mxu1 %vm875_vm3, %v6302_v23 }
 0x237   :  { %5052 = vmatpush3.bf16.msra.mxu1 %v5051_v37  ;;  %4612 = vmatprep.mubr.msk.f32.mxu1 %vm5901_vm2, %v5902_v57 }
 0x238   :  { %5053 = vmatprep.subr.bf16.mxu1 %v5900_v50 }
 0x23a   :  { %4613 = vmatmul.mubr.msk.f32.gmra.mrb[48].mxu1 %vm875_vm3, %v6310_v29 }
 0x23b   :  { %4615 = vmatprep.mubr.msk.f32.mxu1 %vm5901_vm2, %v5902_v57  ;;  %5055 = vmatpush3.bf16.msra.mxu1 %v5054_v46  ;;  %v2184_v46 = vld [vmem:[#allocation7 + $0x10] sm:$0xff] }
 0x23c   :  { %5056 = vmatprep.subr.bf16.mxu1 %v5900_v50 }
 0x23e   :  { %4616 = vmatmul.mubr.msk.f32.gmra.mrb[50].mxu1 %vm875_vm3, %v6318_v35 }
 0x23f   :  { %4618 = vmatprep.mubr.msk.f32.mxu1 %vm5901_vm2, %v5902_v57 }
 0x242   :  { %4619 = vmatmul.mubr.msk.f32.gmra.mrb[52].mxu1 %vm875_vm3, %v6326_v41 }
 0x243   :  { %4621 = vmatprep.mubr.msk.f32.mxu1 %vm5901_vm2, %v5902_v57 }
 0x246   :  { %4622 = vmatmul.mubr.msk.f32.gmra.mrb[54].mxu1 %vm875_vm3, %v6334_v47 }
 0x247   :  { %4624 = vmatprep.mubr.msk.f32.mxu1 %vm5901_vm2, %v5902_v57 }
 0x24a   :  { %4625 = vmatmul.mubr.msk.f32.gmra.mrb[56].mxu1 %vm875_vm3, %v6340_v58 }
 0x24b   :  { %4627 = vmatprep.mubr.msk.f32.mxu1 %vm5901_vm2, %v5902_v57 }
 0x24e   :  { %4628 = vmatmul.mubr.msk.f32.gmra.mrb[0].mxu1 %vm875_vm3, %v6348_v3 }
 0x24f   :  { %4630 = vmatprep.mubr.msk.f32.mxu1 %vm5901_vm2, %v5902_v57 }
 0x252   :  { %4631 = vmatmul.mubr.msk.f32.gmra.mrb[2].mxu1 %vm875_vm3, %v6357_v10 }
 0x253   :  { %4633 = vmatprep.mubr.msk.f32.mxu1 %vm5901_vm2, %v5902_v57 }
 0x256   :  { %4634 = vmatmul.mubr.msk.f32.gmra.mrb[4].mxu1 %vm875_vm3, %v6366_v19 }
 0x257   :  { %4636 = vmatprep.mubr.msk.f32.mxu1 %vm5901_vm2, %v5902_v57 }
 0x25a   :  { %4637 = vmatmul.mubr.msk.f32.gmra.mrb[6].mxu1 %vm875_vm3, %v6374_v26 }
 0x25b   :  { %4639 = vmatprep.mubr.msk.f32.mxu1 %vm5901_vm2, %v5902_v57 }
 0x25e   :  { %4640 = vmatmul.mubr.msk.f32.gmra.mrb[8].mxu1 %vm875_vm3, %v6382_v33 }
 0x25f   :  { %4642 = vmatprep.mubr.msk.f32.mxu1 %vm5901_vm2, %v5902_v57 }
 0x262   :  { %4643 = vmatmul.mubr.msk.f32.gmra.mrb[10].mxu1 %vm875_vm3, %v6390_v40 }
 0x263   :  { %4645 = vmatprep.mubr.msk.f32.mxu1 %vm5901_vm2, %v5902_v57 }
 0x266   :  { %4646 = vmatmul.mubr.msk.f32.gmra.mrb[12].mxu1 %vm875_vm3, %v6398_v48 }
 0x267   :  { %4648 = vmatprep.mubr.msk.f32.mxu1 %vm5901_vm2, %v5902_v57 }
 0x26a   :  { %4649 = vmatmul.mubr.msk.f32.gmra.mrb[14].mxu1 %vm875_vm3, %v6406_v55 }
 0x26b   :  { %4651 = vmatprep.mubr.msk.f32.mxu1 %vm5901_vm2, %v5902_v57 }
 0x26e   :  { %4652 = vmatmul.mubr.msk.f32.gmra.mrb[16].mxu1 %vm875_vm3, %v6414_v63 }
 0x26f   :  { %4654 = vmatprep.mubr.msk.f32.mxu1 %vm5901_vm2, %v5902_v57 }
 0x272   :  { %4655 = vmatmul.mubr.msk.f32.gmra.mrb[18].mxu1 %vm875_vm3, %v6422_v6 }
 0x273   :  { %4657 = vmatprep.mubr.msk.f32.mxu1 %vm5901_vm2, %v5902_v57 }
 0x276   :  { %4658 = vmatmul.mubr.msk.f32.gmra.mrb[20].mxu1 %vm875_vm3, %v6430_v16 }
 0x277   :  { %4660 = vmatprep.mubr.msk.f32.mxu1 %vm5901_vm2, %v5902_v57 }
 0x27a   :  { %4661 = vmatmul.mubr.msk.f32.gmra.mrb[22].mxu1 %vm875_vm3, %v6438_v25 }
 0x27b   :  { %4663 = vmatprep.mubr.msk.f32.mxu1 %vm5901_vm2, %v5902_v57 }
 0x27e   :  { %4664 = vmatmul.mubr.msk.f32.gmra.mrb[24].mxu1 %vm875_vm3, %v6446_v34 }
 0x27f   :  { %4666 = vmatprep.mubr.msk.f32.mxu1 %vm5901_vm2, %v5902_v57 }
 0x282   :  { %4667 = vmatmul.mubr.msk.f32.gmra.mrb[26].mxu1 %vm875_vm3, %v6454_v43 }
 0x283   :  { %4669 = vmatprep.mubr.msk.f32.mxu1 %vm5901_vm2, %v5902_v57 }
 0x286   :  { %4670 = vmatmul.mubr.msk.f32.gmra.mrb[28].mxu1 %vm875_vm3, %v6462_v52 }
 0x287   :  { %4672 = vmatprep.mubr.msk.f32.mxu1 %vm5901_vm2, %v5902_v57 }
 0x28a   :  { %4673 = vmatmul.mubr.msk.f32.gmra.mrb[30].mxu1 %vm875_vm3, %v6470_v61 }
 0x28b   :  { %4675 = vmatprep.mubr.msk.f32.mxu1 %vm5901_vm2, %v5902_v57 }
 0x28e   :  { %4676 = vmatmul.mubr.msk.f32.gmra.mrb[32].mxu1 %vm875_vm3, %v6478_v5 }
 0x28f   :  { %4678 = vmatprep.mubr.msk.f32.mxu1 %vm5901_vm2, %v5902_v57 }
 0x291   :  { %v1169_v23 = vpop.f32.mrb[44].mxu1 }
 0x292   :  { %v4505_v51 = vpop.f32.mrb[45].mxu1  ;;  %4679 = vmatmul.mubr.msk.f32.gmra.mrb[34].mxu1 %vm875_vm3, %v6486_v18  ;;  %v2185_v23 = vld [vmem:[#allocation7 + $0x18] sm:$0xff] }
 0x293   :  { %4681 = vmatprep.mubr.msk.f32.mxu1 %vm5901_vm2, %v5902_v57  ;;  %v5082_v53 = vpack.c.bf16 %v2185_v23, %v2184_v46 }
 0x296   :  { %4682 = vmatmul.mubr.msk.f32.gmra.mrb[36].mxu1 %vm875_vm3, %v6494_v28 }
 0x297   :  { %4684 = vmatprep.mubr.msk.f32.mxu1 %vm5901_vm2, %v5902_v57 }
 0x29a   :  { %4685 = vmatmul.mubr.msk.f32.gmra.mrb[38].mxu1 %vm875_vm3, %v6502_v38 }
 0x29b   :  { %4687 = vmatprep.mubr.msk.f32.mxu1 %vm5901_vm2, %v5902_v57 }
 0x29e   :  { %4688 = vmatmul.mubr.msk.f32.gmra.mrb[40].mxu1 %vm875_vm3, %v6510_v49 }
 0x29f   :  { %4690 = vmatprep.mubr.msk.f32.mxu1 %vm5901_vm2, %v5902_v57 }
 0x2a2   :  { %4691 = vmatmul.mubr.msk.f32.gmra.mrb[42].mxu1 %vm875_vm3, %v6524_v60 }
 0x2a3   :  { %4693 = vmatprep.mubr.msk.f32.mxu1 %vm5901_vm2, %v5902_v57 }
 0x2a6   :  { %4694 = vmatmul.mubr.msk.f32.gmra.mrb[60].mxu1 %vm875_vm3, %v6781_v0 }
 0x2a7   :  { %4704 = vmatprep.mubr.msk.f32.mxu1 %vm5901_vm2, %v5902_v57 }
 0x2aa   :  { %4705 = vmatmul.mubr.msk.f32.vlgmr.msra.gmra.mrb[46].mxu1 %vm875_vm3, %v6310_v29 }
 0x2ab   :  { %5058 = vmatpush3.bf16.msra.mxu1 %v5057_v59  ;;  %4707 = vmatprep.mubr.msk.f32.mxu1 %vm5901_vm2, %v5902_v57  ;;  %v2187_v59 = vld [vmem:[#allocation7 + $0x28] sm:$0xff] }
 0x2ac   :  { %5059 = vmatprep.subr.bf16.mxu1 %v5900_v50 }
 0x2ae   :  { %4708 = vmatmul.mubr.msk.f32.gmra.mrb[48].mxu1 %vm875_vm3, %v6318_v35 }
 0x2af   :  { %4710 = vmatprep.mubr.msk.f32.mxu1 %vm5901_vm2, %v5902_v57  ;;  %5061 = vmatpush3.bf16.msra.mxu1 %v5060_v12 }
 0x2b2   :  { %4711 = vmatmul.mubr.msk.f32.gmra.mrb[50].mxu1 %vm875_vm3, %v6326_v41 }
 0x2b3   :  { %4713 = vmatprep.mubr.msk.f32.mxu1 %vm5901_vm2, %v5902_v57 }
 0x2b6   :  { %4714 = vmatmul.mubr.msk.f32.gmra.mrb[52].mxu1 %vm875_vm3, %v6334_v47 }
 0x2b7   :  { %4716 = vmatprep.mubr.msk.f32.mxu1 %vm5901_vm2, %v5902_v57 }
 0x2ba   :  { %4717 = vmatmul.mubr.msk.f32.gmra.mrb[54].mxu1 %vm875_vm3, %v6340_v58 }
 0x2bb   :  { %4719 = vmatprep.mubr.msk.f32.mxu1 %vm5901_vm2, %v5902_v57 }
 0x2be   :  { %4720 = vmatmul.mubr.msk.f32.gmra.mrb[56].mxu1 %vm875_vm3, %v6348_v3 }
 0x2bf   :  { %4722 = vmatprep.mubr.msk.f32.mxu1 %vm5901_vm2, %v5902_v57 }
 0x2c2   :  { %4723 = vmatmul.mubr.msk.f32.gmra.mrb[0].mxu1 %vm875_vm3, %v6357_v10 }
 0x2c3   :  { %4725 = vmatprep.mubr.msk.f32.mxu1 %vm5901_vm2, %v5902_v57 }
 0x2c6   :  { %4726 = vmatmul.mubr.msk.f32.gmra.mrb[2].mxu1 %vm875_vm3, %v6366_v19 }
 0x2c7   :  { %4728 = vmatprep.mubr.msk.f32.mxu1 %vm5901_vm2, %v5902_v57 }
 0x2ca   :  { %4729 = vmatmul.mubr.msk.f32.gmra.mrb[4].mxu1 %vm875_vm3, %v6374_v26 }
 0x2cb   :  { %4731 = vmatprep.mubr.msk.f32.mxu1 %vm5901_vm2, %v5902_v57 }
 0x2ce   :  { %4732 = vmatmul.mubr.msk.f32.gmra.mrb[6].mxu1 %vm875_vm3, %v6382_v33 }
 0x2cf   :  { %4734 = vmatprep.mubr.msk.f32.mxu1 %vm5901_vm2, %v5902_v57 }
 0x2d2   :  { %4735 = vmatmul.mubr.msk.f32.gmra.mrb[8].mxu1 %vm875_vm3, %v6390_v40 }
 0x2d3   :  { %4737 = vmatprep.mubr.msk.f32.mxu1 %vm5901_vm2, %v5902_v57 }
 0x2d6   :  { %4738 = vmatmul.mubr.msk.f32.gmra.mrb[10].mxu1 %vm875_vm3, %v6398_v48 }
 0x2d7   :  { %4740 = vmatprep.mubr.msk.f32.mxu1 %vm5901_vm2, %v5902_v57 }
 0x2da   :  { %4741 = vmatmul.mubr.msk.f32.gmra.mrb[12].mxu1 %vm875_vm3, %v6406_v55 }
 0x2db   :  { %4743 = vmatprep.mubr.msk.f32.mxu1 %vm5901_vm2, %v5902_v57 }
 0x2de   :  { %4744 = vmatmul.mubr.msk.f32.gmra.mrb[14].mxu1 %vm875_vm3, %v6414_v63 }
 0x2df   :  { %4746 = vmatprep.mubr.msk.f32.mxu1 %vm5901_vm2, %v5902_v57 }
 0x2e2   :  { %4747 = vmatmul.mubr.msk.f32.gmra.mrb[16].mxu1 %vm875_vm3, %v6422_v6 }
 0x2e3   :  { %4749 = vmatprep.mubr.msk.f32.mxu1 %vm5901_vm2, %v5902_v57 }
 0x2e6   :  { %4750 = vmatmul.mubr.msk.f32.gmra.mrb[18].mxu1 %vm875_vm3, %v6430_v16 }
 0x2e7   :  { %4752 = vmatprep.mubr.msk.f32.mxu1 %vm5901_vm2, %v5902_v57 }
 0x2ea   :  { %4753 = vmatmul.mubr.msk.f32.gmra.mrb[20].mxu1 %vm875_vm3, %v6438_v25 }
 0x2eb   :  { %4755 = vmatprep.mubr.msk.f32.mxu1 %vm5901_vm2, %v5902_v57 }
 0x2ee   :  { %4756 = vmatmul.mubr.msk.f32.gmra.mrb[22].mxu1 %vm875_vm3, %v6446_v34 }
 0x2ef   :  { %4758 = vmatprep.mubr.msk.f32.mxu1 %vm5901_vm2, %v5902_v57 }
 0x2f2   :  { %4759 = vmatmul.mubr.msk.f32.gmra.mrb[24].mxu1 %vm875_vm3, %v6454_v43 }
 0x2f3   :  { %4761 = vmatprep.mubr.msk.f32.mxu1 %vm5901_vm2, %v5902_v57 }
 0x2f6   :  { %4762 = vmatmul.mubr.msk.f32.gmra.mrb[26].mxu1 %vm875_vm3, %v6462_v52 }
 0x2f7   :  { %4764 = vmatprep.mubr.msk.f32.mxu1 %vm5901_vm2, %v5902_v57 }
 0x2fa   :  { %4765 = vmatmul.mubr.msk.f32.gmra.mrb[28].mxu1 %vm875_vm3, %v6470_v61 }
 0x2fb   :  { %4767 = vmatprep.mubr.msk.f32.mxu1 %vm5901_vm2, %v5902_v57 }
 0x2fe   :  { %4768 = vmatmul.mubr.msk.f32.gmra.mrb[30].mxu1 %vm875_vm3, %v6478_v5 }
 0x2ff   :  { %4770 = vmatprep.mubr.msk.f32.mxu1 %vm5901_vm2, %v5902_v57 }
 0x302   :  { %4771 = vmatmul.mubr.msk.f32.gmra.mrb[32].mxu1 %vm875_vm3, %v6486_v18 }
 0x303   :  { %4773 = vmatprep.mubr.msk.f32.mxu1 %vm5901_vm2, %v5902_v57 }
 0x305   :  { %v1381_v29 = vpop.f32.mrb[58].mxu1 }
 0x306   :  { %v4600_v13 = vpop.f32.mrb[59].mxu1  ;;  %4774 = vmatmul.mubr.msk.f32.gmra.mrb[34].mxu1 %vm875_vm3, %v6494_v28  ;;  %v5086_v29 = vpack.c.bf16 %v2187_v59, %v2186_v54 }
 0x307   :  { %4776 = vmatprep.mubr.msk.f32.mxu1 %vm5901_vm2, %v5902_v57  ;;  %v2188_v13 = vld [vmem:[#allocation7 + $0x30] sm:$0xff] }
 0x30a   :  { %4777 = vmatmul.mubr.msk.f32.gmra.mrb[36].mxu1 %vm875_vm3, %v6502_v38 }
 0x30b   :  { %4779 = vmatprep.mubr.msk.f32.mxu1 %vm5901_vm2, %v5902_v57 }
 0x30e   :  { %4780 = vmatmul.mubr.msk.f32.gmra.mrb[38].mxu1 %vm875_vm3, %v6510_v49 }
 0x30f   :  { %4782 = vmatprep.mubr.msk.f32.mxu1 %vm5901_vm2, %v5902_v57 }
 0x312   :  { %4783 = vmatmul.mubr.msk.f32.gmra.mrb[40].mxu1 %vm875_vm3, %v6524_v60 }
 0x313   :  { %4785 = vmatprep.mubr.msk.f32.mxu1 %vm5901_vm2, %v5902_v57 }
 0x316   :  { %4786 = vmatmul.mubr.msk.f32.gmra.mrb[42].mxu1 %vm875_vm3, %v6781_v0 }
 0x317   :  { %4788 = vmatprep.mubr.msk.f32.mxu1 %vm5901_vm2, %v5902_v57 }
 0x31a   :  { %4789 = vmatmul.mubr.msk.f32.gmra.mrb[62].mxu1 %vm875_vm3, %v865_v22 }
 0x31b   :  { %4799 = vmatprep.mubr.msk.f32.mxu1 %vm5901_vm2, %v5902_v57 }
 0x31e   :  { %4800 = vmatmul.mubr.msk.f32.vlgmr.msra.gmra.mrb[46].mxu1 %vm875_vm3, %v6318_v35  ;;  %v5062_v35 = vpack.c.bf16 %v2192_v11, %v2191_v9 }
 0x31f   :  { %4802 = vmatprep.mubr.msk.f32.mxu1 %vm5901_vm2, %v5902_v57 }
 0x320   :  { %5063 = vmatprep.subr.bf16.mxu0 %v5062_v35 }
 0x321   :  { %5065 = vmatpush3.bf16.msra.mxu0 %v5062_v35  ;;  %v5090_v35 = vpack.c.bf16 %v2189_v17, %v2188_v13 }
 0x322   :  { %4803 = vmatmul.mubr.msk.f32.gmra.mrb[48].mxu1 %vm875_vm3, %v6326_v41 }
 0x323   :  { %4805 = vmatprep.mubr.msk.f32.mxu1 %vm5901_vm2, %v5902_v57 }
 0x326   :  { %4806 = vmatmul.mubr.msk.f32.gmra.mrb[50].mxu1 %vm875_vm3, %v6334_v47  ;;  %v2193_v47 = vld [vmem:[#allocation7 + $0x50] sm:$0xff] }
 0x327   :  { %4808 = vmatprep.mubr.msk.f32.mxu1 %vm5901_vm2, %v5902_v57 }
 0x32a   :  { %4809 = vmatmul.mubr.msk.f32.gmra.mrb[52].mxu1 %vm875_vm3, %v6340_v58  ;;  %v2194_v58 = vld [vmem:[#allocation7 + $0x58] sm:$0xff] }
 0x32b   :  { %4811 = vmatprep.mubr.msk.f32.mxu1 %vm5901_vm2, %v5902_v57 }
 0x32e   :  { %4812 = vmatmul.mubr.msk.f32.gmra.mrb[54].mxu1 %vm875_vm3, %v6348_v3 }
 0x32f   :  { %4814 = vmatprep.mubr.msk.f32.mxu1 %vm5901_vm2, %v5902_v57 }
 0x332   :  { %4815 = vmatmul.mubr.msk.f32.gmra.mrb[56].mxu1 %vm875_vm3, %v6357_v10  ;;  %v5066_v10 = vpack.c.bf16 %v2194_v58, %v2193_v47  ;;  %v2516_v47 = vld [vmem:[#allocation7 + $0x88] sm:$0xff] }
 0x333   :  { %4817 = vmatprep.mubr.msk.f32.mxu1 %vm5901_vm2, %v5902_v57 }
 0x334   :  { %5067 = vmatprep.subr.bf16.mxu0 %v5066_v10 }
 0x335   :  { %5069 = vmatpush3.bf16.msra.mxu0 %v5066_v10 }
 0x336   :  { %4818 = vmatmul.mubr.msk.f32.gmra.mrb[0].mxu1 %vm875_vm3, %v6366_v19  ;;  %v2195_v19 = vld [vmem:[#allocation7 + $0x60] sm:$0xff] }
 0x337   :  { %4820 = vmatprep.mubr.msk.f32.mxu1 %vm5901_vm2, %v5902_v57 }
 0x33a   :  { %4821 = vmatmul.mubr.msk.f32.gmra.mrb[2].mxu1 %vm875_vm3, %v6374_v26  ;;  %v2196_v26 = vld [vmem:[#allocation7 + $0x68] sm:$0xff] }
 0x33b   :  { %4823 = vmatprep.mubr.msk.f32.mxu1 %vm5901_vm2, %v5902_v57 }
 0x33e   :  { %4824 = vmatmul.mubr.msk.f32.gmra.mrb[4].mxu1 %vm875_vm3, %v6382_v33  ;;  %v5070_v33 = vpack.c.bf16 %v2196_v26, %v2195_v19 }
 0x33f   :  { %4826 = vmatprep.mubr.msk.f32.mxu1 %vm5901_vm2, %v5902_v57 }
 0x340   :  { %5071 = vmatprep.subr.bf16.mxu0 %v5070_v33 }
 0x341   :  { %5073 = vmatpush3.bf16.msra.mxu0 %v5070_v33 }
 0x342   :  { %4827 = vmatmul.mubr.msk.f32.gmra.mrb[6].mxu1 %vm875_vm3, %v6390_v40  ;;  %v2197_v40 = vld [vmem:[#allocation7 + $0x70] sm:$0xff] }
 0x343   :  { %4829 = vmatprep.mubr.msk.f32.mxu1 %vm5901_vm2, %v5902_v57 }
 0x346   :  { %4830 = vmatmul.mubr.msk.f32.gmra.mrb[8].mxu1 %vm875_vm3, %v6398_v48  ;;  %v2198_v48 = vld [vmem:[#allocation7 + $0x78] sm:$0xff] }
 0x347   :  { %4832 = vmatprep.mubr.msk.f32.mxu1 %vm5901_vm2, %v5902_v57 }
 0x34a   :  { %4833 = vmatmul.mubr.msk.f32.gmra.mrb[10].mxu1 %vm875_vm3, %v6406_v55  ;;  %v5074_v55 = vpack.c.bf16 %v2198_v48, %v2197_v40 }
 0x34b   :  { %4835 = vmatprep.mubr.msk.f32.mxu1 %vm5901_vm2, %v5902_v57 }
 0x34c   :  { %5075 = vmatprep.subr.bf16.mxu0 %v5074_v55 }
 0x34d   :  { %5077 = vmatpush3.bf16.msra.mxu0 %v5074_v55 }
 0x34e   :  { %4836 = vmatmul.mubr.msk.f32.gmra.mrb[12].mxu1 %vm875_vm3, %v6414_v63  ;;  %v2182_v63 = vld [vmem:[#allocation7] sm:$0xff] }
 0x34f   :  { %4838 = vmatprep.mubr.msk.f32.mxu1 %vm5901_vm2, %v5902_v57 }
 0x352   :  { %4839 = vmatmul.mubr.msk.f32.gmra.mrb[14].mxu1 %vm875_vm3, %v6422_v6  ;;  %v2183_v6 = vld [vmem:[#allocation7 + $0x8] sm:$0xff] }
 0x353   :  { %4841 = vmatprep.mubr.msk.f32.mxu1 %vm5901_vm2, %v5902_v57 }
 0x356   :  { %4842 = vmatmul.mubr.msk.f32.gmra.mrb[16].mxu1 %vm875_vm3, %v6430_v16  ;;  %v5078_v16 = vpack.c.bf16 %v2183_v6, %v2182_v63 }
 0x357   :  { %4844 = vmatprep.mubr.msk.f32.mxu1 %vm5901_vm2, %v5902_v57 }
 0x358   :  { %5079 = vmatprep.subr.bf16.mxu0 %v5078_v16 }
 0x35a   :  { %4845 = vmatmul.mubr.msk.f32.gmra.mrb[18].mxu1 %vm875_vm3, %v6438_v25 }
 0x35b   :  { %4847 = vmatprep.mubr.msk.f32.mxu1 %vm5901_vm2, %v5902_v57 }
 0x35e   :  { %4848 = vmatmul.mubr.msk.f32.gmra.mrb[20].mxu1 %vm875_vm3, %v6446_v34 }
 0x35f   :  { %4850 = vmatprep.mubr.msk.f32.mxu1 %vm5901_vm2, %v5902_v57 }
 0x362   :  { %4851 = vmatmul.mubr.msk.f32.gmra.mrb[22].mxu1 %vm875_vm3, %v6454_v43 }
 0x363   :  { %4853 = vmatprep.mubr.msk.f32.mxu1 %vm5901_vm2, %v5902_v57 }
 0x366   :  { %4854 = vmatmul.mubr.msk.f32.gmra.mrb[24].mxu1 %vm875_vm3, %v6462_v52 }
 0x367   :  { %4856 = vmatprep.mubr.msk.f32.mxu1 %vm5901_vm2, %v5902_v57 }
 0x36a   :  { %4857 = vmatmul.mubr.msk.f32.gmra.mrb[26].mxu1 %vm875_vm3, %v6470_v61 }
 0x36b   :  { %4859 = vmatprep.mubr.msk.f32.mxu1 %vm5901_vm2, %v5902_v57 }
 0x36e   :  { %4860 = vmatmul.mubr.msk.f32.gmra.mrb[28].mxu1 %vm875_vm3, %v6478_v5 }
 0x36f   :  { %4862 = vmatprep.mubr.msk.f32.mxu1 %vm5901_vm2, %v5902_v57 }
 0x372   :  { %4863 = vmatmul.mubr.msk.f32.gmra.mrb[30].mxu1 %vm875_vm3, %v6486_v18 }
 0x373   :  { %4865 = vmatprep.mubr.msk.f32.mxu1 %vm5901_vm2, %v5902_v57 }
 0x376   :  { %4866 = vmatmul.mubr.msk.f32.gmra.mrb[32].mxu1 %vm875_vm3, %v6494_v28 }
 0x377   :  { %4868 = vmatprep.mubr.msk.f32.mxu1 %vm5901_vm2, %v5902_v57 }
 0x379   :  { %v1598_v41 = vpop.f32.mrb[60].mxu1 }
 0x37a   :  { %v4695_v3 = vpop.f32.mrb[61].mxu1  ;;  %4869 = vmatmul.mubr.msk.f32.gmra.mrb[34].mxu1 %vm875_vm3, %v6502_v38  ;;  %v7033_v38 = vld [vmem:[#allocation10 + $0x2] ss:$0 sm:$0xff] }
 0x37b   :  { %4871 = vmatprep.mubr.msk.f32.mxu1 %vm5901_vm2, %v5902_v57  ;;  %v2515_v41 = vld [vmem:[#allocation7 + $0x80] sm:$0xff] }
 0x37c   :  { %v7063_v26 = vpack.c.bf16 %v2516_v47, %v2515_v41 }
 0x37e   :  { %4872 = vmatmul.mubr.msk.f32.gmra.mrb[36].mxu1 %vm875_vm3, %v6510_v49 }
 0x37f   :  { %4874 = vmatprep.mubr.msk.f32.mxu1 %vm5901_vm2, %v5902_v57 }
 0x382   :  { %4875 = vmatmul.mubr.msk.f32.gmra.mrb[38].mxu1 %vm875_vm3, %v6524_v60  ;;  %v7035_v60 = vld [vmem:[#allocation10 + $0x3] ss:$0 sm:$0xff] }
 0x383   :  { %4877 = vmatprep.mubr.msk.f32.mxu1 %vm5901_vm2, %v5902_v57 }
 0x386   :  { %4878 = vmatmul.mubr.msk.f32.gmra.mrb[40].mxu1 %vm875_vm3, %v6781_v0 }
 0x387   :  { %4880 = vmatprep.mubr.msk.f32.mxu1 %vm5901_vm2, %v5902_v57 }
 0x38a   :  { %4881 = vmatmul.mubr.msk.f32.gmra.mrb[42].mxu1 %vm875_vm3, %v865_v22 }
 0x38b   :  { %4883 = vmatprep.mubr.msk.f32.mxu1 %vm5901_vm2, %v5902_v57 }
 0x38e   :  { %4884 = vmatmul.mubr.f32.gmra.mrb[64].mxu1 %v5902_v57 }
 0x3ed   :  { %v1843_v25 = vpop.f32.mrb[62].mxu1 }
 0x3ee   :  { %v4790_v34 = vpop.f32.mrb[63].mxu1 }
 0x3f1   :  { %v1945_v43 = vpop.f32.mrb[46].mxu1 }
 0x3f2   :  { %v5458_v52 = vadd.f32 %v1945_v43, %v6634_v15  ;;  %v4801_v61 = vpop.f32.mrb[47].mxu1 }
 0x3f5   :  { %v1950_v5 = vpop.f32.mrb[48].mxu1 }
 0x3f6   :  { %v5459_v18 = vadd.f32 %v1950_v5, %v6640_v14  ;;  %v4804_v28 = vpop.f32.mrb[49].mxu1 }
 0x3f8   :  { %v2116_v49 = vmax.f32 %v5458_v52, %v5459_v18 }
 0x3f9   :  { %v1955_v1 = vpop.f32.mrb[50].mxu1 }
 0x3fa   :  { %v2136_v2 = vmul.f32 %v7033_v38, %v2116_v49  ;;  %v5460_v4 = vadd.f32 %v1955_v1, %v6646_v21  ;;  %v4807_v27 = vpop.f32.mrb[51].mxu1 }
 0x3fc   :  { %v7040_v30 = vadd.f32 %v7035_v60, %v2136_v2 }
 0x3fd   :  { %v1960_v15 = vpop.f32.mrb[52].mxu1 }
 0x3fe   :  { %v2168_v31 = vmax.f32 %v7040_v30, 0.0  ;;  %v5461_v14 = vadd.f32 %v1960_v15, %v6652_v24  ;;  %v4810_v36 = vpop.f32.mrb[53].mxu1 }
 0x400   :  { %v2117_v37 = vmax.f32 %v5460_v4, %v5461_v14  ;;  %4902 = vmatprep.mubr.msk.f32.mxu0 %vm2199_vm4, %v2168_v31 }
 0x401   :  { %v1965_v39 = vpop.f32.mrb[54].mxu1 }
 0x402   :  { %v2137_v42 = vmul.f32 %v7033_v38, %v2117_v37  ;;  %v5462_v21 = vadd.f32 %v1965_v39, %v6658_v32  ;;  %v4813_v45 = vpop.f32.mrb[55].mxu1 }
 0x404   :  { %v2155_v51 = vadd.f32 %v7035_v60, %v2137_v42 }
 0x405   :  { %v1970_v56 = vpop.f32.mrb[56].mxu1 }
 0x406   :  { %v7050_v62 = vmax.f32 %v2155_v51, 0.0  ;;  %v5463_v24 = vadd.f32 %v1970_v56, %v6664_v44  ;;  %v4816_v0 = vpop.f32.mrb[57].mxu1 }
 0x408   :  { %v2118_v7 = vmax.f32 %v5462_v21, %v5463_v24  ;;  %4903 = vmatmul.mubr.msk.f32.vlgmr.msra.gmra.mrb[74].mxu0 %vm2199_vm4, %v7050_v62 }
 0x409   :  { %v1975_v8 = vpop.f32.mrb[0].mxu1  ;;  %5081 = vmatpush3.bf16.msra.mxu0 %v5078_v16 }
 0x40a   :  { %v2138_v32 = vmul.f32 %v7033_v38, %v2118_v7  ;;  %v4819_v12 = vpop.f32.mrb[1].mxu1  ;;  %5083 = vmatprep.subr.bf16.mxu0 %v5082_v53 }
 0x40c   :  { %v2156_v20 = vadd.f32 %v7035_v60, %v2138_v32 }
 0x40d   :  { %v1980_v44 = vpop.f32.mrb[2].mxu1  ;;  %5085 = vmatpush3.bf16.msra.mxu0 %v5082_v53 }
 0x40e   :  { %v7057_v22 = vmax.f32 %v2156_v20, 0.0  ;;  %v2119_v9 = vmax.f32 %v1975_v8, %v1980_v44  ;;  %v4822_v11 = vpop.f32.mrb[3].mxu1  ;;  %5087 = vmatprep.subr.bf16.mxu0 %v5086_v29 }
 0x410   :  { %v2139_v58 = vmul.f32 %v7033_v38, %v2119_v9  ;;  %4905 = vmatprep.mubr.msk.f32.mxu0 %vm2199_vm4, %v7057_v22 }
 0x411   :  { %v1985_v3 = vpop.f32.mrb[4].mxu1  ;;  %5089 = vmatpush3.bf16.msra.mxu0 %v5086_v29 }
 0x412   :  { %v2157_v10 = vadd.f32 %v7035_v60, %v2139_v58  ;;  %v4825_v19 = vpop.f32.mrb[5].mxu1  ;;  %5091 = vmatprep.subr.bf16.mxu0 %v5090_v35 }
 0x414   :  { %v7065_v33 = vmax.f32 %v2157_v10, 0.0 }
 0x415   :  { %v1990_v40 = vpop.f32.mrb[6].mxu1  ;;  %5093 = vmatpush3.bf16.msra.mxu0 %v5090_v35 }
 0x416   :  { %v2120_v48 = vmax.f32 %v1985_v3, %v1990_v40  ;;  %v4828_v55 = vpop.f32.mrb[7].mxu1  ;;  %4906 = vmatmul.mubr.msk.f32.gmra.mrb[76].mxu0 %vm2199_vm4, %v7065_v33  ;;  %5095 = vmatprep.subr.bf16.mxu0 %v7063_v26 }
 0x418   :  { %v2140_v63 = vmul.f32 %v7033_v38, %v2120_v48 }
 0x419   :  { %v1995_v6 = vpop.f32.mrb[8].mxu1 }
 0x41a   :  { %v2158_v16 = vadd.f32 %v7035_v60, %v2140_v63  ;;  %v4831_v25 = vpop.f32.mrb[9].mxu1 }
 0x41c   :  { %v7072_v34 = vmax.f32 %v2158_v16, 0.0 }
 0x41d   :  { %v2000_v43 = vpop.f32.mrb[10].mxu1 }
 0x41e   :  { %v2121_v52 = vmax.f32 %v1995_v6, %v2000_v43  ;;  %v4834_v61 = vpop.f32.mrb[11].mxu1  ;;  %4908 = vmatprep.mubr.msk.f32.mxu0 %vm2199_vm4, %v7072_v34 }
 0x420   :  { %v2141_v5 = vmul.f32 %v7033_v38, %v2121_v52 }
 0x421   :  { %v2005_v18 = vpop.f32.mrb[12].mxu1 }
 0x422   :  { %v2159_v28 = vadd.f32 %v7035_v60, %v2141_v5  ;;  %v4837_v49 = vpop.f32.mrb[13].mxu1 }
 0x424   :  { %v7078_v1 = vmax.f32 %v2159_v28, 0.0 }
 0x425   :  { %v2010_v2 = vpop.f32.mrb[14].mxu1 }
 0x426   :  { %v2122_v4 = vmax.f32 %v2005_v18, %v2010_v2  ;;  %v4840_v27 = vpop.f32.mrb[15].mxu1  ;;  %4909 = vmatmul.mubr.msk.f32.gmra.mrb[78].mxu0 %vm2199_vm4, %v7078_v1 }
 0x428   :  { %v2142_v15 = vmul.f32 %v7033_v38, %v2122_v4 }
 0x429   :  { %v2015_v14 = vpop.f32.mrb[16].mxu1 }
 0x42a   :  { %v2160_v36 = vadd.f32 %v7035_v60, %v2142_v15  ;;  %v4843_v37 = vpop.f32.mrb[17].mxu1 }
 0x42c   :  { %v7084_v39 = vmax.f32 %v2160_v36, 0.0 }
 0x42d   :  { %v2020_v42 = vpop.f32.mrb[18].mxu1 }
 0x42e   :  { %v2123_v21 = vmax.f32 %v2015_v14, %v2020_v42  ;;  %v4846_v45 = vpop.f32.mrb[19].mxu1  ;;  %4911 = vmatprep.mubr.msk.f32.mxu0 %vm2199_vm4, %v7084_v39 }
 0x430   :  { %v2143_v46 = vmul.f32 %v7033_v38, %v2123_v21 }
 0x431   :  { %v2025_v23 = vpop.f32.mrb[20].mxu1 }
 0x432   :  { %v2161_v51 = vadd.f32 %v7035_v60, %v2143_v46  ;;  %v4849_v56 = vpop.f32.mrb[21].mxu1 }
 0x433   :  { %v2518_v56 = vld [vmem:[#allocation7 + $0x98] sm:$0xff] }
 0x434   :  { %v7090_v24 = vmax.f32 %v2161_v51, 0.0  ;;  %v2517_v51 = vld [vmem:[#allocation7 + $0x90] sm:$0xff] }
 0x435   :  { %v2030_v0 = vpop.f32.mrb[22].mxu1 }
 0x436   :  { %v2124_v53 = vmax.f32 %v2025_v23, %v2030_v0  ;;  %v4852_v54 = vpop.f32.mrb[23].mxu1  ;;  %4912 = vmatmul.mubr.msk.f32.gmra.mrb[80].mxu0 %vm2199_vm4, %v7090_v24  ;;  %v5098_v0 = vpack.c.bf16 %v2518_v56, %v2517_v51  ;;  %v2758_v56 = vld [vmem:[#allocation8 + $0x180] sm:$0xff] }
 0x437   :  { %v2520_v54 = vld [vmem:[#allocation7 + $0xa8] sm:$0xff] }
 0x438   :  { %v2144_v59 = vmul.f32 %v7033_v38, %v2124_v53  ;;  %v2519_v53 = vld [vmem:[#allocation7 + $0xa0] sm:$0xff] }
 0x439   :  { %v2035_v7 = vpop.f32.mrb[24].mxu1 }
 0x43a   :  { %v2162_v8 = vadd.f32 %v7035_v60, %v2144_v59  ;;  %v4855_v32 = vpop.f32.mrb[25].mxu1  ;;  %v2522_v59 = vld [vmem:[#allocation7 + $0xb8] sm:$0xff] }
 0x43b   :  { %v2713_v32 = vld [vmem:[#allocation8 + $0x18] sm:$0xff] }
 0x43c   :  { %v7096_v12 = vmax.f32 %v2162_v8, 0.0  ;;  %v2710_v8 = vld [vmem:[#allocation8] sm:$0xff] }
 0x43d   :  { %v2040_v29 = vpop.f32.mrb[26].mxu1 }
 0x43e   :  { %v2125_v13 = vmax.f32 %v2035_v7, %v2040_v29  ;;  %v4858_v17 = vpop.f32.mrb[27].mxu1  ;;  %4914 = vmatprep.mubr.msk.f32.mxu0 %vm2199_vm4, %v7096_v12  ;;  %v2711_v7 = vld [vmem:[#allocation8 + $0x8] sm:$0xff]  ;;  %v2717_v29 = vld [vmem:[#allocation8 + $0x38] sm:$0xff] }
 0x43f   :  { %v5112_v17 = vpack.c.bf16 %v2713_v32, %v2710_v8  ;;  %v2777_v8 = vld [vmem:[#allocation8 + $0x218] sm:$0xff]  ;;  %v2780_v32 = vld [vmem:[#allocation8 + $0x230] sm:$0xff] }
 0x440   :  { %v2145_v20 = vmul.f32 %v7033_v38, %v2125_v13  ;;  %v2720_v13 = vld [vmem:[#allocation8 + $0x50] sm:$0xff] }
 0x441   :  { %v2045_v44 = vpop.f32.mrb[28].mxu1 }
 0x442   :  { %v2163_v9 = vadd.f32 %v7035_v60, %v2145_v20  ;;  %v4861_v11 = vpop.f32.mrb[29].mxu1  ;;  %v5114_v20 = vpack.c.bf16 %v2720_v13, %v2717_v29  ;;  %v5154_v13 = vpack.c.bf16 %v2780_v32, %v2777_v8 }
 0x443   :  { %v2723_v11 = vld [vmem:[#allocation8 + $0x68] sm:$0xff] }
 0x444   :  { %v7102_v35 = vmax.f32 %v2163_v9, 0.0  ;;  %v2719_v9 = vld [vmem:[#allocation8 + $0x48] sm:$0xff] }
 0x445   :  { %v2050_v41 = vpop.f32.mrb[30].mxu1 }
 0x446   :  { %v2126_v47 = vmax.f32 %v2045_v44, %v2050_v41  ;;  %v4864_v58 = vpop.f32.mrb[31].mxu1  ;;  %4915 = vmatmul.mubr.msk.f32.gmra.mrb[82].mxu0 %vm2199_vm4, %v7102_v35  ;;  %v2716_v44 = vld [vmem:[#allocation8 + $0x30] sm:$0xff]  ;;  %v2726_v41 = vld [vmem:[#allocation8 + $0x80] sm:$0xff] }
 0x447   :  { %v5118_v58 = vpack.c.bf16 %v2726_v41, %v2723_v11 }
 0x448   :  { %v2146_v3 = vmul.f32 %v7033_v38, %v2126_v47  ;;  %v5116_v47 = vpack.c.bf16 %v2719_v9, %v2716_v44  ;;  %v2783_v44 = vld [vmem:[#allocation8 + $0x248] sm:$0xff]  ;;  %v2786_v9 = vld [vmem:[#allocation8 + $0x260] sm:$0xff] }
 0x449   :  { %v2055_v10 = vpop.f32.mrb[32].mxu1  ;;  %v5158_v41 = vpack.c.bf16 %v2786_v9, %v2783_v44 }
 0x44a   :  { %v2164_v19 = vadd.f32 %v7035_v60, %v2146_v3  ;;  %v4867_v40 = vpop.f32.mrb[33].mxu1  ;;  %v2722_v3 = vld [vmem:[#allocation8 + $0x60] sm:$0xff] }
 0x44c   :  { %v7108_v48 = vmax.f32 %v2164_v19, 0.0  ;;  %v2729_v19 = vld [vmem:[#allocation8 + $0x98] sm:$0xff] }
 0x44d   :  { %v2060_v55 = vpop.f32.mrb[34].mxu1 }
 0x44e   :  { %v2127_v63 = vmax.f32 %v2055_v10, %v2060_v55  ;;  %v4870_v6 = vpop.f32.mrb[35].mxu1  ;;  %4917 = vmatprep.mubr.msk.f32.mxu0 %vm2199_vm4, %v7108_v48  ;;  %v2725_v10 = vld [vmem:[#allocation8 + $0x78] sm:$0xff]  ;;  %v2728_v55 = vld [vmem:[#allocation8 + $0x90] sm:$0xff] }
 0x44f   :  { %v5120_v40 = vpack.c.bf16 %v2725_v10, %v2722_v3  ;;  %v2738_v6 = vld [vmem:[#allocation8 + $0xe0] sm:$0xff]  ;;  %v2789_v10 = vld [vmem:[#allocation8 + $0x278] sm:$0xff] }
 0x450   :  { %v2147_v16 = vmul.f32 %v7033_v38, %v2127_v63  ;;  %v2735_v63 = vld [vmem:[#allocation8 + $0xc8] sm:$0xff] }
 0x451   :  { %v2065_v25 = vpop.f32.mrb[36].mxu1 }
 0x452   :  { %v2165_v43 = vadd.f32 %v7035_v60, %v2147_v16  ;;  %v4873_v52 = vpop.f32.mrb[37].mxu1 }
 0x453   :  { %v2744_v52 = vld [vmem:[#allocation8 + $0x110] sm:$0xff] }
 0x454   :  { %v7114_v61 = vmax.f32 %v2165_v43, 0.0  ;;  %v2741_v43 = vld [vmem:[#allocation8 + $0xf8] sm:$0xff] }
 0x455   :  { %v2070_v5 = vpop.f32.mrb[38].mxu1 }
 0x456   :  { %v2128_v18 = vmax.f32 %v2065_v25, %v2070_v5  ;;  %v4876_v28 = vpop.f32.mrb[39].mxu1  ;;  %4918 = vmatmul.mubr.msk.f32.gmra.mrb[84].mxu0 %vm2199_vm4, %v7114_v61  ;;  %v2734_v25 = vld [vmem:[#allocation8 + $0xc0] sm:$0xff] }
 0x457   :  { %v2747_v28 = vld [vmem:[#allocation8 + $0x128] sm:$0xff] }
 0x458   :  { %v2148_v49 = vmul.f32 %v7033_v38, %v2128_v18  ;;  %v2740_v18 = vld [vmem:[#allocation8 + $0xf0] sm:$0xff] }
 0x459   :  { %v2075_v2 = vpop.f32.mrb[40].mxu1 }
 0x45a   :  { %v2166_v4 = vadd.f32 %v7035_v60, %v2148_v49  ;;  %v4879_v27 = vpop.f32.mrb[41].mxu1  ;;  %v2750_v49 = vld [vmem:[#allocation8 + $0x140] sm:$0xff] }
 0x45b   :  { %v2753_v27 = vld [vmem:[#allocation8 + $0x158] sm:$0xff] }
 0x45c   :  { %v7120_v15 = vmax.f32 %v2166_v4, 0.0  ;;  %v2746_v4 = vld [vmem:[#allocation8 + $0x120] sm:$0xff] }
 0x45d   :  { %v2080_v14 = vpop.f32.mrb[42].mxu1 }
 0x45e   :  { %v2129_v36 = vmax.f32 %v2075_v2, %v2080_v14  ;;  %v4882_v37 = vpop.f32.mrb[43].mxu1  ;;  %4920 = vmatprep.mubr.msk.f32.mxu0 %vm2199_vm4, %v7120_v15  ;;  %v2756_v14 = vld [vmem:[#allocation8 + $0x170] sm:$0xff] }
 0x45f   :  { %v2755_v37 = vld [vmem:[#allocation8 + $0x168] sm:$0xff] }
 0x460   :  { %v2149_v42 = vmul.f32 %v7033_v38, %v2129_v36  ;;  %v5102_v38 = vpack.c.bf16 %v2520_v54, %v2519_v53  ;;  %v5138_v36 = vpack.c.bf16 %v2756_v14, %v2753_v27  ;;  %v2764_v54 = vld [vmem:[#allocation8 + $0x1b0] sm:$0xff] }
 0x461   :  { %v2085_v21 = vpop.f32.mrb[64].mxu1 }
 0x462   :  { %v7126_v45 = vadd.f32 %v7035_v60, %v2149_v42  ;;  %v4885_v46 = vpop.f32.mrb[65].mxu1  ;;  %v2521_v60 = vld [vmem:[#allocation7 + $0xb0] sm:$0xff]  ;;  %v2759_v42 = vld [vmem:[#allocation8 + $0x188] sm:$0xff]  ;;  %v2762_v21 = vld [vmem:[#allocation8 + $0x1a0] sm:$0xff] }
 0x463   :  { %v5106_v30 = vpack.c.bf16 %v2522_v59, %v2521_v60  ;;  %v5142_v51 = vpack.c.bf16 %v2762_v21, %v2759_v42  ;;  %v2771_v60 = vld [vmem:[#allocation8 + $0x1e8] sm:$0xff]  ;;  %v2774_v59 = vld [vmem:[#allocation8 + $0x200] sm:$0xff] }
 0x464   :  { %v2181_v23 = vmax.f32 %v7126_v45, 0.0  ;;  %v2768_v45 = vld [vmem:[#allocation8 + $0x1d0] sm:$0xff] }
 0x466   :  { %4921 = vmatmul.mubr.msk.f32.gmra.mrb[86].mxu0 %vm2199_vm4, %v2181_v23 }
 0x467   :  { %4939 = vmatprep.mubr.f32.mxu0 %v5902_v57 }
 0x46a   :  { %4940 = vmatmul.mubr.msk.f32.vlgmr.msra.gmra.mrb[74].mxu0 %vm2199_vm4, %v2168_v31  ;;  %v2714_v31 = vld [vmem:[#allocation8 + $0x20] sm:$0xff] }
 0x46b   :  { %5097 = vmatpush3.bf16.msra.mxu0 %v7063_v26  ;;  %4942 = vmatprep.mubr.msk.f32.mxu0 %vm2199_vm4, %v7050_v62  ;;  %v5110_v26 = vpack.c.bf16 %v2714_v31, %v2711_v7  ;;  %v5150_v7 = vpack.c.bf16 %v2774_v59, %v2771_v60  ;;  %v2770_v31 = vld [vmem:[#allocation8 + $0x1e0] sm:$0xff] }
 0x46c   :  { %5099 = vmatprep.subr.bf16.mxu0 %v5098_v0 }
 0x46e   :  { %4943 = vmatmul.mubr.msk.f32.gmra.mrb[76].mxu0 %vm2199_vm4, %v7057_v22 }
 0x46f   :  { %4945 = vmatprep.mubr.msk.f32.mxu0 %vm2199_vm4, %v7065_v33  ;;  %5101 = vmatpush3.bf16.msra.mxu0 %v5098_v0  ;;  %v2765_v0 = vld [vmem:[#allocation8 + $0x1b8] sm:$0xff] }
 0x470   :  { %5103 = vmatprep.subr.bf16.mxu0 %v5102_v38  ;;  %v5146_v53 = vpack.c.bf16 %v2768_v45, %v2765_v0  ;;  %v2813_v45 = vld [vmem:[#allocation8 + $0x338] sm:$0xff] }
 0x472   :  { %4946 = vmatmul.mubr.msk.f32.gmra.mrb[78].mxu0 %vm2199_vm4, %v7072_v34 }
 0x473   :  { %4948 = vmatprep.mubr.msk.f32.mxu0 %vm2199_vm4, %v7078_v1  ;;  %5105 = vmatpush3.bf16.msra.mxu0 %v5102_v38  ;;  %v2767_v38 = vld [vmem:[#allocation8 + $0x1c8] sm:$0xff] }
 0x474   :  { %5107 = vmatprep.subr.bf16.mxu0 %v5106_v30 }
 0x476   :  { %4949 = vmatmul.mubr.msk.f32.gmra.mrb[80].mxu0 %vm2199_vm4, %v7084_v39 }
 0x477   :  { %4951 = vmatprep.mubr.msk.f32.mxu0 %vm2199_vm4, %v7090_v24  ;;  %5109 = vmatpush3.bf16.msra.mxu0 %v5106_v30  ;;  %v5148_v30 = vpack.c.bf16 %v2767_v38, %v2764_v54 }
 0x478   :  { %5111 = vmatprep.subr.bf16.mxu0 %v5110_v26  ;;  %v2773_v26 = vld [vmem:[#allocation8 + $0x1f8] sm:$0xff] }
 0x479   :  { %v5152_v29 = vpack.c.bf16 %v2773_v26, %v2770_v31  ;;  %v2812_v31 = vld [vmem:[#allocation8 + $0x330] sm:$0xff]  ;;  %v2815_v26 = vld [vmem:[#allocation8 + $0x348] sm:$0xff] }
 0x47a   :  { %4952 = vmatmul.mubr.msk.f32.gmra.mrb[82].mxu0 %vm2199_vm4, %v7096_v12  ;;  %v5180_v44 = vpack.c.bf16 %v2815_v26, %v2812_v31  ;;  %v2851_v31 = vld [vmem:[#allocation8 + $0x468] sm:$0xff] }
 0x47b   :  { %4954 = vmatprep.mubr.msk.f32.mxu0 %vm2199_vm4, %v7102_v35  ;;  %v2855_v26 = vld [vmem:[#allocation8 + $0x488] sm:$0xff] }
 0x47e   :  { %4955 = vmatmul.mubr.msk.f32.gmra.mrb[84].mxu0 %vm2199_vm4, %v7108_v48 }
 0x47f   :  { %4957 = vmatprep.mubr.msk.f32.mxu0 %vm2199_vm4, %v7114_v61 }
 0x482   :  { %4958 = vmatmul.mubr.msk.f32.gmra.mrb[86].mxu0 %vm2199_vm4, %v7120_v15 }
 0x483   :  { %4976 = vmatprep.mubr.msk.f32.mxu0 %vm2199_vm4, %v7050_v62  ;;  %v2732_v62 = vld [vmem:[#allocation8 + $0xb0] sm:$0xff] }
 0x486   :  { %4977 = vmatmul.mubr.msk.f32.vlgmr.msra.gmra.mrb[74].mxu0 %vm2199_vm4, %v7057_v22  ;;  %v5122_v22 = vpack.c.bf16 %v2732_v62, %v2729_v19  ;;  %v2792_v19 = vld [vmem:[#allocation8 + $0x290] sm:$0xff] }
 0x487   :  { %4979 = vmatprep.mubr.msk.f32.mxu0 %vm2199_vm4, %v7065_v33  ;;  %5113 = vmatpush1.bf16.msra.mxu0 %v5112_v17  ;;  %v2731_v33 = vld [vmem:[#allocation8 + $0xa8] sm:$0xff]  ;;  %v2776_v17 = vld [vmem:[#allocation8 + $0x210] sm:$0xff]  ;;  %v5162_v62 = vpack.c.bf16 %v2792_v19, %v2789_v10  ;;  %v2825_v10 = vld [vmem:[#allocation8 + $0x398] sm:$0xff] }
 0x488   :  { %5115 = vmatprep.subr.bf16.mxu0 %v5114_v20  ;;  %v5124_v16 = vpack.c.bf16 %v2731_v33, %v2728_v55  ;;  %v2779_v20 = vld [vmem:[#allocation8 + $0x228] sm:$0xff]  ;;  %v2828_v19 = vld [vmem:[#allocation8 + $0x3b0] sm:$0xff] }
 0x489   :  { %v5156_v11 = vpack.c.bf16 %v2779_v20, %v2776_v17  ;;  %v2795_v33 = vld [vmem:[#allocation8 + $0x2a8] sm:$0xff] }
 0x48a   :  { %4980 = vmatmul.mubr.msk.f32.gmra.mrb[76].mxu0 %vm2199_vm4, %v7072_v34  ;;  %v5126_v34 = vpack.c.bf16 %v2738_v6, %v2735_v63  ;;  %v2798_v63 = vld [vmem:[#allocation8 + $0x2c0] sm:$0xff] }
 0x48b   :  { %4982 = vmatprep.mubr.msk.f32.mxu0 %vm2199_vm4, %v7078_v1  ;;  %5117 = vmatpush1.bf16.msra.mxu0 %v5116_v47  ;;  %v2737_v1 = vld [vmem:[#allocation8 + $0xd8] sm:$0xff]  ;;  %v2782_v47 = vld [vmem:[#allocation8 + $0x240] sm:$0xff]  ;;  %v5166_v6 = vpack.c.bf16 %v2798_v63, %v2795_v33  ;;  %v5186_v63 = vpack.c.bf16 %v2828_v19, %v2825_v10 }
 0x48c   :  { %5119 = vmatprep.subr.bf16.mxu0 %v5118_v58  ;;  %v5128_v5 = vpack.c.bf16 %v2737_v1, %v2734_v25  ;;  %v2785_v58 = vld [vmem:[#allocation8 + $0x258] sm:$0xff]  ;;  %v2870_v10 = vld [vmem:[#allocation8 + $0x500] sm:$0xff] }
 0x48d   :  { %v5160_v3 = vpack.c.bf16 %v2785_v58, %v2782_v47  ;;  %v2801_v1 = vld [vmem:[#allocation8 + $0x2d8] sm:$0xff] }
 0x48e   :  { %4983 = vmatmul.mubr.msk.f32.gmra.mrb[78].mxu0 %vm2199_vm4, %v7084_v39  ;;  %v5130_v39 = vpack.c.bf16 %v2744_v52, %v2741_v43  ;;  %v2804_v43 = vld [vmem:[#allocation8 + $0x2f0] sm:$0xff]  ;;  %v2821_v47 = vld [vmem:[#allocation8 + $0x378] sm:$0xff] }
 0x48f   :  { %4985 = vmatprep.mubr.msk.f32.mxu0 %vm2199_vm4, %v7090_v24  ;;  %5121 = vmatpush1.bf16.msra.mxu0 %v5120_v40  ;;  %v2743_v24 = vld [vmem:[#allocation8 + $0x108] sm:$0xff]  ;;  %v2788_v40 = vld [vmem:[#allocation8 + $0x270] sm:$0xff]  ;;  %v5170_v52 = vpack.c.bf16 %v2804_v43, %v2801_v1  ;;  %v2834_v43 = vld [vmem:[#allocation8 + $0x3e0] sm:$0xff] }
 0x490   :  { %5123 = vmatprep.subr.bf16.mxu0 %v5122_v22  ;;  %v5132_v2 = vpack.c.bf16 %v2743_v24, %v2740_v18  ;;  %v2791_v22 = vld [vmem:[#allocation8 + $0x288] sm:$0xff] }
 0x491   :  { %v5164_v55 = vpack.c.bf16 %v2791_v22, %v2788_v40  ;;  %v2807_v24 = vld [vmem:[#allocation8 + $0x308] sm:$0xff] }
 0x492   :  { %4986 = vmatmul.mubr.msk.f32.gmra.mrb[80].mxu0 %vm2199_vm4, %v7096_v12  ;;  %v5134_v12 = vpack.c.bf16 %v2750_v49, %v2747_v28  ;;  %v2810_v28 = vld [vmem:[#allocation8 + $0x320] sm:$0xff]  ;;  %v2831_v1 = vld [vmem:[#allocation8 + $0x3c8] sm:$0xff] }
 0x493   :  { %4988 = vmatprep.mubr.msk.f32.mxu0 %vm2199_vm4, %v7102_v35  ;;  %5125 = vmatpush1.bf16.msra.mxu0 %v5124_v16  ;;  %v2749_v35 = vld [vmem:[#allocation8 + $0x138] sm:$0xff]  ;;  %v2794_v16 = vld [vmem:[#allocation8 + $0x2a0] sm:$0xff]  ;;  %v5174_v49 = vpack.c.bf16 %v2810_v28, %v2807_v24  ;;  %v5190_v24 = vpack.c.bf16 %v2834_v43, %v2831_v1  ;;  %v2875_v1 = vld [vmem:[#allocation8 + $0x528] sm:$0xff] }
 0x494   :  { %5127 = vmatprep.subr.bf16.mxu0 %v5126_v34  ;;  %v2797_v34 = vld [vmem:[#allocation8 + $0x2b8] sm:$0xff]  ;;  %v2830_v28 = vld [vmem:[#allocation8 + $0x3c0] sm:$0xff]  ;;  %v2879_v43 = vld [vmem:[#allocation8 + $0x548] sm:$0xff] }
 0x495   :  { %v5168_v25 = vpack.c.bf16 %v2797_v34, %v2794_v16  ;;  %v2827_v16 = vld [vmem:[#allocation8 + $0x3a8] sm:$0xff] }
 0x496   :  { %4989 = vmatmul.mubr.msk.f32.gmra.mrb[82].mxu0 %vm2199_vm4, %v7108_v48  ;;  %v5136_v48 = vpack.c.bf16 %v2749_v35, %v2746_v4  ;;  %v7189_v35 = vld [vmem:[#allocation10 + $0x4] ss:$0 sm:$0xff] }
 0x497   :  { %4991 = vmatprep.mubr.msk.f32.mxu0 %vm2199_vm4, %v7114_v61  ;;  %5129 = vmatpush1.bf16.msra.mxu0 %v5128_v5  ;;  %v2752_v61 = vld [vmem:[#allocation8 + $0x150] sm:$0xff] }
 0x498   :  { %5131 = vmatprep.subr.bf16.mxu0 %v5130_v39  ;;  %v5140_v46 = vpack.c.bf16 %v2755_v37, %v2752_v61  ;;  %v2800_v5 = vld [vmem:[#allocation8 + $0x2d0] sm:$0xff]  ;;  %v2803_v39 = vld [vmem:[#allocation8 + $0x2e8] sm:$0xff] }
 0x499   :  { %v5172_v18 = vpack.c.bf16 %v2803_v39, %v2800_v5 }
 0x49a   :  { %4992 = vmatmul.mubr.msk.f32.gmra.mrb[84].mxu0 %vm2199_vm4, %v7120_v15  ;;  %v2761_v15 = vld [vmem:[#allocation8 + $0x198] sm:$0xff] }
 0x49b   :  { %4994 = vmatprep.mubr.msk.f32.mxu0 %vm2199_vm4, %v2181_v23  ;;  %5133 = vmatpush1.bf16.msra.mxu0 %v5132_v2  ;;  %v5144_v23 = vpack.c.bf16 %v2761_v15, %v2758_v56  ;;  %v2809_v56 = vld [vmem:[#allocation8 + $0x318] sm:$0xff] }
 0x49c   :  { %5135 = vmatprep.subr.bf16.mxu0 %v5134_v12 }
 0x49e   :  { %4995 = vmatmul.mubr.f32.gmra.mrb[86].mxu0 %v5902_v57 }
 0x49f   :  { %5137 = vmatpush1.bf16.msra.mxu0 %v5136_v48 }
 0x4a0   :  { %5139 = vmatprep.subr.bf16.mxu0 %v5138_v36  ;;  %v7192_v36 = vld [vmem:[#allocation10 + $0x5] ss:$0 sm:$0xff] }
 0x4a3   :  { %5141 = vmatpush1.bf16.msra.mxu0 %v5140_v46 }
 0x4a4   :  { %5143 = vmatprep.subr.bf16.mxu0 %v5142_v51  ;;  %v2806_v51 = vld [vmem:[#allocation8 + $0x300] sm:$0xff] }
 0x4a5   :  { %v5176_v60 = vpack.c.bf16 %v2809_v56, %v2806_v51  ;;  %v2843_v51 = vld [vmem:[#allocation8 + $0x428] sm:$0xff]  ;;  %v2846_v56 = vld [vmem:[#allocation8 + $0x440] sm:$0xff] }
 0x4a7   :  { %5145 = vmatpush1.bf16.msra.mxu0 %v5144_v23  ;;  %v2816_v23 = vld [vmem:[#allocation8 + $0x350] sm:$0xff] }
 0x4a8   :  { %5147 = vmatprep.subr.bf16.mxu0 %v5146_v53 }
 0x4ab   :  { %5149 = vmatpush1.bf16.msra.mxu0 %v5148_v30 }
 0x4ac   :  { %5151 = vmatprep.subr.bf16.mxu0 %v5150_v7  ;;  %v5178_v7 = vpack.c.bf16 %v2816_v23, %v2813_v45  ;;  %v5198_v45 = vpack.c.bf16 %v2846_v56, %v2843_v51  ;;  %v2842_v23 = vld [vmem:[#allocation8 + $0x420] sm:$0xff]  ;;  %v2893_v56 = vld [vmem:[#allocation8 + $0x5b8] sm:$0xff] }
 0x4ad   :  { %v2890_v51 = vld [vmem:[#allocation8 + $0x5a0] sm:$0xff] }
 0x4af   :  { %5153 = vmatpush1.bf16.msra.mxu0 %v5152_v29  ;;  %v2819_v29 = vld [vmem:[#allocation8 + $0x368] sm:$0xff] }
 0x4b0   :  { %5155 = vmatprep.subr.bf16.mxu0 %v5154_v13  ;;  %v2822_v13 = vld [vmem:[#allocation8 + $0x380] sm:$0xff] }
 0x4b3   :  { %5157 = vmatpush1.bf16.msra.mxu0 %v5156_v11  ;;  %v5182_v11 = vpack.c.bf16 %v2822_v13, %v2819_v29  ;;  %v2854_v13 = vld [vmem:[#allocation8 + $0x480] sm:$0xff] }
 0x4b4   :  { %5159 = vmatprep.subr.bf16.mxu0 %v5158_v41  ;;  %v2818_v41 = vld [vmem:[#allocation8 + $0x360] sm:$0xff] }
 0x4b7   :  { %5161 = vmatpush1.bf16.msra.mxu0 %v5160_v3 }
 0x4b8   :  { %5163 = vmatprep.subr.bf16.mxu0 %v5162_v62 }
 0x4bb   :  { %5165 = vmatpush1.bf16.msra.mxu0 %v5164_v55  ;;  %v5184_v55 = vpack.c.bf16 %v2821_v47, %v2818_v41  ;;  %v2860_v41 = vld [vmem:[#allocation8 + $0x4b0] sm:$0xff]  ;;  %v2863_v47 = vld [vmem:[#allocation8 + $0x4c8] sm:$0xff] }
 0x4bc   :  { %5167 = vmatprep.subr.bf16.mxu0 %v5166_v6  ;;  %v2824_v6 = vld [vmem:[#allocation8 + $0x390] sm:$0xff]  ;;  %v5212_v19 = vpack.c.bf16 %v2863_v47, %v2860_v41  ;;  %v2915_v41 = vld [vmem:[#allocation8 + $0x668] sm:$0xff]  ;;  %v2918_v47 = vld [vmem:[#allocation8 + $0x680] sm:$0xff] }
 0x4bd   :  { %v5188_v39 = vpack.c.bf16 %v2827_v16, %v2824_v6 }
 0x4bf   :  { %5169 = vmatpush1.bf16.msra.mxu0 %v5168_v25 }
 0x4c0   :  { %5171 = vmatprep.subr.bf16.mxu0 %v5170_v52 }
 0x4c3   :  { %5173 = vmatpush1.bf16.msra.mxu0 %v5172_v18 }
 0x4c4   :  { %5175 = vmatprep.subr.bf16.mxu0 %v5174_v49  ;;  %v2833_v49 = vld [vmem:[#allocation8 + $0x3d8] sm:$0xff] }
 0x559   :  { %v4978_v2 = vpop.f32.mrb[74].mxu0 }
 0x55a   :  { %v2589_v12 = vpop.f32.mrb[75].mxu0 }
 0x55b   :  { %v2672_v4 = vmax.f32 %v2589_v12, %v4978_v2  ;;  %v2837_v12 = vld [vmem:[#allocation8 + $0x3f8] sm:$0xff] }
 0x55d   :  { %v4981_v27 = vpop.f32.mrb[76].mxu0  ;;  %v2685_v14 = vmul.f32 %v7189_v35, %v2672_v4  ;;  %v2840_v4 = vld [vmem:[#allocation8 + $0x410] sm:$0xff] }
 0x55e   :  { %v2599_v48 = vpop.f32.mrb[77].mxu0 }
 0x55f   :  { %v2673_v61 = vmax.f32 %v2599_v48, %v4981_v27  ;;  %v7196_v21 = vadd.f32 %v7192_v36, %v2685_v14  ;;  %v5192_v48 = vpack.c.bf16 %v2833_v49, %v2830_v28  ;;  %v2885_v28 = vld [vmem:[#allocation8 + $0x578] sm:$0xff]  ;;  %v2888_v49 = vld [vmem:[#allocation8 + $0x590] sm:$0xff] }
 0x561   :  { %v2686_v37 = vmul.f32 %v7189_v35, %v2673_v61  ;;  %v4984_v42 = vpop.f32.mrb[78].mxu0  ;;  %v2703_v59 = vmax.f32 %v7196_v21, 0.0  ;;  %v5194_v61 = vpack.c.bf16 %v2840_v4, %v2837_v12  ;;  %v5226_v12 = vpack.c.bf16 %v2888_v49, %v2885_v28  ;;  %v2884_v4 = vld [vmem:[#allocation8 + $0x570] sm:$0xff]  ;;  %v2883_v21 = vld [vmem:[#allocation8 + $0x568] sm:$0xff] }
 0x562   :  { %v2609_v46 = vpop.f32.mrb[79].mxu0 }
 0x563   :  { %v2674_v15 = vmax.f32 %v2609_v46, %v4984_v42  ;;  %v7199_v0 = vadd.f32 %v7192_v36, %v2686_v37  ;;  %v2836_v37 = vld [vmem:[#allocation8 + $0x3f0] sm:$0xff]  ;;  %v2839_v42 = vld [vmem:[#allocation8 + $0x408] sm:$0xff] }
 0x565   :  { %v2687_v53 = vmul.f32 %v7189_v35, %v2674_v15  ;;  %v4987_v54 = vpop.f32.mrb[80].mxu0  ;;  %v2704_v38 = vmax.f32 %v7199_v0, 0.0  ;;  %v5196_v15 = vpack.c.bf16 %v2839_v42, %v2836_v37 }
 0x566   :  { %v2619_v30 = vpop.f32.mrb[81].mxu0 }
 0x567   :  { %v7205_v8 = vadd.f32 %v7192_v36, %v2687_v53  ;;  %v2675_v32 = vmax.f32 %v2619_v30, %v4987_v54  ;;  %3127 = vmatprep.mubr.f32.mxu0 %v2704_v38  ;;  %v2845_v53 = vld [vmem:[#allocation8 + $0x438] sm:$0xff] }
 0x568   :  { %3128 = vmatmul.mubr.f32.vlgmr.msra.gmra.mrb[88].mxu0 %v2703_v59  ;;  %v2849_v54 = vld [vmem:[#allocation8 + $0x458] sm:$0xff] }
 0x569   :  { %v2688_v17 = vmul.f32 %v7189_v35, %v2675_v32  ;;  %5177 = vmatpush1.bf16.msra.mxu0 %v5176_v60  ;;  %v4990_v20 = vpop.f32.mrb[82].mxu0  ;;  %v2852_v60 = vld [vmem:[#allocation8 + $0x470] sm:$0xff]  ;;  %v2858_v32 = vld [vmem:[#allocation8 + $0x4a0] sm:$0xff] }
 0x56a   :  { %v2629_v9 = vpop.f32.mrb[83].mxu0  ;;  %5179 = vmatprep.subr.bf16.mxu0 %v5178_v7  ;;  %v5202_v30 = vpack.c.bf16 %v2852_v60, %v2849_v54  ;;  %v2848_v7 = vld [vmem:[#allocation8 + $0x450] sm:$0xff]  ;;  %v5206_v29 = vpack.c.bf16 %v2858_v32, %v2855_v26  ;;  %v2899_v60 = vld [vmem:[#allocation8 + $0x5e8] sm:$0xff]  ;;  %v2902_v26 = vld [vmem:[#allocation8 + $0x600] sm:$0xff] }
 0x56b   :  { %v2676_v58 = vmax.f32 %v2629_v9, %v4990_v20  ;;  %v7213_v3 = vadd.f32 %v7192_v36, %v2688_v17  ;;  %v2857_v17 = vld [vmem:[#allocation8 + $0x498] sm:$0xff]  ;;  %v2896_v54 = vld [vmem:[#allocation8 + $0x5d0] sm:$0xff] }
 0x56c   :  { %v2861_v20 = vld [vmem:[#allocation8 + $0x4b8] sm:$0xff]  ;;  %v5208_v9 = vpack.c.bf16 %v2857_v17, %v2854_v13  ;;  %v2705_v17 = vmax.f32 %v7205_v8, 0.0  ;;  %v2979_v8 = vld [vmem:[#allocation8 + $0x868] sm:$0xff] }
 0x56d   :  { %v2689_v62 = vmul.f32 %v7189_v35, %v2676_v58  ;;  %5181 = vmatpush1.bf16.msra.mxu0 %v5180_v44  ;;  %v4993_v40 = vpop.f32.mrb[84].mxu0  ;;  %v2706_v22 = vmax.f32 %v7213_v3, 0.0  ;;  %v2864_v44 = vld [vmem:[#allocation8 + $0x4d0] sm:$0xff]  ;;  %v2867_v58 = vld [vmem:[#allocation8 + $0x4e8] sm:$0xff]  ;;  %v2905_v32 = vld [vmem:[#allocation8 + $0x618] sm:$0xff] }
 0x56e   :  { %v2639_v33 = vpop.f32.mrb[85].mxu0  ;;  %5183 = vmatprep.subr.bf16.mxu0 %v5182_v11  ;;  %v5210_v11 = vpack.c.bf16 %v2864_v44, %v2861_v20  ;;  %v5240_v13 = vpack.c.bf16 %v2905_v32, %v2902_v26  ;;  %v2908_v44 = vld [vmem:[#allocation8 + $0x630] sm:$0xff]  ;;  %v2957_v26 = vld [vmem:[#allocation8 + $0x7b8] sm:$0xff] }
 0x56f   :  { %v7218_v34 = vadd.f32 %v7192_v36, %v2689_v62  ;;  %v2677_v25 = vmax.f32 %v2639_v33, %v4993_v40  ;;  %3198 = vmatprep.mubr.f32.mxu0 %v2706_v22  ;;  %v5214_v62 = vpack.c.bf16 %v2870_v10, %v2867_v58  ;;  %v2866_v40 = vld [vmem:[#allocation8 + $0x4e0] sm:$0xff]  ;;  %v2873_v33 = vld [vmem:[#allocation8 + $0x518] sm:$0xff]  ;;  %v5246_v10 = vpack.c.bf16 %v2918_v47, %v2915_v41  ;;  %v2960_v32 = vld [vmem:[#allocation8 + $0x7d0] sm:$0xff] }
 0x571   :  { %v2690_v52 = vmul.f32 %v7189_v35, %v2677_v25  ;;  %5185 = vmatpush1.bf16.msra.mxu0 %v5184_v55  ;;  %v4996_v5 = vpop.f32.mrb[86].mxu0  ;;  %v2869_v55 = vld [vmem:[#allocation8 + $0x4f8] sm:$0xff]  ;;  %v2872_v25 = vld [vmem:[#allocation8 + $0x510] sm:$0xff] }
 0x572   :  { %v2649_v18 = vpop.f32.mrb[87].mxu0  ;;  %5187 = vmatprep.subr.bf16.mxu0 %v5186_v63  ;;  %v2876_v63 = vld [vmem:[#allocation8 + $0x530] sm:$0xff]  ;;  %v5216_v6 = vpack.c.bf16 %v2869_v55, %v2866_v40  ;;  %v2921_v40 = vld [vmem:[#allocation8 + $0x698] sm:$0xff] }
 0x573   :  { %v2678_v2 = vmax.f32 %v2649_v18, %v4996_v5  ;;  %v7224_v27 = vadd.f32 %v7192_v36, %v2690_v52  ;;  %v5218_v16 = vpack.c.bf16 %v2876_v63, %v2873_v33  ;;  %v2882_v52 = vld [vmem:[#allocation8 + $0x560] sm:$0xff]  ;;  %v5220_v5 = vpack.c.bf16 %v2875_v1, %v2872_v25  ;;  %v2924_v55 = vld [vmem:[#allocation8 + $0x6b0] sm:$0xff]  ;;  %v2927_v25 = vld [vmem:[#allocation8 + $0x6c8] sm:$0xff] }
 0x574   :  { %v2878_v18 = vld [vmem:[#allocation8 + $0x540] sm:$0xff]  ;;  %v5250_v63 = vpack.c.bf16 %v2924_v55, %v2921_v40 }
 0x575   :  { %v2691_v14 = vmul.f32 %v7189_v35, %v2678_v2  ;;  %5189 = vmatpush1.bf16.msra.mxu0 %v5188_v39  ;;  %v5200_v35 = vpack.c.bf16 %v2845_v53, %v2842_v23  ;;  %v5222_v39 = vpack.c.bf16 %v2882_v52, %v2879_v43  ;;  %v5232_v23 = vpack.c.bf16 %v2893_v56, %v2890_v51  ;;  %v2930_v1 = vld [vmem:[#allocation8 + $0x6e0] sm:$0xff]  ;;  %v2945_v51 = vld [vmem:[#allocation8 + $0x758] sm:$0xff]  ;;  %v2948_v56 = vld [vmem:[#allocation8 + $0x770] sm:$0xff] }
 0x576   :  { %5191 = vmatprep.subr.bf16.mxu0 %v5190_v24  ;;  %v2881_v24 = vld [vmem:[#allocation8 + $0x558] sm:$0xff]  ;;  %v5254_v52 = vpack.c.bf16 %v2930_v1, %v2927_v25 }
 0x577   :  { %v7228_v46 = vadd.f32 %v7192_v36, %v2691_v14  ;;  %v5204_v36 = vpack.c.bf16 %v2851_v31, %v2848_v7  ;;  %v5224_v2 = vpack.c.bf16 %v2881_v24, %v2878_v18  ;;  %v2887_v14 = vld [vmem:[#allocation8 + $0x588] sm:$0xff]  ;;  %v5236_v7 = vpack.c.bf16 %v2899_v60, %v2896_v54  ;;  %v2933_v18 = vld [vmem:[#allocation8 + $0x6f8] sm:$0xff]  ;;  %v2936_v24 = vld [vmem:[#allocation8 + $0x710] sm:$0xff] }
 0x578   :  { %v5228_v37 = vpack.c.bf16 %v2887_v14, %v2884_v4  ;;  %v5258_v49 = vpack.c.bf16 %v2936_v24, %v2933_v18  ;;  %v2939_v4 = vld [vmem:[#allocation8 + $0x728] sm:$0xff]  ;;  %v2942_v14 = vld [vmem:[#allocation8 + $0x740] sm:$0xff] }
 0x579   :  { %5193 = vmatpush1.bf16.msra.mxu0 %v5192_v48  ;;  %v2891_v48 = vld [vmem:[#allocation8 + $0x5a8] sm:$0xff]  ;;  %v2954_v60 = vld [vmem:[#allocation8 + $0x7a0] sm:$0xff] }
 0x57a   :  { %5195 = vmatprep.subr.bf16.mxu0 %v5194_v61  ;;  %v2894_v61 = vld [vmem:[#allocation8 + $0x5c0] sm:$0xff]  ;;  %v2951_v54 = vld [vmem:[#allocation8 + $0x788] sm:$0xff] }
 0x57b   :  { %v5230_v42 = vpack.c.bf16 %v2894_v61, %v2891_v48  ;;  %v5262_v61 = vpack.c.bf16 %v2942_v14, %v2939_v4 }
 0x57d   :  { %5197 = vmatpush1.bf16.msra.mxu0 %v5196_v15  ;;  %v2897_v15 = vld [vmem:[#allocation8 + $0x5d8] sm:$0xff] }
 0x57e   :  { %5199 = vmatprep.subr.bf16.mxu0 %v5198_v45  ;;  %v2900_v45 = vld [vmem:[#allocation8 + $0x5f0] sm:$0xff] }
 0x57f   :  { %v5234_v53 = vpack.c.bf16 %v2900_v45, %v2897_v15  ;;  %v5266_v45 = vpack.c.bf16 %v2948_v56, %v2945_v51 }
 0x581   :  { %5201 = vmatpush1.bf16.msra.mxu0 %v5200_v35  ;;  %v2903_v35 = vld [vmem:[#allocation8 + $0x608] sm:$0xff] }
 0x582   :  { %5203 = vmatprep.subr.bf16.mxu0 %v5202_v30  ;;  %v2906_v30 = vld [vmem:[#allocation8 + $0x620] sm:$0xff] }
 0x583   :  { %v5238_v31 = vpack.c.bf16 %v2906_v30, %v2903_v35  ;;  %v5270_v30 = vpack.c.bf16 %v2954_v60, %v2951_v54 }
 0x585   :  { %5205 = vmatpush1.bf16.msra.mxu0 %v5204_v36  ;;  %v2909_v36 = vld [vmem:[#allocation8 + $0x638] sm:$0xff] }
 0x586   :  { %5207 = vmatprep.subr.bf16.mxu0 %v5206_v29  ;;  %v2912_v29 = vld [vmem:[#allocation8 + $0x650] sm:$0xff] }
 0x587   :  { %v5242_v20 = vpack.c.bf16 %v2912_v29, %v2909_v36  ;;  %v5274_v29 = vpack.c.bf16 %v2960_v32, %v2957_v26  ;;  %v2707_v32 = vmax.f32 %v7218_v34, 0.0  ;;  %v3024_v34 = vld [vmem:[#allocation8 + $0x9d0] sm:$0xff] }
 0x589   :  { %5209 = vmatpush1.bf16.msra.mxu0 %v5208_v9  ;;  %v2911_v9 = vld [vmem:[#allocation8 + $0x648] sm:$0xff] }
 0x58a   :  { %5211 = vmatprep.subr.bf16.mxu0 %v5210_v11  ;;  %v2708_v11 = vmax.f32 %v7224_v27, 0.0  ;;  %v5244_v58 = vpack.c.bf16 %v2911_v9, %v2908_v44  ;;  %v2963_v44 = vld [vmem:[#allocation8 + $0x7e8] sm:$0xff]  ;;  %v2966_v9 = vld [vmem:[#allocation8 + $0x800] sm:$0xff] }
 0x58b   :  { %v5278_v47 = vpack.c.bf16 %v2966_v9, %v2963_v44  ;;  %v3014_v44 = vld [vmem:[#allocation8 + $0x980] sm:$0xff] }
 0x58d   :  { %5213 = vmatpush1.bf16.msra.mxu0 %v5212_v19  ;;  %v2914_v19 = vld [vmem:[#allocation8 + $0x660] sm:$0xff] }
 0x58e   :  { %5215 = vmatprep.subr.bf16.mxu0 %v5214_v62  ;;  %v2917_v62 = vld [vmem:[#allocation8 + $0x678] sm:$0xff] }
 0x58f   :  { %v5248_v33 = vpack.c.bf16 %v2917_v62, %v2914_v19  ;;  %v2969_v19 = vld [vmem:[#allocation8 + $0x818] sm:$0xff]  ;;  %v2972_v62 = vld [vmem:[#allocation8 + $0x830] sm:$0xff] }
 0x590   :  { %v5282_v55 = vpack.c.bf16 %v2972_v62, %v2969_v19  ;;  %v3020_v19 = vld [vmem:[#allocation8 + $0x9b0] sm:$0xff] }
 0x591   :  { %5217 = vmatpush1.bf16.msra.mxu0 %v5216_v6  ;;  %v2920_v6 = vld [vmem:[#allocation8 + $0x690] sm:$0xff] }
 0x592   :  { %5219 = vmatprep.subr.bf16.mxu0 %v5218_v16  ;;  %v2923_v16 = vld [vmem:[#allocation8 + $0x6a8] sm:$0xff] }
 0x593   :  { %v5252_v43 = vpack.c.bf16 %v2923_v16, %v2920_v6  ;;  %v2975_v6 = vld [vmem:[#allocation8 + $0x848] sm:$0xff]  ;;  %v2978_v16 = vld [vmem:[#allocation8 + $0x860] sm:$0xff] }
 0x594   :  { %v5286_v1 = vpack.c.bf16 %v2978_v16, %v2975_v6  ;;  %v3026_v6 = vld [vmem:[#allocation8 + $0x9e0] sm:$0xff] }
 0x595   :  { %5221 = vmatpush1.bf16.msra.mxu0 %v5220_v5  ;;  %v2926_v5 = vld [vmem:[#allocation8 + $0x6c0] sm:$0xff] }
 0x596   :  { %5223 = vmatprep.subr.bf16.mxu0 %v5222_v39  ;;  %v2929_v39 = vld [vmem:[#allocation8 + $0x6d8] sm:$0xff] }
 0x597   :  { %v5256_v28 = vpack.c.bf16 %v2929_v39, %v2926_v5  ;;  %v2981_v5 = vld [vmem:[#allocation8 + $0x878] sm:$0xff]  ;;  %v2984_v39 = vld [vmem:[#allocation8 + $0x890] sm:$0xff] }
 0x598   :  { %v5290_v24 = vpack.c.bf16 %v2984_v39, %v2981_v5  ;;  %v3032_v5 = vld [vmem:[#allocation8 + $0xa10] sm:$0xff] }
 0x599   :  { %5225 = vmatpush1.bf16.msra.mxu0 %v5224_v2  ;;  %v2932_v2 = vld [vmem:[#allocation8 + $0x6f0] sm:$0xff] }
 0x59a   :  { %5227 = vmatprep.subr.bf16.mxu0 %v5226_v12  ;;  %v2935_v12 = vld [vmem:[#allocation8 + $0x708] sm:$0xff] }
 0x59b   :  { %v5260_v48 = vpack.c.bf16 %v2935_v12, %v2932_v2  ;;  %v2987_v2 = vld [vmem:[#allocation8 + $0x8a8] sm:$0xff]  ;;  %v2990_v12 = vld [vmem:[#allocation8 + $0x8c0] sm:$0xff] }
 0x59c   :  { %v5294_v14 = vpack.c.bf16 %v2990_v12, %v2987_v2  ;;  %v3038_v2 = vld [vmem:[#allocation8 + $0xa40] sm:$0xff] }
 0x59d   :  { %5229 = vmatpush1.bf16.msra.mxu0 %v5228_v37  ;;  %v2938_v37 = vld [vmem:[#allocation8 + $0x720] sm:$0xff] }
 0x59e   :  { %5231 = vmatprep.subr.bf16.mxu0 %v5230_v42  ;;  %v2941_v42 = vld [vmem:[#allocation8 + $0x738] sm:$0xff] }
 0x59f   :  { %v5264_v15 = vpack.c.bf16 %v2941_v42, %v2938_v37  ;;  %v2993_v37 = vld [vmem:[#allocation8 + $0x8d8] sm:$0xff]  ;;  %v2996_v42 = vld [vmem:[#allocation8 + $0x8f0] sm:$0xff] }
 0x5a0   :  { %v5298_v56 = vpack.c.bf16 %v2996_v42, %v2993_v37  ;;  %v3044_v37 = vld [vmem:[#allocation8 + $0xa70] sm:$0xff] }
 0x5a1   :  { %5233 = vmatpush1.bf16.msra.mxu0 %v5232_v23  ;;  %v2944_v23 = vld [vmem:[#allocation8 + $0x750] sm:$0xff] }
 0x5a2   :  { %5235 = vmatprep.subr.bf16.mxu0 %v5234_v53  ;;  %v2947_v53 = vld [vmem:[#allocation8 + $0x768] sm:$0xff] }
 0x5a3   :  { %v5268_v35 = vpack.c.bf16 %v2947_v53, %v2944_v23  ;;  %v2999_v23 = vld [vmem:[#allocation8 + $0x908] sm:$0xff]  ;;  %v3002_v53 = vld [vmem:[#allocation8 + $0x920] sm:$0xff] }
 0x5a4   :  { %v5302_v60 = vpack.c.bf16 %v3002_v53, %v2999_v23  ;;  %v2763_v23 = vld [vmem:[#allocation8 + $0x1a8] sm:$0xff] }
 0x5a5   :  { %5237 = vmatpush1.bf16.msra.mxu0 %v5236_v7  ;;  %v2950_v7 = vld [vmem:[#allocation8 + $0x780] sm:$0xff] }
 0x5a6   :  { %5239 = vmatprep.subr.bf16.mxu0 %v5238_v31  ;;  %v2953_v31 = vld [vmem:[#allocation8 + $0x798] sm:$0xff] }
 0x5a7   :  { %v5272_v36 = vpack.c.bf16 %v2953_v31, %v2950_v7  ;;  %v3005_v7 = vld [vmem:[#allocation8 + $0x938] sm:$0xff]  ;;  %v3008_v31 = vld [vmem:[#allocation8 + $0x950] sm:$0xff] }
 0x5a8   :  { %3199 = vmatmul.mubr.f32.vlgmr.msra.gmra.mrb[88].mxu0 %v2705_v17 }
 0x5a9   :  { %5241 = vmatpush1.bf16.msra.mxu0 %v5240_v13  ;;  %3269 = vmatprep.mubr.f32.mxu0 %v2708_v11  ;;  %v2956_v13 = vld [vmem:[#allocation8 + $0x7b0] sm:$0xff] }
 0x5aa   :  { %5243 = vmatprep.subr.bf16.mxu0 %v5242_v20  ;;  %v2959_v20 = vld [vmem:[#allocation8 + $0x7c8] sm:$0xff] }
 0x5ab   :  { %v5276_v41 = vpack.c.bf16 %v2959_v20, %v2956_v13  ;;  %v3007_v13 = vld [vmem:[#allocation8 + $0x948] sm:$0xff] }
 0x5ac   :  { %v3011_v20 = vld [vmem:[#allocation8 + $0x968] sm:$0xff] }
 0x5ad   :  { %5245 = vmatpush1.bf16.msra.mxu0 %v5244_v58  ;;  %v2962_v58 = vld [vmem:[#allocation8 + $0x7e0] sm:$0xff] }
 0x5ae   :  { %5247 = vmatprep.subr.bf16.mxu0 %v5246_v10  ;;  %v2965_v10 = vld [vmem:[#allocation8 + $0x7f8] sm:$0xff] }
 0x5af   :  { %v5280_v40 = vpack.c.bf16 %v2965_v10, %v2962_v58  ;;  %v3013_v58 = vld [vmem:[#allocation8 + $0x978] sm:$0xff] }
 0x5b0   :  { %v3017_v10 = vld [vmem:[#allocation8 + $0x998] sm:$0xff] }
 0x5b1   :  { %5249 = vmatpush1.bf16.msra.mxu0 %v5248_v33  ;;  %v2968_v33 = vld [vmem:[#allocation8 + $0x810] sm:$0xff] }
 0x5b2   :  { %5251 = vmatprep.subr.bf16.mxu0 %v5250_v63  ;;  %v2971_v63 = vld [vmem:[#allocation8 + $0x828] sm:$0xff] }
 0x5b3   :  { %v5284_v25 = vpack.c.bf16 %v2971_v63, %v2968_v33  ;;  %v3019_v33 = vld [vmem:[#allocation8 + $0x9a8] sm:$0xff] }
 0x5b4   :  { %v3023_v63 = vld [vmem:[#allocation8 + $0x9c8] sm:$0xff] }
 0x5b5   :  { %5253 = vmatpush1.bf16.msra.mxu0 %v5252_v43  ;;  %v2974_v43 = vld [vmem:[#allocation8 + $0x840] sm:$0xff] }
 0x5b6   :  { %5255 = vmatprep.subr.bf16.mxu0 %v5254_v52  ;;  %v2977_v52 = vld [vmem:[#allocation8 + $0x858] sm:$0xff] }
 0x5b7   :  { %v5288_v18 = vpack.c.bf16 %v2977_v52, %v2974_v43  ;;  %v3025_v43 = vld [vmem:[#allocation8 + $0x9d8] sm:$0xff] }
 0x5b8   :  { %v3029_v52 = vld [vmem:[#allocation8 + $0x9f8] sm:$0xff] }
 0x5b9   :  { %5257 = vmatpush1.bf16.msra.mxu0 %v5256_v28  ;;  %v2980_v28 = vld [vmem:[#allocation8 + $0x870] sm:$0xff] }
 0x5ba   :  { %5259 = vmatprep.subr.bf16.mxu0 %v5258_v49  ;;  %v2983_v49 = vld [vmem:[#allocation8 + $0x888] sm:$0xff] }
 0x5bb   :  { %v5292_v4 = vpack.c.bf16 %v2983_v49, %v2980_v28  ;;  %v3031_v28 = vld [vmem:[#allocation8 + $0xa08] sm:$0xff] }
 0x5bc   :  { %v3035_v49 = vld [vmem:[#allocation8 + $0xa28] sm:$0xff] }
 0x5bd   :  { %5261 = vmatpush1.bf16.msra.mxu0 %v5260_v48  ;;  %v2986_v48 = vld [vmem:[#allocation8 + $0x8a0] sm:$0xff] }
 0x5be   :  { %5263 = vmatprep.subr.bf16.mxu0 %v5262_v61  ;;  %v2989_v61 = vld [vmem:[#allocation8 + $0x8b8] sm:$0xff] }
 0x5bf   :  { %v5296_v51 = vpack.c.bf16 %v2989_v61, %v2986_v48  ;;  %v3037_v48 = vld [vmem:[#allocation8 + $0xa38] sm:$0xff] }
 0x5c0   :  { %v3041_v61 = vld [vmem:[#allocation8 + $0xa58] sm:$0xff] }
 0x5c1   :  { %5265 = vmatpush1.bf16.msra.mxu0 %v5264_v15  ;;  %v2992_v15 = vld [vmem:[#allocation8 + $0x8d0] sm:$0xff] }
 0x5c2   :  { %5267 = vmatprep.subr.bf16.mxu0 %v5266_v45  ;;  %v2995_v45 = vld [vmem:[#allocation8 + $0x8e8] sm:$0xff] }
 0x5c3   :  { %v5300_v54 = vpack.c.bf16 %v2995_v45, %v2992_v15  ;;  %v3043_v15 = vld [vmem:[#allocation8 + $0xa68] sm:$0xff]  ;;  %v2760_v45 = vld [vmem:[#allocation8 + $0x190] sm:$0xff] }
 0x5c5   :  { %5269 = vmatpush1.bf16.msra.mxu0 %v5268_v35  ;;  %v2998_v35 = vld [vmem:[#allocation8 + $0x900] sm:$0xff] }
 0x5c6   :  { %5271 = vmatprep.subr.bf16.mxu0 %v5270_v30  ;;  %v3001_v30 = vld [vmem:[#allocation8 + $0x918] sm:$0xff] }
 0x5c7   :  { %v5304_v26 = vpack.c.bf16 %v3001_v30, %v2998_v35  ;;  %v2715_v35 = vld [vmem:[#allocation8 + $0x28] sm:$0xff]  ;;  %v2766_v30 = vld [vmem:[#allocation8 + $0x1c0] sm:$0xff] }
 0x5c9   :  { %5273 = vmatpush1.bf16.msra.mxu0 %v5272_v36  ;;  %v5306_v36 = vpack.c.bf16 %v3008_v31, %v3005_v7  ;;  %v2769_v7 = vld [vmem:[#allocation8 + $0x1d8] sm:$0xff] }
 0x5ca   :  { %5275 = vmatprep.subr.bf16.mxu0 %v5274_v29  ;;  %v3004_v29 = vld [vmem:[#allocation8 + $0x930] sm:$0xff] }
 0x5cb   :  { %v5308_v9 = vpack.c.bf16 %v3007_v13, %v3004_v29  ;;  %v2718_v29 = vld [vmem:[#allocation8 + $0x40] sm:$0xff]  ;;  %v2721_v13 = vld [vmem:[#allocation8 + $0x58] sm:$0xff] }
 0x5cd   :  { %5277 = vmatpush1.bf16.msra.mxu0 %v5276_v41  ;;  %v5310_v41 = vpack.c.bf16 %v3014_v44, %v3011_v20  ;;  %v2772_v20 = vld [vmem:[#allocation8 + $0x1f0] sm:$0xff]  ;;  %v2775_v44 = vld [vmem:[#allocation8 + $0x208] sm:$0xff] }
 0x5ce   :  { %5279 = vmatprep.subr.bf16.mxu0 %v5278_v47  ;;  %v3010_v47 = vld [vmem:[#allocation8 + $0x960] sm:$0xff] }
 0x5cf   :  { %v5312_v62 = vpack.c.bf16 %v3013_v58, %v3010_v47  ;;  %v2724_v47 = vld [vmem:[#allocation8 + $0x70] sm:$0xff]  ;;  %v2727_v58 = vld [vmem:[#allocation8 + $0x88] sm:$0xff] }
 0x5d1   :  { %5281 = vmatpush1.bf16.msra.mxu0 %v5280_v40  ;;  %v5314_v40 = vpack.c.bf16 %v3020_v19, %v3017_v10  ;;  %v2778_v10 = vld [vmem:[#allocation8 + $0x220] sm:$0xff]  ;;  %v2781_v19 = vld [vmem:[#allocation8 + $0x238] sm:$0xff] }
 0x5d2   :  { %5283 = vmatprep.subr.bf16.mxu0 %v5282_v55  ;;  %v3016_v55 = vld [vmem:[#allocation8 + $0x990] sm:$0xff] }
 0x5d3   :  { %v5316_v16 = vpack.c.bf16 %v3019_v33, %v3016_v55  ;;  %v2730_v55 = vld [vmem:[#allocation8 + $0xa0] sm:$0xff]  ;;  %v2733_v33 = vld [vmem:[#allocation8 + $0xb8] sm:$0xff] }
 0x5d5   :  { %5285 = vmatpush1.bf16.msra.mxu0 %v5284_v25  ;;  %v5318_v25 = vpack.c.bf16 %v3026_v6, %v3023_v63  ;;  %v2784_v63 = vld [vmem:[#allocation8 + $0x250] sm:$0xff]  ;;  %v2787_v6 = vld [vmem:[#allocation8 + $0x268] sm:$0xff] }
 0x5d6   :  { %5287 = vmatprep.subr.bf16.mxu0 %v5286_v1  ;;  %v3022_v1 = vld [vmem:[#allocation8 + $0x9c0] sm:$0xff]  ;;  %v5350_v0 = vpack.c.bf16 %v2787_v6, %v2784_v63  ;;  %v2889_v6 = vld [vmem:[#allocation8 + $0x598] sm:$0xff] }
 0x5d7   :  { %v5320_v39 = vpack.c.bf16 %v3025_v43, %v3022_v1  ;;  %v2790_v1 = vld [vmem:[#allocation8 + $0x280] sm:$0xff]  ;;  %v2793_v43 = vld [vmem:[#allocation8 + $0x298] sm:$0xff] }
 0x5d8   :  { %v2886_v63 = vld [vmem:[#allocation8 + $0x580] sm:$0xff] }
 0x5d9   :  { %5289 = vmatpush1.bf16.msra.mxu0 %v5288_v18  ;;  %v5322_v18 = vpack.c.bf16 %v3032_v5, %v3029_v52  ;;  %v5354_v5 = vpack.c.bf16 %v2793_v43, %v2790_v1  ;;  %v2892_v1 = vld [vmem:[#allocation8 + $0x5b0] sm:$0xff]  ;;  %v2895_v43 = vld [vmem:[#allocation8 + $0x5c8] sm:$0xff] }
 0x5da   :  { %5291 = vmatprep.subr.bf16.mxu0 %v5290_v24  ;;  %v3028_v24 = vld [vmem:[#allocation8 + $0x9f0] sm:$0xff] }
 0x5db   :  { %v5324_v12 = vpack.c.bf16 %v3031_v28, %v3028_v24  ;;  %v2796_v24 = vld [vmem:[#allocation8 + $0x2b0] sm:$0xff]  ;;  %v2799_v28 = vld [vmem:[#allocation8 + $0x2c8] sm:$0xff] }
 0x5dd   :  { %5293 = vmatpush1.bf16.msra.mxu0 %v5292_v4  ;;  %v5326_v4 = vpack.c.bf16 %v3038_v2, %v3035_v49  ;;  %v5358_v2 = vpack.c.bf16 %v2799_v28, %v2796_v24  ;;  %v2898_v24 = vld [vmem:[#allocation8 + $0x5e0] sm:$0xff]  ;;  %v2901_v28 = vld [vmem:[#allocation8 + $0x5f8] sm:$0xff] }
 0x5de   :  { %5295 = vmatprep.subr.bf16.mxu0 %v5294_v14  ;;  %v3034_v14 = vld [vmem:[#allocation8 + $0xa20] sm:$0xff] }
 0x5df   :  { %v5328_v42 = vpack.c.bf16 %v3037_v48, %v3034_v14  ;;  %v2802_v14 = vld [vmem:[#allocation8 + $0x2e0] sm:$0xff]  ;;  %v2805_v48 = vld [vmem:[#allocation8 + $0x2f8] sm:$0xff] }
 0x5e1   :  { %5297 = vmatpush1.bf16.msra.mxu0 %v5296_v51  ;;  %v5330_v51 = vpack.c.bf16 %v3044_v37, %v3041_v61  ;;  %v5362_v37 = vpack.c.bf16 %v2805_v48, %v2802_v14  ;;  %v2952_v14 = vld [vmem:[#allocation8 + $0x790] sm:$0xff]  ;;  %v2955_v48 = vld [vmem:[#allocation8 + $0x7a8] sm:$0xff] }
 0x5e2   :  { %5299 = vmatprep.subr.bf16.mxu0 %v5298_v56  ;;  %v3040_v56 = vld [vmem:[#allocation8 + $0xa50] sm:$0xff] }
 0x5e3   :  { %v5332_v53 = vpack.c.bf16 %v3043_v15, %v3040_v56  ;;  %v2856_v56 = vld [vmem:[#allocation8 + $0x490] sm:$0xff]  ;;  %v2859_v15 = vld [vmem:[#allocation8 + $0x4a8] sm:$0xff] }
 0x5e5   :  { %5301 = vmatpush1.bf16.msra.mxu0 %v5300_v54  ;;  %v5334_v54 = vpack.c.bf16 %v2763_v23, %v2760_v45  ;;  %v5366_v23 = vpack.c.bf16 %v2859_v15, %v2856_v56  ;;  %v2958_v56 = vld [vmem:[#allocation8 + $0x7c0] sm:$0xff]  ;;  %v2961_v15 = vld [vmem:[#allocation8 + $0x7d8] sm:$0xff] }
 0x5e6   :  { %5303 = vmatprep.subr.bf16.mxu0 %v5302_v60  ;;  %v2712_v60 = vld [vmem:[#allocation8 + $0x10] sm:$0xff] }
 0x5e7   :  { %v5336_v31 = vpack.c.bf16 %v2715_v35, %v2712_v60  ;;  %v2862_v60 = vld [vmem:[#allocation8 + $0x4c0] sm:$0xff]  ;;  %v2865_v35 = vld [vmem:[#allocation8 + $0x4d8] sm:$0xff] }
 0x5e8   :  { %3270 = vmatmul.mubr.f32.vlgmr.msra.gmra.mrb[88].mxu0 %v2707_v32 }
 0x5e9   :  { %5305 = vmatpush1.bf16.msra.mxu0 %v5304_v26  ;;  %3340 = vmatprep.mubr.f32.mxu0 %v5902_v57  ;;  %v2709_v26 = vmax.f32 %v7228_v46, 0.0 }
 0x5ea   :  { %5307 = vmatprep.subr.bf16.mxu0 %v5306_v36  ;;  %v5338_v36 = vpack.c.bf16 %v2769_v7, %v2766_v30  ;;  %v5370_v7 = vpack.c.bf16 %v2865_v35, %v2862_v60  ;;  %v2964_v60 = vld [vmem:[#allocation8 + $0x7f0] sm:$0xff]  ;;  %v2967_v35 = vld [vmem:[#allocation8 + $0x808] sm:$0xff] }
 0x5ed   :  { %5309 = vmatpush1.bf16.msra.mxu0 %v5308_v9  ;;  %v5340_v9 = vpack.c.bf16 %v2721_v13, %v2718_v29  ;;  %v2868_v29 = vld [vmem:[#allocation8 + $0x4f0] sm:$0xff]  ;;  %v2871_v13 = vld [vmem:[#allocation8 + $0x508] sm:$0xff] }
 0x5ee   :  { %5311 = vmatprep.subr.bf16.mxu0 %v5310_v41  ;;  %v5342_v41 = vpack.c.bf16 %v2775_v44, %v2772_v20  ;;  %v5374_v44 = vpack.c.bf16 %v2871_v13, %v2868_v29  ;;  %v2970_v29 = vld [vmem:[#allocation8 + $0x820] sm:$0xff]  ;;  %v2973_v13 = vld [vmem:[#allocation8 + $0x838] sm:$0xff] }
 0x5f1   :  { %5313 = vmatpush1.bf16.msra.mxu0 %v5312_v62  ;;  %v5344_v62 = vpack.c.bf16 %v2727_v58, %v2724_v47  ;;  %v2874_v47 = vld [vmem:[#allocation8 + $0x520] sm:$0xff]  ;;  %v2877_v58 = vld [vmem:[#allocation8 + $0x538] sm:$0xff] }
 0x5f2   :  { %5315 = vmatprep.subr.bf16.mxu0 %v5314_v40  ;;  %v5346_v40 = vpack.c.bf16 %v2781_v19, %v2778_v10  ;;  %v5378_v19 = vpack.c.bf16 %v2877_v58, %v2874_v47  ;;  %v2976_v47 = vld [vmem:[#allocation8 + $0x850] sm:$0xff]  ;;  %v2931_v58 = vld [vmem:[#allocation8 + $0x6e8] sm:$0xff] }
 0x5f3   :  { %v5414_v27 = vpack.c.bf16 %v2979_v8, %v2976_v47 }
 0x5f5   :  { %5317 = vmatpush1.bf16.msra.mxu0 %v5316_v16  ;;  %v5348_v16 = vpack.c.bf16 %v2733_v33, %v2730_v55  ;;  %v2880_v55 = vld [vmem:[#allocation8 + $0x550] sm:$0xff]  ;;  %v2835_v33 = vld [vmem:[#allocation8 + $0x3e8] sm:$0xff] }
 0x5f6   :  { %5319 = vmatprep.subr.bf16.mxu0 %v5318_v25  ;;  %v2739_v25 = vld [vmem:[#allocation8 + $0xe8] sm:$0xff]  ;;  %v5382_v3 = vpack.c.bf16 %v2883_v21, %v2880_v55  ;;  %v2934_v55 = vld [vmem:[#allocation8 + $0x700] sm:$0xff]  ;;  %v2937_v21 = vld [vmem:[#allocation8 + $0x718] sm:$0xff] }
 0x5f9   :  { %5321 = vmatpush1.bf16.msra.mxu0 %v5320_v39  ;;  %v2742_v39 = vld [vmem:[#allocation8 + $0x100] sm:$0xff] }
 0x5fa   :  { %5323 = vmatprep.subr.bf16.mxu0 %v5322_v18  ;;  %v2745_v18 = vld [vmem:[#allocation8 + $0x118] sm:$0xff] }
 0x5fb   :  { %v5356_v49 = vpack.c.bf16 %v2745_v18, %v2742_v39  ;;  %v2844_v39 = vld [vmem:[#allocation8 + $0x430] sm:$0xff]  ;;  %v2847_v18 = vld [vmem:[#allocation8 + $0x448] sm:$0xff] }
 0x5fd   :  { %5325 = vmatpush1.bf16.msra.mxu0 %v5324_v12  ;;  %v2748_v12 = vld [vmem:[#allocation8 + $0x130] sm:$0xff] }
 0x5fe   :  { %5327 = vmatprep.subr.bf16.mxu0 %v5326_v4  ;;  %v2751_v4 = vld [vmem:[#allocation8 + $0x148] sm:$0xff] }
 0x5ff   :  { %v5360_v61 = vpack.c.bf16 %v2751_v4, %v2748_v12  ;;  %v2850_v12 = vld [vmem:[#allocation8 + $0x460] sm:$0xff]  ;;  %v2853_v4 = vld [vmem:[#allocation8 + $0x478] sm:$0xff] }
 0x601   :  { %5329 = vmatpush1.bf16.msra.mxu0 %v5328_v42  ;;  %v2754_v42 = vld [vmem:[#allocation8 + $0x160] sm:$0xff] }
 0x602   :  { %5331 = vmatprep.subr.bf16.mxu0 %v5330_v51  ;;  %v2757_v51 = vld [vmem:[#allocation8 + $0x178] sm:$0xff] }
 0x603   :  { %v5364_v45 = vpack.c.bf16 %v2757_v51, %v2754_v42  ;;  %v2904_v42 = vld [vmem:[#allocation8 + $0x610] sm:$0xff]  ;;  %v2907_v51 = vld [vmem:[#allocation8 + $0x628] sm:$0xff] }
 0x605   :  { %5333 = vmatpush1.bf16.msra.mxu0 %v5332_v53  ;;  %v2808_v53 = vld [vmem:[#allocation8 + $0x310] sm:$0xff] }
 0x606   :  { %5335 = vmatprep.subr.bf16.mxu0 %v5334_v54  ;;  %v2811_v54 = vld [vmem:[#allocation8 + $0x328] sm:$0xff] }
 0x607   :  { %v5368_v30 = vpack.c.bf16 %v2811_v54, %v2808_v53  ;;  %v2910_v53 = vld [vmem:[#allocation8 + $0x640] sm:$0xff]  ;;  %v2913_v54 = vld [vmem:[#allocation8 + $0x658] sm:$0xff] }
 0x608   :  { %3341 = vmatmul.mubr.f32.vlgmr.msra.gmra.mrb[88].mxu0 %v2709_v26 }
 0x609   :  { %5337 = vmatpush3.bf16.msra.mxu0 %v5336_v31  ;;  %3411 = vmatprep.mubr.f32.mxu0 %v2704_v38  ;;  %v2736_v38 = vld [vmem:[#allocation8 + $0xd0] sm:$0xff]  ;;  %v2814_v31 = vld [vmem:[#allocation8 + $0x340] sm:$0xff] }
 0x60a   :  { %5339 = vmatprep.subr.bf16.mxu0 %v5338_v36  ;;  %v5352_v52 = vpack.c.bf16 %v2739_v25, %v2736_v38  ;;  %v2817_v36 = vld [vmem:[#allocation8 + $0x358] sm:$0xff]  ;;  %v2838_v38 = vld [vmem:[#allocation8 + $0x400] sm:$0xff] }
 0x60b   :  { %v5372_v20 = vpack.c.bf16 %v2817_v36, %v2814_v31  ;;  %v2841_v25 = vld [vmem:[#allocation8 + $0x418] sm:$0xff]  ;;  %v2916_v31 = vld [vmem:[#allocation8 + $0x670] sm:$0xff]  ;;  %v2919_v36 = vld [vmem:[#allocation8 + $0x688] sm:$0xff] }
 0x60d   :  { %5341 = vmatpush3.bf16.msra.mxu0 %v5340_v9  ;;  %v2820_v9 = vld [vmem:[#allocation8 + $0x370] sm:$0xff] }
 0x60e   :  { %5343 = vmatprep.subr.bf16.mxu0 %v5342_v41  ;;  %v2823_v41 = vld [vmem:[#allocation8 + $0x388] sm:$0xff] }
 0x60f   :  { %v5376_v10 = vpack.c.bf16 %v2823_v41, %v2820_v9  ;;  %v2922_v9 = vld [vmem:[#allocation8 + $0x6a0] sm:$0xff]  ;;  %v2925_v41 = vld [vmem:[#allocation8 + $0x6b8] sm:$0xff] }
 0x611   :  { %5345 = vmatpush3.bf16.msra.mxu0 %v5344_v62  ;;  %v2826_v62 = vld [vmem:[#allocation8 + $0x3a0] sm:$0xff] }
 0x612   :  { %5347 = vmatprep.subr.bf16.mxu0 %v5346_v40  ;;  %v2829_v40 = vld [vmem:[#allocation8 + $0x3b8] sm:$0xff] }
 0x615   :  { %5349 = vmatpush3.bf16.msra.mxu0 %v5348_v16 }
 0x616   :  { %5351 = vmatprep.subr.bf16.mxu0 %v5350_v0  ;;  %v5386_v0 = vpack.c.bf16 %v2889_v6, %v2886_v63  ;;  %v2940_v63 = vld [vmem:[#allocation8 + $0x730] sm:$0xff]  ;;  %v2943_v6 = vld [vmem:[#allocation8 + $0x748] sm:$0xff] }
 0x619   :  { %5353 = vmatpush3.bf16.msra.mxu0 %v5352_v52  ;;  %v5388_v52 = vpack.c.bf16 %v2841_v25, %v2838_v38  ;;  %v5424_v38 = vpack.c.bf16 %v2943_v6, %v2940_v63 }
 0x61a   :  { %5355 = vmatprep.subr.bf16.mxu0 %v5354_v5  ;;  %v5390_v5 = vpack.c.bf16 %v2895_v43, %v2892_v1  ;;  %v2946_v1 = vld [vmem:[#allocation8 + $0x760] sm:$0xff]  ;;  %v2949_v43 = vld [vmem:[#allocation8 + $0x778] sm:$0xff] }
 0x61d   :  { %5357 = vmatpush3.bf16.msra.mxu0 %v5356_v49  ;;  %v5392_v49 = vpack.c.bf16 %v2847_v18, %v2844_v39  ;;  %v3003_v39 = vld [vmem:[#allocation8 + $0x928] sm:$0xff] }
 0x61e   :  { %5359 = vmatprep.subr.bf16.mxu0 %v5358_v2  ;;  %v5394_v2 = vpack.c.bf16 %v2901_v28, %v2898_v24  ;;  %v3006_v24 = vld [vmem:[#allocation8 + $0x940] sm:$0xff]  ;;  %v3009_v28 = vld [vmem:[#allocation8 + $0x958] sm:$0xff] }
 0x621   :  { %5361 = vmatpush3.bf16.msra.mxu0 %v5360_v61  ;;  %v5396_v61 = vpack.c.bf16 %v2853_v4, %v2850_v12  ;;  %v3015_v12 = vld [vmem:[#allocation8 + $0x988] sm:$0xff] }
 0x622   :  { %5363 = vmatprep.subr.bf16.mxu0 %v5362_v37  ;;  %v5398_v37 = vpack.c.bf16 %v2955_v48, %v2952_v14  ;;  %v3018_v14 = vld [vmem:[#allocation8 + $0x9a0] sm:$0xff]  ;;  %v3021_v48 = vld [vmem:[#allocation8 + $0x9b8] sm:$0xff] }
 0x625   :  { %5365 = vmatpush3.bf16.msra.mxu0 %v5364_v45  ;;  %v5400_v45 = vpack.c.bf16 %v2907_v51, %v2904_v42  ;;  %v3033_v42 = vld [vmem:[#allocation8 + $0xa18] sm:$0xff] }
 0x626   :  { %5367 = vmatprep.subr.bf16.mxu0 %v5366_v23  ;;  %v5402_v23 = vpack.c.bf16 %v2961_v15, %v2958_v56  ;;  %v3036_v56 = vld [vmem:[#allocation8 + $0xa30] sm:$0xff]  ;;  %v3039_v15 = vld [vmem:[#allocation8 + $0xa48] sm:$0xff] }
 0x628   :  { %3412 = vmatmul.mubr.f32.vlgmr.msra.gmra.mrb[90].mxu0 %v2703_v59  ;;  %v5380_v59 = vpack.c.bf16 %v2829_v40, %v2826_v62 }
 0x629   :  { %5369 = vmatpush3.bf16.msra.mxu0 %v5368_v30  ;;  %3481 = vmatprep.mubr.f32.mxu0 %v2706_v22  ;;  %v2832_v22 = vld [vmem:[#allocation8 + $0x3d0] sm:$0xff]  ;;  %v5404_v30 = vpack.c.bf16 %v2913_v54, %v2910_v53  ;;  %v3045_v53 = vld [vmem:[#allocation8 + $0xa78] sm:$0xff] }
 0x62a   :  { %5371 = vmatprep.subr.bf16.mxu0 %v5370_v7  ;;  %v5384_v16 = vpack.c.bf16 %v2835_v33, %v2832_v22  ;;  %v5406_v7 = vpack.c.bf16 %v2967_v35, %v2964_v60  ;;  %v5420_v22 = vpack.c.bf16 %v2937_v21, %v2934_v55  ;;  %v3048_v60 = vlaneseq }
 0x62c   :  { %v3049_v35 = vshrl.u32 %v3048_v60, 7 }
 0x62d   :  { %5373 = vmatpush3.bf16.msra.mxu0 %v5372_v20  ;;  %v5408_v20 = vpack.c.bf16 %v2919_v36, %v2916_v31 }
 0x62e   :  { %5375 = vmatprep.subr.bf16.mxu0 %v5374_v44  ;;  %v5410_v44 = vpack.c.bf16 %v2973_v13, %v2970_v29  ;;  %v3054_v31 = vsub.s32 1, %v3049_v35  ;;  %v3058_v8 = vsub.s32 2, %v3049_v35 }
 0x631   :  { %5377 = vmatpush3.bf16.msra.mxu0 %v5376_v10  ;;  %v2982_v10 = vld [vmem:[#allocation8 + $0x880] sm:$0xff] }
 0x632   :  { %5379 = vmatprep.subr.bf16.mxu0 %v5378_v19  ;;  %v2985_v19 = vld [vmem:[#allocation8 + $0x898] sm:$0xff] }
 0x633   :  { %v5418_v40 = vpack.c.bf16 %v2985_v19, %v2982_v10 }
 0x635   :  { %5381 = vmatpush3.bf16.msra.mxu0 %v5380_v59  ;;  %v2988_v59 = vld [vmem:[#allocation8 + $0x8b0] sm:$0xff] }
 0x636   :  { %5383 = vmatprep.subr.bf16.mxu0 %v5382_v3  ;;  %v2991_v3 = vld [vmem:[#allocation8 + $0x8c8] sm:$0xff] }
 0x637   :  { %v5422_v33 = vpack.c.bf16 %v2991_v3, %v2988_v59 }
 0x639   :  { %5385 = vmatpush3.bf16.msra.mxu0 %v5384_v16  ;;  %v2994_v16 = vld [vmem:[#allocation8 + $0x8e0] sm:$0xff] }
 0x63a   :  { %5387 = vmatprep.subr.bf16.mxu0 %v5386_v0  ;;  %v2997_v0 = vld [vmem:[#allocation8 + $0x8f8] sm:$0xff] }
 0x63b   :  { %v5426_v25 = vpack.c.bf16 %v2997_v0, %v2994_v16 }
 0x63d   :  { %5389 = vmatpush3.bf16.msra.mxu0 %v5388_v52  ;;  %v5428_v52 = vpack.c.bf16 %v2949_v43, %v2946_v1 }
 0x63e   :  { %5391 = vmatprep.subr.bf16.mxu0 %v5390_v5  ;;  %v3000_v5 = vld [vmem:[#allocation8 + $0x910] sm:$0xff] }
 0x63f   :  { %v5431_v18 = vpack.c.bf16 %v3003_v39, %v3000_v5 }
 0x641   :  { %5393 = vmatpush3.bf16.msra.mxu0 %v5392_v49  ;;  %v5434_v49 = vpack.c.bf16 %v3009_v28, %v3006_v24 }
 0x642   :  { %5395 = vmatprep.subr.bf16.mxu0 %v5394_v2  ;;  %v3012_v2 = vld [vmem:[#allocation8 + $0x970] sm:$0xff] }
 0x643   :  { %v5437_v4 = vpack.c.bf16 %v3015_v12, %v3012_v2 }
 0x645   :  { %5397 = vmatpush3.bf16.msra.mxu0 %v5396_v61  ;;  %v5440_v61 = vpack.c.bf16 %v3021_v48, %v3018_v14 }
 0x646   :  { %5399 = vmatprep.subr.bf16.mxu0 %v5398_v37 }
 0x648   :  { %3482 = vmatmul.mubr.f32.vlgmr.msra.gmra.mrb[92].mxu0 %v2705_v17  ;;  %v5412_v17 = vpack.c.bf16 %v2925_v41, %v2922_v9 }
 0x649   :  { %5401 = vmatpush3.bf16.msra.mxu0 %v5400_v45  ;;  %3551 = vmatprep.mubr.f32.mxu0 %v2708_v11  ;;  %v2928_v11 = vld [vmem:[#allocation8 + $0x6d0] sm:$0xff]  ;;  %v5449_v45 = vpack.c.bf16 %v3039_v15, %v3036_v56 }
 0x64a   :  { %5403 = vmatprep.subr.bf16.mxu0 %v5402_v23  ;;  %v5416_v62 = vpack.c.bf16 %v2931_v58, %v2928_v11  ;;  %v3042_v23 = vld [vmem:[#allocation8 + $0xa60] sm:$0xff] }
 0x64b   :  { %v5452_v54 = vpack.c.bf16 %v3045_v53, %v3042_v23 }
 0x64d   :  { %5405 = vmatpush3.bf16.msra.mxu0 %v5404_v30  ;;  %v3050_v30 = vsub.s32 0, %v3049_v35 }
 0x64e   :  { %5407 = vmatprep.subr.bf16.mxu0 %v5406_v7  ;;  %v3046_v7 = vld [vmem:[#allocation11] sm:$0x7] }
 0x64f   :  { %v3051_v36 = vrot.slane %v3046_v7, %v3050_v30  ;;  %v3055_v29 = vrot.slane %v3046_v7, %v3054_v31 }
 0x651   :  { %5409 = vmatpush3.bf16.msra.mxu0 %v5408_v20 }
 0x652   :  { %5411 = vmatprep.subr.bf16.mxu0 %v5410_v44 }
 0x655   :  { %5413 = vmatpush3.bf16.msra.mxu0 %v5412_v17  ;;  %v3059_v17 = vrot.slane %v3046_v7, %v3058_v8 }
 0x656   :  { %5415 = vmatprep.subr.bf16.mxu0 %v5414_v27 }
 0x659   :  { %5417 = vmatpush3.bf16.msra.mxu0 %v5416_v62 }
 0x65a   :  { %5419 = vmatprep.subr.bf16.mxu0 %v5418_v40 }
 0x65d   :  { %5421 = vmatpush3.bf16.msra.mxu0 %v5420_v22 }
 0x65e   :  { %5423 = vmatprep.subr.bf16.mxu0 %v5422_v33 }
 0x661   :  { %5425 = vmatpush3.bf16.msra.mxu0 %v5424_v38 }
 0x662   :  { %5427 = vmatprep.subr.bf16.mxu0 %v5426_v25 }
 0x665   :  { %5429 = vmatpush3.bf16.msra.mxu0 %v5428_v52 }
 0x666   :  { %5430 = vmatprep.subr.bf16.mxu0 %v5900_v50 }
 0x668   :  { %3552 = vmatmul.mubr.f32.vlgmr.msra.gmra.mrb[94].mxu0 %v2707_v32  ;;  %v3027_v32 = vld [vmem:[#allocation8 + $0x9e8] sm:$0xff] }
 0x669   :  { %5432 = vmatpush3.bf16.msra.mxu0 %v5431_v18  ;;  %5029 = vmatprep.mubr.msk.f32.mxu0 %vm5901_vm2, %v5902_v57  ;;  %v5443_v37 = vpack.c.bf16 %v3027_v32, %v3024_v34  ;;  %v3030_v57 = vld [vmem:[#allocation8 + $0xa00] sm:$0xff] }
 0x66a   :  { %5433 = vmatprep.subr.bf16.mxu0 %v5900_v50  ;;  %v5446_v51 = vpack.c.bf16 %v3033_v42, %v3030_v57 }
 0x66d   :  { %5435 = vmatpush3.bf16.msra.mxu0 %v5434_v49 }
 0x66e   :  { %5436 = vmatprep.subr.bf16.mxu0 %v5900_v50 }
 0x671   :  { %5438 = vmatpush3.bf16.msra.mxu0 %v5437_v4 }
 0x672   :  { %5439 = vmatprep.subr.bf16.mxu0 %v5900_v50 }
 0x675   :  { %5441 = vmatpush3.bf16.msra.mxu0 %v5440_v61 }
 0x676   :  { %5442 = vmatprep.subr.bf16.mxu0 %v5900_v50 }
 0x679   :  { %5444 = vmatpush3.bf16.msra.mxu0 %v5443_v37 }
 0x67a   :  { %5445 = vmatprep.subr.bf16.mxu0 %v5900_v50 }
 0x67d   :  { %5447 = vmatpush3.bf16.msra.mxu0 %v5446_v51 }
 0x67e   :  { %5448 = vmatprep.subr.bf16.mxu0 %v5900_v50 }
 0x681   :  { %5450 = vmatpush3.bf16.msra.mxu0 %v5449_v45 }
 0x682   :  { %5451 = vmatprep.subr.bf16.mxu0 %v5900_v50 }
 0x685   :  { %5453 = vmatpush3.bf16.msra.mxu0 %v5452_v54 }
 0x688   :  { %5030 = vmatmul.mubr.f32.vlgmr.msra.gmra.mrb[96].mxu0 %v2709_v26 }
 0x6db   :  { %v3342_v13 = vpop.f32.mrb[88].mxu0 }
 0x6dc   :  { %v5464_v20 = vadd.f32 %v3342_v13, %v3051_v36  ;;  %v3344_v44 = vpop.f32.mrb[89].mxu0 }
 0x6dd   :  { %v5465_v9 = vadd.f32 %v3344_v44, %v3055_v29 }
 0x6de   :  { %3627 = vst [vmem:[#allocation13] sm:$0xff] %v5464_v20 }
 0x6df   :  { %3628 = vst [vmem:[#allocation13 + $0x8] sm:$0xff] %v5465_v9 }
 0x6fb   :  { %v4226_v41 = vpop.f32.mrb[90].mxu0 }
 0x6fc   :  { %v4227_v47 = vpop.f32.mrb[91].mxu0 }
 0x6fd   :  { %v4228_v50 = vadd.f32 %v4227_v47, %v4226_v41 }
 0x6ff   :  { %v3414_v27 = vadd.f32 %v4228_v50, %v3059_v17 }
 0x71b   :  { %v4261_v46 = vpop.f32.mrb[92].mxu0 }
 0x71c   :  { %v4262_v26 = vpop.f32.mrb[93].mxu0 }
 0x71d   :  { %v4263_v11 = vadd.f32 %v4262_v26, %v4261_v46 }
 0x71f   :  { %v3484_v58 = vadd.f32 %v4263_v11, %v3414_v27 }
 0x73b   :  { %v4296_v10 = vpop.f32.mrb[94].mxu0 }
 0x73c   :  { %v4297_v19 = vpop.f32.mrb[95].mxu0 }
 0x73d   :  { %v4298_v62 = vadd.f32 %v4297_v19, %v4296_v10 }
 0x73f   :  { %v3554_v40 = vadd.f32 %v4298_v62, %v3484_v58 }
 0x75b   :  { %v3623_v55 = vpop.f32.mrb[96].mxu0 }
 0x75c   :  { %v3624_v21 = vadd.f32 %v3623_v55, %v3554_v40  ;;  %v5031_v59 = vpop.f32.mrb[97].mxu0 }
 0x75e   :  { %3629 = vst [vmem:[#allocation13 + $0x10] sm:$0xff] %v3624_v21 }
 0x75f   :  { %5869 = shalt.err (!%p5866_p10)
}
 0x760   :  { %s5870_s17 = scalar_lea.hbm %s7286_s7, 384 }
 0x761   :  { %p5871_p11 = scmp.ne.s32.totalorder %s7286_s7, %s5870_s17  ;;  %p5874_p12 = scmp.lt.u32.totalorder %s5870_s17, %s7286_s7 }
 0x763   :  { %p5876_p13 = pnand %p5874_p12, %p5871_p11 }
 0x765   :  { %5879 = shalt.err (!%p5876_p13)
}
 0x766   :  { %3639 = dma.vmem_to_hbm [thread:$0]  %s3637_s10, 384, %s7286_s7, [#allocation4]  }
 0x767   :  { %5888 = dma.done.wait [#allocation4], 384  }
 0x768   :  { %5889 = vsyncadd [#allocation4], 4294966912 }
 0x769   :  { %3643 = vsyncpa [#allocation3], 1 }
 0x76a   :  { %3644 = vsyncpa [#allocation6], 1 }
 0x76b   :  { %3645 = vsyncpa [#allocation9], 1 }
 0x76c   :  { %3646 = vsyncpa [#allocation12], 1 }
 0x76d   :  { %3647 = vsyncpa [#allocation4], 1 }

</bundles_post_ra>
